<compile_context>
chip_gen: v6e
topology: v6e:2x2x1
jax: 0.10.0
libtpu: 0.0.40
codegen_flags: <defaults>
</compile_context>

<pallas_src>
import numpy as np
import jax
import jax.numpy as jnp
from jax.experimental import pallas as pl
from jax.experimental.pallas import tpu as pltpu

BN_EPS = 1e-5

# Static network geometry (matches the PyTorch module).
C_IN, C1, C2, C3 = 1, 16, 32, 1
K1, S1, P1 = 3, 1, 1
K2, S2, P2 = 5, 3, 2


# ---------------------------------------------------------------------------
# Fused kernel
# ---------------------------------------------------------------------------
def _make_encoder_kernel(N, H, HP, WP, M1, M2):
    WC = WP * C1  # lane width of the layer-1 / padded-map rows (=320 here)

    def kernel(x1r_ref, w1b_ref, w2b_ref, w3b_ref,
               g1_ref, be1_ref, g2_ref, be2_ref, b3_ref,
               g1sum_ref, g1exp_ref, g2sum_ref, g2exp_ref, rmask_ref,
               out_ref, xp1_scr):
        f32 = jnp.float32

        # ---- layer 1: Conv(1->16, 3x3, s1, p1) as ONE banded matmul --------
        # x1r: (N*H, K1*W) rows of the 3 vertically-shifted input rows.
        # w1b: (K1*W, WP*C1) banded weight; horizontal taps, horizontal
        #      conv padding AND layer-2's zero pad columns are folded in, so
        #      y1 comes out already in the (row, (w_padded, channel)) layout.
        y1 = jnp.dot(x1r_ref[...], w1b_ref[...],
                     preferred_element_type=f32)            # (N*H, WP*C1)

        # ---- BN1 (batch stats, single pass) + ReLU --------------------------
        cs = jnp.sum(y1, axis=0, keepdims=True)              # (1, WP*C1)
        cq = jnp.sum(y1 * y1, axis=0, keepdims=True)
        s_c = jnp.dot(cs, g1sum_ref[...], preferred_element_type=f32)   # (1, C1)
        q_c = jnp.dot(cq, g1sum_ref[...], preferred_element_type=f32)
        mean = s_c * (1.0 / M1)
        var = q_c * (1.0 / M1) - mean * mean
        scale_c = g1_ref[...] * jax.lax.rsqrt(var + BN_EPS)
        shift_c = be1_ref[...] - mean * scale_c
        # Expand per-channel scale/shift to the 320 lanes; g1exp has zero
        # columns on the pad positions so pad lanes stay exactly 0 after ReLU.
        scale = jnp.dot(scale_c, g1exp_ref[...], preferred_element_type=f32)
        shift = jnp.dot(shift_c, g1exp_ref[...], preferred_element_type=f32)
        y1 = jnp.maximum(y1 * scale + shift, 0.0)

        # ---- scatter into the vertically padded map (halo-only zeroing) -----
        # xp1_scr: (N*HP, WP*C1); interior rows written once, full lane width.
        for n in range(N):
            r0 = n * HP
            xp1_scr[r0:r0 + P2, :] = jnp.zeros((P2, WC), f32)            # top halo
            xp1_scr[r0 + P2 + H:r0 + HP, :] = jnp.zeros((P2, WC), f32)   # bottom halo
            xp1_scr[r0 + P2:r0 + P2 + H, :] = y1[n * H:(n + 1) * H, :]   # interior

        # ---- layer 2: Conv(16->32, 5x5, s3, p2) as K2 row-shifted matmuls ----
        # For each vertical tap dy, take H contiguous padded rows per image and
        # multiply by a block-banded (WP*C1, Wo*C2) weight that encodes the
        # stride-3 horizontal windows.  Row r of the accumulator is the conv
        # output at ho = r/S2 when r % S2 == 0 (other rows are redundant and
        # dropped on the host side).  Conv bias b2 cancels in batch-stats BN.
        acc = None
        for dy in range(K2):
            xa = jnp.concatenate(
                [xp1_scr[n * HP + dy:n * HP + dy + H, :] for n in range(N)],
                axis=0)                                      # (N*H, WP*C1)
            t = jnp.dot(xa, w2b_ref[dy], preferred_element_type=f32)  # (N*H, Wo*C2)
            acc = t if acc is None else acc + t

        # ---- BN2 (batch stats over the M2 valid positions only) + ReLU ------
        m = rmask_ref[...]                                   # (N*H, 1), 1.0 on valid rows
        am = acc * m
        cs2 = jnp.sum(am, axis=0, keepdims=True)             # (1, Wo*C2)
        cq2 = jnp.sum(am * acc, axis=0, keepdims=True)
        s2 = jnp.dot(cs2, g2sum_ref[...], preferred_element_type=f32)   # (1, C2)
        q2 = jnp.dot(cq2, g2sum_ref[...], preferred_element_type=f32)
        mean2 = s2 * (1.0 / M2)
        var2 = q2 * (1.0 / M2) - mean2 * mean2
        scale2_c = g2_ref[...] * jax.lax.rsqrt(var2 + BN_EPS)
        shift2_c = be2_ref[...] - mean2 * scale2_c
        scale2 = jnp.dot(scale2_c, g2exp_ref[...], preferred_element_type=f32)
        shift2 = jnp.dot(shift2_c, g2exp_ref[...], preferred_element_type=f32)
        y2 = jnp.maximum(acc * scale2 + shift2, 0.0)         # (N*H, Wo*C2)

        # ---- layer 3: Conv(32->1, 1x1) as block-diagonal matmul + bias -------
        out_ref[...] = (jnp.dot(y2, w3b_ref[...], preferred_element_type=f32)
                        + b3_ref[...])                       # (N*H, Wo)

    return kernel


# ---------------------------------------------------------------------------
# XLA-side glue: banded/block weight construction (cheap, fuses under jit)
# ---------------------------------------------------------------------------
@jax.jit
def encoder_forward(x_nchw, params):
    x = x_nchw.astype(jnp.float32)
    N, Cin, H, W = x.shape
    Ho = (H + 2 * P2 - K2) // S2 + 1
    Wo = (W + 2 * P2 - K2) // S2 + 1
    HP = H + 2 * P2
    WP = W + 2 * P2
    M1 = N * H * W
    M2 = N * Ho * Wo

    # ---- layer-1 input rows: (N*H, K1*W), column order (dy, iw) -------------
    x3 = x[:, 0, :, :]                                       # (N, H, W)
    xpad = jnp.pad(x3, ((0, 0), (P1, P1), (0, 0)))           # vertical pad only
    x1r = jnp.concatenate([xpad[:, dy:dy + H, :] for dy in range(K1)],
                          axis=-1).reshape(N * H, K1 * W)

    # ---- banded layer-1 weight (K1*W, WP*C1): horizontal taps + h-pad folded -
    sel1 = np.zeros((K1, W, WP), np.float32)
    for dx in range(K1):
        for w_out in range(W):
            iw = w_out + dx - P1
            if 0 <= iw < W:
                sel1[dx, iw, w_out + P2] = 1.0               # pad cols stay zero
    w1r = params["w1"][:, 0, :, :]                           # (C1, K1, K1)
    w1b = jnp.einsum("cyx,xip->yipc", w1r, jnp.asarray(sel1)
                     ).reshape(K1 * W, WP * C1)

    # ---- per-dy block-banded layer-2 weights (K2, WP*C1, Wo*C2) --------------
    sel2 = np.zeros((K2, WP, Wo), np.float32)
    for dx in range(K2):
        for wo in range(Wo):
            sel2[dx, S2 * wo + dx, wo] = 1.0
    w2b = jnp.einsum("ocyx,xpw->ypcwo", params["w2"], jnp.asarray(sel2)
                     ).reshape(K2, WP * C1, Wo * C2)

    # ---- block-diagonal layer-3 weight (Wo*C2, Wo) ---------------------------
    w3v = params["w3"][:, :, 0, 0].reshape(C2)
    w3b = jnp.kron(jnp.eye(Wo, dtype=jnp.float32), w3v.reshape(C2, 1))

    # ---- constant 0/1 selector matrices for BN group-sum / broadcast ---------
    g1sum = np.kron(np.ones((WP, 1), np.float32), np.eye(C1, dtype=np.float32))
    colmask = np.zeros((1, WP), np.float32)
    colmask[0, P2:P2 + W] = 1.0                              # zero on pad columns
    g1exp = np.kron(colmask, np.eye(C1, dtype=np.float32))   # (C1, WP*C1)
    g2sum = np.kron(np.ones((Wo, 1), np.float32), np.eye(C2, dtype=np.float32))
    g2exp = np.kron(np.ones((1, Wo), np.float32), np.eye(C2, dtype=np.float32))
    rmask = ((np.arange(N * H) % H) % S2 == 0).astype(np.float32).reshape(N * H, 1)

    g1 = params["g1"].reshape(1, C1)
    be1 = params["be1"].reshape(1, C1)
    g2 = params["g2"].reshape(1, C2)
    be2 = params["be2"].reshape(1, C2)
    b3 = params["b3"].reshape(1, 1)
    # NOTE: conv biases b1/b2 are intentionally not passed -- exactly cancelled
    # by the batch-statistics BatchNorm (training-mode semantics).

    kernel = _make_encoder_kernel(N, H, HP, WP, M1, M2)
    vmem = pl.BlockSpec(memory_space=pltpu.MemorySpace.VMEM)
    out = pl.pallas_call(
        kernel,
        out_shape=jax.ShapeDtypeStruct((N * H, Wo), jnp.float32),
        in_specs=[vmem] * 14,
        out_specs=vmem,
        scratch_shapes=[pltpu.VMEM((N * HP, WP * C1), jnp.float32)],
    )(x1r, w1b, w2b, w3b, g1, be1, g2, be2, b3,
      jnp.asarray(g1sum), jnp.asarray(g1exp),
      jnp.asarray(g2sum), jnp.asarray(g2exp), jnp.asarray(rmask))

    # Keep only the stride-aligned rows and relayout to NCHW.
    y = out.reshape(N, H, Wo)[:, :S2 * Ho:S2, :]             # (N, Ho, Wo)
    return y[:, None, :, :]                                  # (N, 1, Ho, Wo)


# ---------------------------------------------------------------------------
# Parameters (deterministic synthetic init, PyTorch-shaped)
# ---------------------------------------------------------------------------
def init_params(key):
    ks = jax.random.split(key, 6)
    return dict(
        w1=0.20 * jax.random.normal(ks[0], (C1, C_IN, K1, K1), jnp.float32),
        b1=0.10 * jax.random.normal(ks[1], (C1,), jnp.float32),
        g1=jnp.ones((C1,), jnp.float32),
        be1=jnp.zeros((C1,), jnp.float32),
        w2=0.05 * jax.random.normal(ks[2], (C2, C1, K2, K2), jnp.float32),
        b2=0.05 * jax.random.normal(ks[3], (C2,), jnp.float32),
        g2=jnp.ones((C2,), jnp.float32),
        be2=jnp.zeros((C2,), jnp.float32),
        w3=0.20 * jax.random.normal(ks[4], (C3, C2, 1, 1), jnp.float32),
        b3=0.10 * jax.random.normal(ks[5], (C3,), jnp.float32),
    )


# ---------------------------------------------------------------------------
# Pure-JAX reference (numeric sanity check; applies b1/b2, which cancel in BN)
# ---------------------------------------------------------------------------
def encoder_ref(x_nchw, params):
    def conv(x, w, b, stride, pad):
        y = jax.lax.conv_general_dilated(
            x, w, (stride, stride), [(pad, pad), (pad, pad)],
            dimension_numbers=("NCHW", "OIHW", "NCHW"),
        )
        return y + b.reshape(1, -1, 1, 1)

    def bn_relu(y, g, be):
        mean = jnp.mean(y, axis=(0, 2, 3), keepdims=True)
        var = jnp.mean(jnp.square(y - mean), axis=(0, 2, 3), keepdims=True)
        yn = (y - mean) * jax.lax.rsqrt(var + BN_EPS)
        return jnp.maximum(yn * g.reshape(1, -1, 1, 1) + be.reshape(1, -1, 1, 1), 0.0)

    y = bn_relu(conv(x_nchw, params["w1"], params["b1"], S1, P1),
                params["g1"], params["be1"])
    y = bn_relu(conv(y, params["w2"], params["b2"], S2, P2),
                params["g2"], params["be2"])
    return conv(y, params["w3"], params["b3"], 1, 0)


if __name__ == "__main__":
    key = jax.random.PRNGKey(0)
    k_x, k_p = jax.random.split(key)
    x = jax.random.normal(k_x, (2, 1, 16, 16), jnp.float32)   # NCHW, like PyTorch
    params = init_params(k_p)

    out = jax.block_until_ready(encoder_forward(x, params))
    ref = jax.block_until_ready(encoder_ref(x, params))

    assert out.shape == (2, 1, 6, 6), out.shape
    assert jnp.allclose(out, ref, rtol=2e-4, atol=2e-4), float(
        jnp.max(jnp.abs(out - ref))
    )
    print("KERNEL_OK")
</pallas_src>

<mosaic_0001>
module attributes {stable_mosaic.version = 11 : i64} {
  func.func @kernel(%arg0: memref<32x48xf32, #tpu.memory_space<vmem>>, %arg1: memref<48x320xf32, #tpu.memory_space<vmem>>, %arg2: memref<5x320x192xf32, #tpu.memory_space<vmem>>, %arg3: memref<192x6xf32, #tpu.memory_space<vmem>>, %arg4: memref<1x16xf32, #tpu.memory_space<vmem>>, %arg5: memref<1x16xf32, #tpu.memory_space<vmem>>, %arg6: memref<1x32xf32, #tpu.memory_space<vmem>>, %arg7: memref<1x32xf32, #tpu.memory_space<vmem>>, %arg8: memref<1x1xf32, #tpu.memory_space<vmem>>, %arg9: memref<320x16xf32, #tpu.memory_space<vmem>>, %arg10: memref<16x320xf32, #tpu.memory_space<vmem>>, %arg11: memref<192x32xf32, #tpu.memory_space<vmem>>, %arg12: memref<32x192xf32, #tpu.memory_space<vmem>>, %arg13: memref<32x1xf32, #tpu.memory_space<vmem>>, %arg14: memref<32x6xf32, #tpu.memory_space<vmem>>, %arg15: memref<40x320xf32, #tpu.memory_space<vmem>>) attributes {dimension_semantics = [], scalar_prefetch = 0 : i64, scratch_operands = 1 : i64, tpu.core_type = #tpu.core_type<tc>} {
    %c0 = arith.constant 0 : index
    %c0_0 = arith.constant 0 : index
    %0 = vector.load %arg0[%c0, %c0_0] : memref<32x48xf32, #tpu.memory_space<vmem>>, vector<32x48xf32>
    %c0_1 = arith.constant 0 : index
    %c0_2 = arith.constant 0 : index
    %1 = vector.load %arg1[%c0_1, %c0_2] : memref<48x320xf32, #tpu.memory_space<vmem>>, vector<48x320xf32>
    %cst = arith.constant dense<0.000000e+00> : vector<32x320xf32>
    %2 = tpu.matmul %0, %1, %cst {dimension_numbers = #tpu.dot_dimension_numbers<[1], [0], [0], [1], [0, 0, 1, 1], [], []>} : vector<32x48xf32>, vector<48x320xf32>, vector<32x320xf32> -> vector<32x320xf32>
    %cst_3 = arith.constant dense<0.000000e+00> : vector<320xf32>
    %3 = vector.multi_reduction <add>, %2, %cst_3 [0] : vector<32x320xf32> to vector<320xf32>
    %4 = vector.shape_cast %3 : vector<320xf32> to vector<1x320xf32>
    %5 = arith.mulf %2, %2 : vector<32x320xf32>
    %cst_4 = arith.constant dense<0.000000e+00> : vector<320xf32>
    %6 = vector.multi_reduction <add>, %5, %cst_4 [0] : vector<32x320xf32> to vector<320xf32>
    %7 = vector.shape_cast %6 : vector<320xf32> to vector<1x320xf32>
    %c0_5 = arith.constant 0 : index
    %c0_6 = arith.constant 0 : index
    %8 = vector.load %arg9[%c0_5, %c0_6] : memref<320x16xf32, #tpu.memory_space<vmem>>, vector<320x16xf32>
    %cst_7 = arith.constant dense<0.000000e+00> : vector<1x16xf32>
    %9 = tpu.matmul %4, %8, %cst_7 {dimension_numbers = #tpu.dot_dimension_numbers<[1], [0], [0], [1], [0, 0, 1, 1], [], []>} : vector<1x320xf32>, vector<320x16xf32>, vector<1x16xf32> -> vector<1x16xf32>
    %c0_8 = arith.constant 0 : index
    %c0_9 = arith.constant 0 : index
    %10 = vector.load %arg9[%c0_8, %c0_9] : memref<320x16xf32, #tpu.memory_space<vmem>>, vector<320x16xf32>
    %cst_10 = arith.constant dense<0.000000e+00> : vector<1x16xf32>
    %11 = tpu.matmul %7, %10, %cst_10 {dimension_numbers = #tpu.dot_dimension_numbers<[1], [0], [0], [1], [0, 0, 1, 1], [], []>} : vector<1x320xf32>, vector<320x16xf32>, vector<1x16xf32> -> vector<1x16xf32>
    %cst_11 = arith.constant 0.001953125 : f32
    %12 = vector.broadcast %cst_11 : f32 to vector<1x16xf32>
    %13 = arith.mulf %9, %12 : vector<1x16xf32>
    %cst_12 = arith.constant 0.001953125 : f32
    %14 = vector.broadcast %cst_12 : f32 to vector<1x16xf32>
    %15 = arith.mulf %11, %14 : vector<1x16xf32>
    %16 = arith.mulf %13, %13 : vector<1x16xf32>
    %17 = arith.subf %15, %16 : vector<1x16xf32>
    %c0_13 = arith.constant 0 : index
    %c0_14 = arith.constant 0 : index
    %18 = vector.load %arg4[%c0_13, %c0_14] : memref<1x16xf32, #tpu.memory_space<vmem>>, vector<1x16xf32>
    %cst_15 = arith.constant 9.99999974E-6 : f32
    %19 = vector.broadcast %cst_15 : f32 to vector<1x16xf32>
    %20 = arith.addf %17, %19 : vector<1x16xf32>
    %21 = math.rsqrt %20 : vector<1x16xf32>
    %22 = arith.mulf %18, %21 : vector<1x16xf32>
    %c0_16 = arith.constant 0 : index
    %c0_17 = arith.constant 0 : index
    %23 = vector.load %arg5[%c0_16, %c0_17] : memref<1x16xf32, #tpu.memory_space<vmem>>, vector<1x16xf32>
    %24 = arith.mulf %13, %22 : vector<1x16xf32>
    %25 = arith.subf %23, %24 : vector<1x16xf32>
    %c0_18 = arith.constant 0 : index
    %c0_19 = arith.constant 0 : index
    %26 = vector.load %arg10[%c0_18, %c0_19] : memref<16x320xf32, #tpu.memory_space<vmem>>, vector<16x320xf32>
    %cst_20 = arith.constant dense<0.000000e+00> : vector<1x320xf32>
    %27 = tpu.matmul %22, %26, %cst_20 {dimension_numbers = #tpu.dot_dimension_numbers<[1], [0], [0], [1], [0, 0, 1, 1], [], []>} : vector<1x16xf32>, vector<16x320xf32>, vector<1x320xf32> -> vector<1x320xf32>
    %c0_21 = arith.constant 0 : index
    %c0_22 = arith.constant 0 : index
    %28 = vector.load %arg10[%c0_21, %c0_22] : memref<16x320xf32, #tpu.memory_space<vmem>>, vector<16x320xf32>
    %cst_23 = arith.constant dense<0.000000e+00> : vector<1x320xf32>
    %29 = tpu.matmul %25, %28, %cst_23 {dimension_numbers = #tpu.dot_dimension_numbers<[1], [0], [0], [1], [0, 0, 1, 1], [], []>} : vector<1x16xf32>, vector<16x320xf32>, vector<1x320xf32> -> vector<1x320xf32>
    %30 = vector.broadcast %27 : vector<1x320xf32> to vector<32x320xf32>
    %31 = arith.mulf %2, %30 : vector<32x320xf32>
    %32 = vector.broadcast %29 : vector<1x320xf32> to vector<32x320xf32>
    %33 = arith.addf %31, %32 : vector<32x320xf32>
    %cst_24 = arith.constant 0.000000e+00 : f32
    %34 = vector.broadcast %cst_24 : f32 to vector<32x320xf32>
    %35 = arith.maximumf %33, %34 : vector<32x320xf32>
    %cst_25 = arith.constant 0.000000e+00 : f32
    %36 = vector.broadcast %cst_25 : f32 to vector<2x320xf32>
    %c0_26 = arith.constant 0 : index
    %c0_27 = arith.constant 0 : index
    %37 = vector.load %arg15[%c0_26, %c0_27] : memref<40x320xf32, #tpu.memory_space<vmem>>, vector<2x320xf32>
    tpu.vector_store %arg15[%c0_26, %c0_27], %36 {strides = array<i32>} : memref<40x320xf32, #tpu.memory_space<vmem>>, vector<2x320xf32>,
    %cst_28 = arith.constant 0.000000e+00 : f32
    %38 = vector.broadcast %cst_28 : f32 to vector<2x320xf32>
    %c18 = arith.constant 18 : index
    %c0_29 = arith.constant 0 : index
    %39 = vector.load %arg15[%c18, %c0_29] : memref<40x320xf32, #tpu.memory_space<vmem>>, vector<2x320xf32>
    tpu.vector_store %arg15[%c18, %c0_29], %38 {strides = array<i32>} : memref<40x320xf32, #tpu.memory_space<vmem>>, vector<2x320xf32>,
    %40 = vector.extract_strided_slice %35 {offsets = [0, 0], sizes = [16, 320], strides = [1, 1]} : vector<32x320xf32> to vector<16x320xf32>
    %c2 = arith.constant 2 : index
    %c0_30 = arith.constant 0 : index
    %41 = vector.load %arg15[%c2, %c0_30] : memref<40x320xf32, #tpu.memory_space<vmem>>, vector<16x320xf32>
    tpu.vector_store %arg15[%c2, %c0_30], %40 {strides = array<i32>} : memref<40x320xf32, #tpu.memory_space<vmem>>, vector<16x320xf32>,
    %cst_31 = arith.constant 0.000000e+00 : f32
    %42 = vector.broadcast %cst_31 : f32 to vector<2x320xf32>
    %c20 = arith.constant 20 : index
    %c0_32 = arith.constant 0 : index
    %43 = vector.load %arg15[%c20, %c0_32] : memref<40x320xf32, #tpu.memory_space<vmem>>, vector<2x320xf32>
    tpu.vector_store %arg15[%c20, %c0_32], %42 {strides = array<i32>} : memref<40x320xf32, #tpu.memory_space<vmem>>, vector<2x320xf32>,
    %cst_33 = arith.constant 0.000000e+00 : f32
    %44 = vector.broadcast %cst_33 : f32 to vector<2x320xf32>
    %c38 = arith.constant 38 : index
    %c0_34 = arith.constant 0 : index
    %45 = vector.load %arg15[%c38, %c0_34] : memref<40x320xf32, #tpu.memory_space<vmem>>, vector<2x320xf32>
    tpu.vector_store %arg15[%c38, %c0_34], %44 {strides = array<i32>} : memref<40x320xf32, #tpu.memory_space<vmem>>, vector<2x320xf32>,
    %46 = vector.extract_strided_slice %35 {offsets = [16, 0], sizes = [16, 320], strides = [1, 1]} : vector<32x320xf32> to vector<16x320xf32>
    %c22 = arith.constant 22 : index
    %c0_35 = arith.constant 0 : index
    %47 = vector.load %arg15[%c22, %c0_35] : memref<40x320xf32, #tpu.memory_space<vmem>>, vector<16x320xf32>
    tpu.vector_store %arg15[%c22, %c0_35], %46 {strides = array<i32>} : memref<40x320xf32, #tpu.memory_space<vmem>>, vector<16x320xf32>,
    %c0_36 = arith.constant 0 : index
    %c0_37 = arith.constant 0 : index
    %48 = vector.load %arg15[%c0_36, %c0_37] : memref<40x320xf32, #tpu.memory_space<vmem>>, vector<16x320xf32>
    %c20_38 = arith.constant 20 : index
    %c0_39 = arith.constant 0 : index
    %49 = vector.load %arg15[%c20_38, %c0_39] : memref<40x320xf32, #tpu.memory_space<vmem>>, vector<16x320xf32>
    %50 = tpu.concatenate %48, %49 in 0 : vector<16x320xf32>, vector<16x320xf32> -> vector<32x320xf32>
    %c0_40 = arith.constant 0 : index
    %c0_41 = arith.constant 0 : index
    %c0_42 = arith.constant 0 : index
    %51 = vector.load %arg2[%c0_40, %c0_41, %c0_42] : memref<5x320x192xf32, #tpu.memory_space<vmem>>, vector<1x320x192xf32>
    %52 = vector.shape_cast %51 : vector<1x320x192xf32> to vector<320x192xf32>
    %cst_43 = arith.constant dense<0.000000e+00> : vector<32x192xf32>
    %53 = tpu.matmul %50, %52, %cst_43 {dimension_numbers = #tpu.dot_dimension_numbers<[1], [0], [0], [1], [0, 0, 1, 1], [], []>} : vector<32x320xf32>, vector<320x192xf32>, vector<32x192xf32> -> vector<32x192xf32>
    %c1 = arith.constant 1 : index
    %c0_44 = arith.constant 0 : index
    %54 = vector.load %arg15[%c1, %c0_44] : memref<40x320xf32, #tpu.memory_space<vmem>>, vector<16x320xf32>
    %c21 = arith.constant 21 : index
    %c0_45 = arith.constant 0 : index
    %55 = vector.load %arg15[%c21, %c0_45] : memref<40x320xf32, #tpu.memory_space<vmem>>, vector<16x320xf32>
    %56 = tpu.concatenate %54, %55 in 0 : vector<16x320xf32>, vector<16x320xf32> -> vector<32x320xf32>
    %c1_46 = arith.constant 1 : index
    %c0_47 = arith.constant 0 : index
    %c0_48 = arith.constant 0 : index
    %57 = vector.load %arg2[%c1_46, %c0_47, %c0_48] : memref<5x320x192xf32, #tpu.memory_space<vmem>>, vector<1x320x192xf32>
    %58 = vector.shape_cast %57 : vector<1x320x192xf32> to vector<320x192xf32>
    %cst_49 = arith.constant dense<0.000000e+00> : vector<32x192xf32>
    %59 = tpu.matmul %56, %58, %cst_49 {dimension_numbers = #tpu.dot_dimension_numbers<[1], [0], [0], [1], [0, 0, 1, 1], [], []>} : vector<32x320xf32>, vector<320x192xf32>, vector<32x192xf32> -> vector<32x192xf32>
    %60 = arith.addf %53, %59 : vector<32x192xf32>
    %c2_50 = arith.constant 2 : index
    %c0_51 = arith.constant 0 : index
    %61 = vector.load %arg15[%c2_50, %c0_51] : memref<40x320xf32, #tpu.memory_space<vmem>>, vector<16x320xf32>
    %c22_52 = arith.constant 22 : index
    %c0_53 = arith.constant 0 : index
    %62 = vector.load %arg15[%c22_52, %c0_53] : memref<40x320xf32, #tpu.memory_space<vmem>>, vector<16x320xf32>
    %63 = tpu.concatenate %61, %62 in 0 : vector<16x320xf32>, vector<16x320xf32> -> vector<32x320xf32>
    %c2_54 = arith.constant 2 : index
    %c0_55 = arith.constant 0 : index
    %c0_56 = arith.constant 0 : index
    %64 = vector.load %arg2[%c2_54, %c0_55, %c0_56] : memref<5x320x192xf32, #tpu.memory_space<vmem>>, vector<1x320x192xf32>
    %65 = vector.shape_cast %64 : vector<1x320x192xf32> to vector<320x192xf32>
    %cst_57 = arith.constant dense<0.000000e+00> : vector<32x192xf32>
    %66 = tpu.matmul %63, %65, %cst_57 {dimension_numbers = #tpu.dot_dimension_numbers<[1], [0], [0], [1], [0, 0, 1, 1], [], []>} : vector<32x320xf32>, vector<320x192xf32>, vector<32x192xf32> -> vector<32x192xf32>
    %67 = arith.addf %60, %66 : vector<32x192xf32>
    %c3 = arith.constant 3 : index
    %c0_58 = arith.constant 0 : index
    %68 = vector.load %arg15[%c3, %c0_58] : memref<40x320xf32, #tpu.memory_space<vmem>>, vector<16x320xf32>
    %c23 = arith.constant 23 : index
    %c0_59 = arith.constant 0 : index
    %69 = vector.load %arg15[%c23, %c0_59] : memref<40x320xf32, #tpu.memory_space<vmem>>, vector<16x320xf32>
    %70 = tpu.concatenate %68, %69 in 0 : vector<16x320xf32>, vector<16x320xf32> -> vector<32x320xf32>
    %c3_60 = arith.constant 3 : index
    %c0_61 = arith.constant 0 : index
    %c0_62 = arith.constant 0 : index
    %71 = vector.load %arg2[%c3_60, %c0_61, %c0_62] : memref<5x320x192xf32, #tpu.memory_space<vmem>>, vector<1x320x192xf32>
    %72 = vector.shape_cast %71 : vector<1x320x192xf32> to vector<320x192xf32>
    %cst_63 = arith.constant dense<0.000000e+00> : vector<32x192xf32>
    %73 = tpu.matmul %70, %72, %cst_63 {dimension_numbers = #tpu.dot_dimension_numbers<[1], [0], [0], [1], [0, 0, 1, 1], [], []>} : vector<32x320xf32>, vector<320x192xf32>, vector<32x192xf32> -> vector<32x192xf32>
    %74 = arith.addf %67, %73 : vector<32x192xf32>
    %c4 = arith.constant 4 : index
    %c0_64 = arith.constant 0 : index
    %75 = vector.load %arg15[%c4, %c0_64] : memref<40x320xf32, #tpu.memory_space<vmem>>, vector<16x320xf32>
    %c24 = arith.constant 24 : index
    %c0_65 = arith.constant 0 : index
    %76 = vector.load %arg15[%c24, %c0_65] : memref<40x320xf32, #tpu.memory_space<vmem>>, vector<16x320xf32>
    %77 = tpu.concatenate %75, %76 in 0 : vector<16x320xf32>, vector<16x320xf32> -> vector<32x320xf32>
    %c4_66 = arith.constant 4 : index
    %c0_67 = arith.constant 0 : index
    %c0_68 = arith.constant 0 : index
    %78 = vector.load %arg2[%c4_66, %c0_67, %c0_68] : memref<5x320x192xf32, #tpu.memory_space<vmem>>, vector<1x320x192xf32>
    %79 = vector.shape_cast %78 : vector<1x320x192xf32> to vector<320x192xf32>
    %cst_69 = arith.constant dense<0.000000e+00> : vector<32x192xf32>
    %80 = tpu.matmul %77, %79, %cst_69 {dimension_numbers = #tpu.dot_dimension_numbers<[1], [0], [0], [1], [0, 0, 1, 1], [], []>} : vector<32x320xf32>, vector<320x192xf32>, vector<32x192xf32> -> vector<32x192xf32>
    %81 = arith.addf %74, %80 : vector<32x192xf32>
    %c0_70 = arith.constant 0 : index
    %c0_71 = arith.constant 0 : index
    %82 = vector.load %arg13[%c0_70, %c0_71] : memref<32x1xf32, #tpu.memory_space<vmem>>, vector<32x1xf32>
    %83 = vector.broadcast %82 : vector<32x1xf32> to vector<32x192xf32>
    %84 = arith.mulf %81, %83 : vector<32x192xf32>
    %cst_72 = arith.constant dense<0.000000e+00> : vector<192xf32>
    %85 = vector.multi_reduction <add>, %84, %cst_72 [0] : vector<32x192xf32> to vector<192xf32>
    %86 = vector.shape_cast %85 : vector<192xf32> to vector<1x192xf32>
    %87 = arith.mulf %84, %81 : vector<32x192xf32>
    %cst_73 = arith.constant dense<0.000000e+00> : vector<192xf32>
    %88 = vector.multi_reduction <add>, %87, %cst_73 [0] : vector<32x192xf32> to vector<192xf32>
    %89 = vector.shape_cast %88 : vector<192xf32> to vector<1x192xf32>
    %c0_74 = arith.constant 0 : index
    %c0_75 = arith.constant 0 : index
    %90 = vector.load %arg11[%c0_74, %c0_75] : memref<192x32xf32, #tpu.memory_space<vmem>>, vector<192x32xf32>
    %cst_76 = arith.constant dense<0.000000e+00> : vector<1x32xf32>
    %91 = tpu.matmul %86, %90, %cst_76 {dimension_numbers = #tpu.dot_dimension_numbers<[1], [0], [0], [1], [0, 0, 1, 1], [], []>} : vector<1x192xf32>, vector<192x32xf32>, vector<1x32xf32> -> vector<1x32xf32>
    %c0_77 = arith.constant 0 : index
    %c0_78 = arith.constant 0 : index
    %92 = vector.load %arg11[%c0_77, %c0_78] : memref<192x32xf32, #tpu.memory_space<vmem>>, vector<192x32xf32>
    %cst_79 = arith.constant dense<0.000000e+00> : vector<1x32xf32>
    %93 = tpu.matmul %89, %92, %cst_79 {dimension_numbers = #tpu.dot_dimension_numbers<[1], [0], [0], [1], [0, 0, 1, 1], [], []>} : vector<1x192xf32>, vector<192x32xf32>, vector<1x32xf32> -> vector<1x32xf32>
    %cst_80 = arith.constant 0.013888889 : f32
    %94 = vector.broadcast %cst_80 : f32 to vector<1x32xf32>
    %95 = arith.mulf %91, %94 : vector<1x32xf32>
    %cst_81 = arith.constant 0.013888889 : f32
    %96 = vector.broadcast %cst_81 : f32 to vector<1x32xf32>
    %97 = arith.mulf %93, %96 : vector<1x32xf32>
    %98 = arith.mulf %95, %95 : vector<1x32xf32>
    %99 = arith.subf %97, %98 : vector<1x32xf32>
    %c0_82 = arith.constant 0 : index
    %c0_83 = arith.constant 0 : index
    %100 = vector.load %arg6[%c0_82, %c0_83] : memref<1x32xf32, #tpu.memory_space<vmem>>, vector<1x32xf32>
    %cst_84 = arith.constant 9.99999974E-6 : f32
    %101 = vector.broadcast %cst_84 : f32 to vector<1x32xf32>
    %102 = arith.addf %99, %101 : vector<1x32xf32>
    %103 = math.rsqrt %102 : vector<1x32xf32>
    %104 = arith.mulf %100, %103 : vector<1x32xf32>
    %c0_85 = arith.constant 0 : index
    %c0_86 = arith.constant 0 : index
    %105 = vector.load %arg7[%c0_85, %c0_86] : memref<1x32xf32, #tpu.memory_space<vmem>>, vector<1x32xf32>
    %106 = arith.mulf %95, %104 : vector<1x32xf32>
    %107 = arith.subf %105, %106 : vector<1x32xf32>
    %c0_87 = arith.constant 0 : index
    %c0_88 = arith.constant 0 : index
    %108 = vector.load %arg12[%c0_87, %c0_88] : memref<32x192xf32, #tpu.memory_space<vmem>>, vector<32x192xf32>
    %cst_89 = arith.constant dense<0.000000e+00> : vector<1x192xf32>
    %109 = tpu.matmul %104, %108, %cst_89 {dimension_numbers = #tpu.dot_dimension_numbers<[1], [0], [0], [1], [0, 0, 1, 1], [], []>} : vector<1x32xf32>, vector<32x192xf32>, vector<1x192xf32> -> vector<1x192xf32>
    %c0_90 = arith.constant 0 : index
    %c0_91 = arith.constant 0 : index
    %110 = vector.load %arg12[%c0_90, %c0_91] : memref<32x192xf32, #tpu.memory_space<vmem>>, vector<32x192xf32>
    %cst_92 = arith.constant dense<0.000000e+00> : vector<1x192xf32>
    %111 = tpu.matmul %107, %110, %cst_92 {dimension_numbers = #tpu.dot_dimension_numbers<[1], [0], [0], [1], [0, 0, 1, 1], [], []>} : vector<1x32xf32>, vector<32x192xf32>, vector<1x192xf32> -> vector<1x192xf32>
    %112 = vector.broadcast %109 : vector<1x192xf32> to vector<32x192xf32>
    %113 = arith.mulf %81, %112 : vector<32x192xf32>
    %114 = vector.broadcast %111 : vector<1x192xf32> to vector<32x192xf32>
    %115 = arith.addf %113, %114 : vector<32x192xf32>
    %cst_93 = arith.constant 0.000000e+00 : f32
    %116 = vector.broadcast %cst_93 : f32 to vector<32x192xf32>
    %117 = arith.maximumf %115, %116 : vector<32x192xf32>
    %c0_94 = arith.constant 0 : index
    %c0_95 = arith.constant 0 : index
    %118 = vector.load %arg3[%c0_94, %c0_95] : memref<192x6xf32, #tpu.memory_space<vmem>>, vector<192x6xf32>
    %cst_96 = arith.constant dense<0.000000e+00> : vector<32x6xf32>
    %119 = tpu.matmul %117, %118, %cst_96 {dimension_numbers = #tpu.dot_dimension_numbers<[1], [0], [0], [1], [0, 0, 1, 1], [], []>} : vector<32x192xf32>, vector<192x6xf32>, vector<32x6xf32> -> vector<32x6xf32>
    %c0_97 = arith.constant 0 : index
    %c0_98 = arith.constant 0 : index
    %120 = vector.load %arg8[%c0_97, %c0_98] : memref<1x1xf32, #tpu.memory_space<vmem>>, vector<1x1xf32>
    %121 = vector.broadcast %120 : vector<1x1xf32> to vector<32x6xf32>
    %122 = arith.addf %119, %121 : vector<32x6xf32>
    %c0_99 = arith.constant 0 : index
    %c0_100 = arith.constant 0 : index
    %123 = vector.load %arg14[%c0_99, %c0_100] : memref<32x6xf32, #tpu.memory_space<vmem>>, vector<32x6xf32>
    tpu.vector_store %arg14[%c0_99, %c0_100], %122 {strides = array<i32>} : memref<32x6xf32, #tpu.memory_space<vmem>>, vector<32x6xf32>,
    return
  }
}

</mosaic_0001>

<bundles_post_ra>
// kernel: encoder_forward.1
= control target key start
LH: loop header
LB: loop body
LE: loop exit
PB: predicated region body
PF: predicated region fallthrough
CT: control target
= control target key end

     0   :  { %v6335_v3 = vmov 0.0   ;;  %vm71_vm0 = vcmask 392192   ;;  %vm3897_vm1 = vmmov 0   ;;  %vm276_vm2 = vcmask 523264   ;;  %s6320_s1 = inlined_call_operand.vmem [shape: f32[48,320], index: 1, kind: input, shape index: {}]   ;;  %s6321_s0 = inlined_call_operand.vmem [shape: f32[32,48], index: 0, kind: input, shape index: {}]   ;;  %s6322_s9 = inlined_call_operand.vmem [shape: f32[320,16], index: 9, kind: input, shape index: {}]   ;;  %s6323_s10 = inlined_call_operand.vmem [shape: f32[16,320], index: 10, kind: input, shape index: {}]   ;;  %s6324_s4 = inlined_call_operand.vmem [shape: f32[1,16], index: 4, kind: input, shape index: {}]   ;;  %s6325_s5 = inlined_call_operand.vmem [shape: f32[1,16], index: 5, kind: input, shape index: {}]   ;;  %s6326_s2 = inlined_call_operand.vmem [shape: f32[5,320,192], index: 2, kind: input, shape index: {}]   ;;  %s6327_s8 = inlined_call_operand.<no memory space> [shape: f32[1,1], index: 8, kind: input, shape index: {}]   ;;  %s6328_s13 = inlined_call_operand.vmem [shape: f32[32,1], index: 13, kind: input, shape index: {}]   ;;  %s6329_s11 = inlined_call_operand.vmem [shape: f32[192,32], index: 11, kind: input, shape index: {}]   ;;  %s6330_s12 = inlined_call_operand.vmem [shape: f32[32,192], index: 12, kind: input, shape index: {}]   ;;  %s6331_s6 = inlined_call_operand.vmem [shape: f32[1,32], index: 6, kind: input, shape index: {}]   ;;  %s6332_s7 = inlined_call_operand.vmem [shape: f32[1,32], index: 7, kind: input, shape index: {}]   ;;  %s6333_s3 = inlined_call_operand.vmem [shape: f32[192,6], index: 3, kind: input, shape index: {}]   ;;  %s6334_s14 = inlined_call_operand.vmem [shape: f32[32,6], index: 14, kind: output, shape index: {}]  }
   0x1   :  { %v69_v0 = vld [vmem:[%s6320_s1 + $0x80] sm:$0xff]  ;;  %v68_v1 = vld [vmem:[%s6320_s1 + $0x78] sm:$0xff]  ;;  %v66_v2 = vld [vmem:[%s6320_s1 + $0x68] sm:$0xff]  ;;  %148 = vmatprep.mubr.f32.mxu0 %v6335_v3  ;;  %1025 = vst [vmem:[#allocation2] sm:$0x3] %v6335_v3  ;;  %3829 = vmatprep.subr.mxu1 %v6335_v3  ;;  %vm676_vm3 = vcmask 130048  }
   0x2   :  { %1026 = vst [vmem:[#allocation2 + $0x8] sm:$0x3] %v6335_v3  ;;  %1029 = vst [vmem:[#allocation2 + $0x30] sm:$0xc] %v6335_v3  ;;  %104 = vmatprep.subr.mxu0 %v69_v0  ;;  %v65_v4 = vld [vmem:[%s6320_s1 + $0x60] sm:$0xff]  ;;  %v63_v5 = vld [vmem:[%s6320_s1 + $0x50] sm:$0xff]  ;;  %3845 = vmatprep.mubr.msk.f32.mxu1 %vm3897_vm1, %v6335_v3 }
   0x3   :  { %1030 = vst [vmem:[#allocation2 + $0x38] sm:$0xc] %v6335_v3  ;;  %1068 = vst [vmem:[#allocation2 + $0x30] sm:$0x30] %v6335_v3  ;;  %105 = vmatpush1.msra.mxu0 %v68_v1  ;;  %v62_v6 = vld [vmem:[%s6320_s1 + $0x48] sm:$0xff]  ;;  %v60_v7 = vld [vmem:[%s6320_s1 + $0x38] sm:$0xff] }
   0x4   :  { %1069 = vst [vmem:[#allocation2 + $0x38] sm:$0x30] %v6335_v3  ;;  %1072 = vst [vmem:[#allocation2 + $0x60] sm:$0xc0] %v6335_v3  ;;  %106 = vmatprep.subr.mxu0 %v66_v2  ;;  %v59_v8 = vld [vmem:[%s6320_s1 + $0x30] sm:$0xff]  ;;  %v57_v9 = vld [vmem:[%s6320_s1 + $0x20] sm:$0xff] }
   0x5   :  { %1073 = vst [vmem:[#allocation2 + $0x68] sm:$0xc0] %v6335_v3  ;;  %107 = vmatpush1.msra.mxu0 %v65_v4  ;;  %v56_v10 = vld [vmem:[%s6320_s1 + $0x18] sm:$0xff]  ;;  %v54_v11 = vld [vmem:[%s6320_s1 + $0x8] sm:$0xff]  ;;  %v53_v12 = vld [vmem:[%s6320_s1] sm:$0xff]  ;;  %vm1027_vm4 = vcmask 517120  }
   0x6   :  { %108 = vmatprep.subr.mxu0 %v63_v5  ;;  %v49_v13 = vld [vmem:[%s6321_s0] sm:$0xff]  ;;  %v70_v14 = vld [vmem:[%s6320_s1 + $0x88] sm:$0xff]  ;;  %v67_v15 = vld [vmem:[%s6320_s1 + $0x70] sm:$0xff]  ;;  %vm1074_vm5 = vcmask 523270   ;;  %vm1070_vm6 = vcmask 521220   ;;  %vm1031_vm7 = vcmask 519170  }
   0x7   :  { %109 = vmatpush1.msra.mxu0 %v62_v6  ;;  %v50_v16 = vld [vmem:[%s6321_s0 + $0x8] sm:$0xff]  ;;  %v64_v17 = vld [vmem:[%s6320_s1 + $0x58] sm:$0xff]  ;;  %v61_v18 = vld [vmem:[%s6320_s1 + $0x40] sm:$0xff]  ;;  %vm1039_vm8 = vcmask 1041408   ;;  %vm1082_vm9 = vcmask 1045504   ;;  %vm1060_vm10 = vcmask 523266  }
   0x8   :  { %110 = vmatprep.subr.mxu0 %v60_v7  ;;  %v51_v19 = vld [vmem:[%s6321_s0 + $0x10] sm:$0xff]  ;;  %v58_v20 = vld [vmem:[%s6320_s1 + $0x28] sm:$0xff]  ;;  %v52_v22 = vld [vmem:[%s6321_s0 + $0x18] sm:$0xff]  ;;  %vm1109_vm11 = vcmask 521216   ;;  %vm1256_vm12 = vcmask 1046528   ;;  %vm1282_vm13 = vcmask 1042432  }
   0x9   :  { %111 = vmatpush1.msra.mxu0 %v59_v8  ;;  %v55_v21 = vld [vmem:[%s6320_s1 + $0x10] sm:$0xff]  ;;  %v4059_v23 = vld [vmem:[%s6322_s9 + $0xf8] sm:$0xff]  ;;  %v4088_v27 = vld [vmem:[%s6322_s9 + $0xe8] sm:$0xff]  ;;  %vm1135_vm14 = vcmask 1043456   ;;  %vm2111_vm15 = vcmask 1044480  }
   0xa   :  { %112 = vmatprep.subr.mxu0 %v57_v9  ;;  %v4067_v24 = vld [vmem:[%s6322_s9 + $0x78] sm:$0xff]  ;;  %v4072_v25 = vld [vmem:[%s6322_s9 + $0xf0] sm:$0xff]  ;;  %v4094_v28 = vld [vmem:[%s6322_s9 + $0x68] sm:$0xff] }
   0xb   :  { %113 = vmatpush1.msra.mxu0 %v56_v10  ;;  %v4082_v26 = vld [vmem:[%s6322_s9 + $0x70] sm:$0xff]  ;;  %v4100_v29 = vld [vmem:[%s6322_s9 + $0xe0] sm:$0xff]  ;;  %v4112_v31 = vld [vmem:[%s6322_s9 + $0xd8] sm:$0xff] }
   0xc   :  { %114 = vmatprep.subr.mxu0 %v54_v11  ;;  %v4106_v30 = vld [vmem:[%s6322_s9 + $0x60] sm:$0xff]  ;;  %v4118_v32 = vld [vmem:[%s6322_s9 + $0x58] sm:$0xff]  ;;  %v4124_v33 = vld [vmem:[%s6322_s9 + $0xd0] sm:$0xff] }
   0xd   :  { %115 = vmatpush1.msra.mxu0 %v53_v12  ;;  %v4130_v34 = vld [vmem:[%s6322_s9 + $0x50] sm:$0xff]  ;;  %v4136_v35 = vld [vmem:[%s6322_s9 + $0xc8] sm:$0xff]  ;;  %v4148_v37 = vld [vmem:[%s6322_s9 + $0xc0] sm:$0xff] }
   0xe   :  { %3344 = vmatmul.mubr.msk.f32.vlgmr.msra.gmra.mxu0 %vm71_vm0, %v49_v13  ;;  %3811 = vmatprep.subr.mxu0 %v70_v14  ;;  %v4142_v36 = vld [vmem:[%s6322_s9 + $0x48] sm:$0xff]  ;;  %v4154_v38 = vld [vmem:[%s6322_s9 + $0x40] sm:$0xff]  ;;  %v4160_v39 = vld [vmem:[%s6322_s9 + $0xb8] sm:$0xff] }
   0xf   :  { %3812 = vmatpush3.msra.mxu0 %v70_v14  ;;  %154 = vmatprep.mubr.f32.mxu0 %v6335_v3  ;;  %v4166_v40 = vld [vmem:[%s6322_s9 + $0x38] sm:$0xff]  ;;  %v4172_v41 = vld [vmem:[%s6322_s9 + $0xb0] sm:$0xff]  ;;  %v4184_v43 = vld [vmem:[%s6322_s9 + $0xa8] sm:$0xff] }
  0x10   :  { %3813 = vmatprep.subr.mxu0 %v67_v15  ;;  %v4178_v42 = vld [vmem:[%s6322_s9 + $0x30] sm:$0xff]  ;;  %v4190_v44 = vld [vmem:[%s6322_s9 + $0x28] sm:$0xff]  ;;  %v4196_v45 = vld [vmem:[%s6322_s9 + $0xa0] sm:$0xff] }
  0x11   :  { %3814 = vmatpush3.msra.mxu0 %v67_v15  ;;  %v4202_v46 = vld [vmem:[%s6322_s9 + $0x20] sm:$0xff]  ;;  %v4208_v47 = vld [vmem:[%s6322_s9 + $0x98] sm:$0xff]  ;;  %v4220_v49 = vld [vmem:[%s6322_s9 + $0x90] sm:$0xff] }
  0x12   :  { %3345 = vmatmul.mubr.msk.f32.gmra.mxu0 %vm71_vm0, %v50_v16  ;;  %3815 = vmatprep.subr.mxu0 %v64_v17  ;;  %v4214_v48 = vld [vmem:[%s6322_s9 + $0x18] sm:$0xff]  ;;  %6355 = vst [vmem:[#allocation5_spill] sm:$0xff] %v4220_v49  ;;  %v4226_v50 = vld [vmem:[%s6322_s9 + $0x10] sm:$0xff]  ;;  %v4238_v52 = vld [vmem:[%s6322_s9 + $0x88] sm:$0xff] }
  0x13   :  { %160 = vmatprep.mubr.f32.mxu0 %v6335_v3  ;;  %3816 = vmatpush3.msra.mxu0 %v64_v17  ;;  %6354 = vst [vmem:[#allocation4_spill] sm:$0xff] %v4214_v48  ;;  %6356 = vst [vmem:[#allocation6_spill] sm:$0xff] %v4226_v50  ;;  %v4231_v51 = vld [vmem:[%s6322_s9 + $0x138] sm:$0xff]  ;;  %v4245_v53 = vld [vmem:[%s6322_s9 + $0x8] sm:$0xff] }
  0x14   :  { %3817 = vmatprep.subr.mxu0 %v61_v18  ;;  %3830 = vmatpush3.msra.mxu1 %v4231_v51  ;;  %6357 = vst [vmem:[#allocation7_spill] sm:$0xff] %v4238_v52  ;;  %6358 = vst [vmem:[#allocation8_spill] sm:$0xff] %v4245_v53  ;;  %v4250_v54 = vld [vmem:[%s6322_s9 + $0x130] sm:$0xff]  ;;  %v4257_v55 = vld [vmem:[%s6322_s9 + $0x80] sm:$0xff] }
  0x15   :  { %3818 = vmatpush3.msra.mxu0 %v61_v18  ;;  %3831 = vmatprep.subr.mxu1 %v6335_v3  ;;  %6359 = vst [vmem:[#allocation9_spill] sm:$0xff] %v4257_v55  ;;  %v4264_v56 = vld [vmem:[%s6322_s9] sm:$0xff]  ;;  %v4269_v57 = vld [vmem:[%s6322_s9 + $0x128] sm:$0xff]  ;;  %v4285_v59 = vld [vmem:[%s6322_s9 + $0x118] sm:$0xff] }
  0x16   :  { %3346 = vmatmul.mubr.msk.f32.gmra.mxu0 %vm71_vm0, %v51_v19  ;;  %3819 = vmatprep.subr.mxu0 %v58_v20  ;;  %6360 = vst [vmem:[#allocation10_spill] sm:$0xff] %v4264_v56  ;;  %v4278_v58 = vld [vmem:[%s6322_s9 + $0x120] sm:$0xff]  ;;  %v4292_v60 = vld [vmem:[%s6322_s9 + $0x110] sm:$0xff]  ;;  %v4299_v61 = vld [vmem:[%s6322_s9 + $0x108] sm:$0xff] }
  0x17   :  { %166 = vmatprep.mubr.f32.mxu0 %v6335_v3  ;;  %3820 = vmatpush3.msra.mxu0 %v58_v20  ;;  %v4306_v62 = vld [vmem:[%s6322_s9 + $0x100] sm:$0xff] }
  0x18   :  { %3821 = vmatprep.subr.mxu0 %v55_v21  ;;  %3832 = vmatpush3.msra.mxu1 %v4250_v54 }
  0x19   :  { %3822 = vmatpush3.msra.mxu0 %v55_v21  ;;  %3833 = vmatprep.subr.mxu1 %v6335_v3 }
  0x1a   :  { %3347 = vmatmul.mubr.msk.f32.gmra.mxu0 %vm71_vm0, %v52_v22  ;;  %3717 = vmatprep.subr.mxu0 %v4059_v23 }
  0x1b   :  { %3823 = vmatprep.mubr.msk.f32.mxu0 %vm71_vm0, %v49_v13  ;;  %3834 = vmatpush3.msra.mxu1 %v4269_v57 }
  0x1c   :  { %3835 = vmatprep.subr.mxu1 %v6335_v3 }
  0x1d   :  { %3836 = vmatpush3.msra.mxu1 %v4278_v58 }
  0x1e   :  { %3824 = vmatmul.mubr.msk.f32.vlgmr.msra.gmra.mxu0 %vm71_vm0, %v50_v16  ;;  %3837 = vmatprep.subr.mxu1 %v6335_v3 }
  0x1f   :  { %3826 = vmatprep.mubr.msk.f32.mxu0 %vm71_vm0, %v51_v19  ;;  %3718 = vmatpush3.msra.mxu0 %v4067_v24 }
  0x20   :  { %3719 = vmatprep.subr.mxu0 %v4072_v25  ;;  %3838 = vmatpush3.msra.mxu1 %v4285_v59 }
  0x21   :  { %3720 = vmatpush3.msra.mxu0 %v4082_v26  ;;  %3839 = vmatprep.subr.mxu1 %v6335_v3 }
  0x22   :  { %3827 = vmatmul.mubr.msk.f32.gmra.mxu0 %vm71_vm0, %v52_v22  ;;  %3721 = vmatprep.subr.mxu0 %v4088_v27  ;;  %vm2137_vm0 = vcmask 1040384  }
  0x23   :  { %3722 = vmatpush3.msra.mxu0 %v4094_v28  ;;  %3840 = vmatpush3.msra.mxu1 %v4292_v60 }
  0x24   :  { %3723 = vmatprep.subr.mxu0 %v4100_v29  ;;  %3841 = vmatprep.subr.mxu1 %v6335_v3 }
  0x25   :  { %3724 = vmatpush3.msra.mxu0 %v4106_v30  ;;  %3842 = vmatpush3.msra.mxu1 %v4299_v61 }
  0x26   :  { %3725 = vmatprep.subr.mxu0 %v4112_v31  ;;  %3843 = vmatprep.subr.mxu1 %v6335_v3 }
  0x27   :  { %3726 = vmatpush3.msra.mxu0 %v4118_v32  ;;  %3844 = vmatpush3.msra.mxu1 %v4306_v62 }
  0x28   :  { %3727 = vmatprep.subr.mxu0 %v4124_v33  ;;  %3761 = vmatprep.subr.mxu1 %v4059_v23 }
  0x29   :  { %3728 = vmatpush3.msra.mxu0 %v4130_v34 }
  0x2a   :  { %3729 = vmatprep.subr.mxu0 %v4136_v35 }
  0x2b   :  { %3730 = vmatpush3.msra.mxu0 %v4142_v36 }
  0x2c   :  { %3731 = vmatprep.subr.mxu0 %v4148_v37 }
  0x2d   :  { %3732 = vmatpush3.msra.mxu0 %v4154_v38 }
  0x2e   :  { %3733 = vmatprep.subr.mxu0 %v4160_v39 }
  0x2f   :  { %3734 = vmatpush3.msra.mxu0 %v4166_v40 }
  0x30   :  { %3735 = vmatprep.subr.mxu0 %v4172_v41 }
  0x31   :  { %3736 = vmatpush3.msra.mxu0 %v4178_v42 }
  0x32   :  { %3737 = vmatprep.subr.mxu0 %v4184_v43 }
  0x33   :  { %3738 = vmatpush3.msra.mxu0 %v4190_v44 }
  0x34   :  { %3739 = vmatprep.subr.mxu0 %v4196_v45 }
  0x35   :  { %3740 = vmatpush3.msra.mxu0 %v4202_v46 }
  0x36   :  { %3741 = vmatprep.subr.mxu0 %v4208_v47 }
  0x37   :  { %3742 = vmatpush3.msra.mxu0 %v4214_v48 }
  0x38   :  { %3743 = vmatprep.subr.mxu0 %v4220_v49 }
  0x39   :  { %3744 = vmatpush3.msra.mxu0 %v4226_v50 }
  0x3a   :  { %3745 = vmatprep.subr.mxu0 %v4238_v52 }
  0x3b   :  { %3746 = vmatpush3.msra.mxu0 %v4245_v53 }
  0x3c   :  { %3747 = vmatprep.subr.mxu0 %v4257_v55 }
  0x3d   :  { %3748 = vmatpush3.msra.mxu0 %v4264_v56 }
  0x3e   :  { %3848 = vmatprep.subr.mxu0 %v6335_v3 }
  0xce   :  { %v4312_v63 = vpop.f32.mrf.mxu0 }
  0xd0   :  { %v4314_v0 = vpop.f32.mrf.mxu0 }
  0xd1   :  { %6361 = vst [vmem:[#allocation11_spill] sm:$0xff] %v4314_v0  ;;  %v291_v8 = vmul.f32 %v4314_v0, %v4314_v0 }
  0xd2   :  { %v4316_v1 = vpop.f32.mrf.mxu0 }
  0xd3   :  { %v258_v5 = vadd.f32 %v4316_v1, %v4312_v63 }
  0xd4   :  { %v4318_v2 = vpop.f32.mrf.mxu0 }
  0xd5   :  { %6362 = vst [vmem:[#allocation12_spill] sm:$0xff] %v4318_v2  ;;  %v294_v6 = vmul.f32 %v4318_v2, %v4318_v2  ;;  %v267_v9 = vadd.f32 %v4318_v2, %v4314_v0 }
  0xd6   :  { %v4320_v4 = vpop.f32.mrf.mxu0 }
  0xd7   :  { %v259_v10 = vadd.f32 %v258_v5, %v4320_v4  ;;  %v311_v13 = vadd.f32 %v294_v6, %v291_v8 }
  0xd8   :  { %v4326_v7 = vpop.f32.mrf.mxu0 }
  0xd9   :  { %6363 = vst [vmem:[#allocation13_spill] sm:$0xff] %v4326_v7  ;;  %v297_v11 = vmul.f32 %v4326_v7, %v4326_v7  ;;  %v268_v14 = vadd.f32 %v267_v9, %v4326_v7 }
  0xda   :  { %v4335_v12 = vpop.f32.mrf.mxu0 }
  0xdb   :  { %v260_v15 = vadd.f32 %v259_v10, %v4335_v12  ;;  %v312_v17 = vadd.f32 %v311_v13, %v297_v11 }
  0xdc   :  { %v4339_v16 = vpop.f32.mrf.mxu0 }
  0xdd   :  { %6364 = vst [vmem:[#allocation14_spill] sm:$0xff] %v4339_v16  ;;  %v261_v18 = vrot.slane %v260_v15, 4  ;;  %v269_v19 = vadd.f32 %v268_v14, %v4339_v16  ;;  %v300_v20 = vmul.f32 %v4339_v16, %v4339_v16 }
  0xde   :  { %v4344_v21 = vpop.f32.mrf.mxu0 }
  0xdf   :  { %6365 = vst [vmem:[#allocation15_spill] sm:$0xff] %v4344_v21  ;;  %v262_v22 = vadd.f32 %v261_v18, %v260_v15  ;;  %v270_v23 = vrot.slane %v269_v19, 4  ;;  %v313_v5 = vadd.f32 %v312_v17, %v300_v20  ;;  %v295_v10 = vmul.f32 %v4344_v21, %v4344_v21 }
  0xe0   :  { %v4346_v6 = vpop.f32.mrf.mxu0  ;;  %v278_v17 = vsel %vm276_vm2, %v4344_v21, 0.0 }
  0xe1   :  { %6366 = vst [vmem:[#allocation16_spill] sm:$0xff] %v4346_v6  ;;  %v263_v8 = vrot.slane %v262_v22, 2  ;;  %v271_v9 = vadd.f32 %v270_v23, %v269_v19  ;;  %v277_v11 = vsel %vm276_vm2, %v4346_v6, 0.0  ;;  %v292_v13 = vmul.f32 %v4346_v6, %v4346_v6 }
  0xe2   :  { %v4354_v14 = vpop.f32.mrf.mxu0  ;;  %v314_v18 = vrot.slane %v313_v5, 4  ;;  %v279_v20 = vadd.f32 %v278_v17, %v277_v11  ;;  %v321_v16 = vsel %vm276_vm2, %v295_v10, 0.0 }
  0xe3   :  { %v264_v3 = vadd.f32 %v263_v8, %v262_v22  ;;  %v272_v15 = vrot.slane %v271_v9, 2  ;;  %v320_v19 = vsel %vm276_vm2, %v292_v13, 0.0  ;;  %v301_v7 = vmul.f32 %v4354_v14, %v4354_v14 }
  0xe4   :  { %v4359_v23 = vpop.f32.mrf.mxu0  ;;  %v322_v8 = vadd.f32 %v321_v16, %v320_v19  ;;  %v315_v11 = vadd.f32 %v314_v18, %v313_v5  ;;  %v282_v13 = vsel %vm276_vm2, %v4354_v14, 0.0 }
  0xe5   :  { %6367 = vst [vmem:[#allocation17_spill] sm:$0xff] %v4359_v23  ;;  %v280_v2 = vsel %vm276_vm2, %v4359_v23, 0.0  ;;  %v298_v22 = vmul.f32 %v4359_v23, %v4359_v23  ;;  %v273_v6 = vadd.f32 %v272_v15, %v271_v9  ;;  %v265_v21 = vrot.slane %v264_v3, 1 }
  0xe6   :  { %v281_v0 = vadd.f32 %v280_v2, %v279_v20  ;;  %v325_v53 = vsel %vm276_vm2, %v301_v7, 0.0  ;;  %v316_v23 = vrot.slane %v315_v11, 2  ;;  %v6368_v15 = vmov 0.0  }
  0xe7   :  { %v323_v17 = vsel %vm276_vm2, %v298_v22, 0.0  ;;  %v274_v55 = vrot.slane %v273_v6, 1  ;;  %v266_v48 = vadd.f32 %v265_v21, %v264_v3  ;;  %1028 = vst.msk [vmem:[#allocation2 + $0x10] sm:$0x3] %vm1027_vm4, %v6368_v15 }
  0xe8   :  { %v283_v10 = vadd.f32 %v282_v13, %v281_v0  ;;  %v324_v56 = vadd.f32 %v323_v17, %v322_v8  ;;  %v317_v0 = vadd.f32 %v316_v23, %v315_v11  ;;  %1075 = vst.msk [vmem:[#allocation2 + $0x70] sm:$0xc0] %vm1074_vm5, %v6368_v15 }
  0xe9   :  { %v275_v49 = vadd.f32 %v274_v55, %v273_v6  ;;  %1071 = vst.msk [vmem:[#allocation2 + $0x40] sm:$0x30] %vm1070_vm6, %v6368_v15 }
  0xea   :  { %v284_v52 = vrot.slane %v283_v10, 4  ;;  %v326_v50 = vadd.f32 %v325_v53, %v324_v56  ;;  %1032 = vst.msk [vmem:[#allocation2 + $0x40] sm:$0xc] %vm1031_vm7, %v6368_v15 }
  0xeb   :  { %440 = vmatprep.mubr.f32.mxu0 %v275_v49  ;;  %v318_v49 = vrot.slane %v317_v0, 1 }
  0xec   :  { %v285_v16 = vadd.f32 %v284_v52, %v283_v10  ;;  %v327_v2 = vrot.slane %v326_v50, 4  ;;  %441 = vmatmul.mubr.f32.vlgmr.msra.gmra.mxu0 %v266_v48  ;;  %v290_v52 = vmul.f32 %v4312_v63, %v4312_v63  ;;  %v663_v10 = vld [vmem:[%s6324_s4] sm:$0x1] }
  0xed   :  { %3849 = vmatpush3.msra.mxu0 %v4231_v51  ;;  %3864 = vmatprep.mubr.msk.f32.mxu0 %vm3897_vm1, %v6368_v15  ;;  %v293_v51 = vmul.f32 %v4316_v1, %v4316_v1  ;;  %v319_v55 = vadd.f32 %v318_v49, %v317_v0  ;;  %v3385_v49 = vld [vmem:[%s6326_s2 + $0x358] sm:$0xff] }
  0xee   :  { %v286_v5 = vrot.slane %v285_v16, 2  ;;  %v328_v9 = vadd.f32 %v327_v2, %v326_v50  ;;  %3850 = vmatprep.subr.mxu0 %v6368_v15 }
  0xef   :  { %3851 = vmatpush3.msra.mxu0 %v4250_v54  ;;  %v296_v54 = vmul.f32 %v4320_v4, %v4320_v4 }
  0xf0   :  { %v329_v7 = vrot.slane %v328_v9, 2  ;;  %v287_v53 = vadd.f32 %v286_v5, %v285_v16  ;;  %3852 = vmatprep.subr.mxu0 %v6368_v15  ;;  %v667_v5 = vld [vmem:[%s6325_s5] sm:$0x1] }
  0xf1   :  { %3853 = vmatpush3.msra.mxu0 %v4269_v57  ;;  %v302_v57 = vadd.f32 %v293_v51, %v290_v52  ;;  %v3383_v51 = vld [vmem:[%s6326_s2 + $0x348] sm:$0xff]  ;;  %v3382_v52 = vld [vmem:[%s6326_s2 + $0x340] sm:$0xff] }
  0xf2   :  { %v288_v3 = vrot.slane %v287_v53, 1  ;;  %v330_v48 = vadd.f32 %v329_v7, %v328_v9  ;;  %3854 = vmatprep.subr.mxu0 %v6368_v15  ;;  %v3389_v7 = vld [vmem:[%s6326_s2 + $0x378] sm:$0xff] }
  0xf3   :  { %3855 = vmatpush3.msra.mxu0 %v4278_v58  ;;  %v299_v58 = vmul.f32 %v4335_v12, %v4335_v12 }
  0xf4   :  { %v289_v50 = vadd.f32 %v288_v3, %v287_v53  ;;  %3856 = vmatprep.subr.mxu0 %v6368_v15  ;;  %v331_v56 = vrot.slane %v330_v48, 1  ;;  %v3388_v53 = vld [vmem:[%s6326_s2 + $0x370] sm:$0xff]  ;;  %v3387_v3 = vld [vmem:[%s6326_s2 + $0x368] sm:$0xff] }
  0xf5   :  { %3857 = vmatpush3.msra.mxu0 %v4285_v59  ;;  %v303_v59 = vadd.f32 %v302_v57, %v296_v54  ;;  %v3381_v54 = vld [vmem:[%s6326_s2 + $0x338] sm:$0xff]  ;;  %v3378_v57 = vld [vmem:[%s6326_s2 + $0x320] sm:$0xff] }
  0xf6   :  { %3846 = vmatmul.mubr.msk.f32.vlgmr.msra.gmra.mxu1 %vm276_vm2, %v289_v50  ;;  %3858 = vmatprep.subr.mxu0 %v6368_v15  ;;  %v3384_v50 = vld [vmem:[%s6326_s2 + $0x350] sm:$0xff] }
  0xf7   :  { %3762 = vmatpush3.msra.mxu1 %v4067_v24  ;;  %3859 = vmatpush3.msra.mxu0 %v4292_v60  ;;  %v332_v24 = vadd.f32 %v331_v56, %v330_v48  ;;  %v3386_v48 = vld [vmem:[%s6326_s2 + $0x360] sm:$0xff]  ;;  %v3379_v56 = vld [vmem:[%s6326_s2 + $0x328] sm:$0xff] }
  0xf8   :  { %3763 = vmatprep.subr.mxu1 %v4072_v25  ;;  %583 = vmatprep.mubr.f32.mxu1 %v319_v55  ;;  %v304_v25 = vadd.f32 %v303_v59, %v299_v58  ;;  %v3380_v55 = vld [vmem:[%s6326_s2 + $0x330] sm:$0xff]  ;;  %v3377_v58 = vld [vmem:[%s6326_s2 + $0x318] sm:$0xff] }
  0xf9   :  { %3860 = vmatprep.subr.mxu0 %v6368_v15  ;;  %3764 = vmatpush3.msra.mxu1 %v4082_v26  ;;  %v3376_v59 = vld [vmem:[%s6326_s2 + $0x310] sm:$0xff] }
  0xfa   :  { %3861 = vmatpush3.msra.mxu0 %v4299_v61  ;;  %3765 = vmatprep.subr.mxu1 %v4088_v27  ;;  %v305_v26 = vrot.slane %v304_v25, 4 }
  0xfb   :  { %3862 = vmatprep.subr.mxu0 %v6368_v15  ;;  %3766 = vmatpush3.msra.mxu1 %v4094_v28 }
  0xfc   :  { %3863 = vmatpush3.msra.mxu0 %v4306_v62  ;;  %3767 = vmatprep.subr.mxu1 %v4100_v29  ;;  %v306_v27 = vadd.f32 %v305_v26, %v304_v25  ;;  %v3374_v25 = vld [vmem:[%s6326_s2 + $0x300] sm:$0xff]  ;;  %v3373_v26 = vld [vmem:[%s6326_s2 + $0x2f8] sm:$0xff] }
  0xfd   :  { %3865 = vmatmul.mubr.msk.f32.vlgmr.msra.gmra.mxu0 %vm276_vm2, %v332_v24  ;;  %3768 = vmatpush3.msra.mxu1 %v4106_v30  ;;  %v6369_v30 = vld [vmem:[#allocation4_spill] sm:$0xff]  ;;  %v3375_v24 = vld [vmem:[%s6326_s2 + $0x308] sm:$0xff] }
  0xfe   :  { %744 = vmatprep.mubr.f32.mxu0 %v6368_v15  ;;  %3769 = vmatprep.subr.mxu1 %v4112_v31  ;;  %v307_v28 = vrot.slane %v306_v27, 2  ;;  %v6370_v31 = vld [vmem:[#allocation5_spill] sm:$0xff] }
  0xff   :  { %3770 = vmatpush3.msra.mxu1 %v4118_v32 }
 0x100   :  { %3771 = vmatprep.subr.mxu1 %v4124_v33  ;;  %v308_v29 = vadd.f32 %v307_v28, %v306_v27  ;;  %v6371_v33 = vld [vmem:[#allocation6_spill] sm:$0xff] }
 0x101   :  { %3772 = vmatpush3.msra.mxu1 %v4130_v34  ;;  %v6372_v34 = vld [vmem:[#allocation7_spill] sm:$0xff]  ;;  %v3371_v28 = vld [vmem:[%s6326_s2 + $0x2e8] sm:$0xff] }
 0x102   :  { %3773 = vmatprep.subr.mxu1 %v4136_v35  ;;  %v309_v32 = vrot.slane %v308_v29, 1  ;;  %v6373_v35 = vld [vmem:[#allocation8_spill] sm:$0xff]  ;;  %v3372_v27 = vld [vmem:[%s6326_s2 + $0x2f0] sm:$0xff] }
 0x103   :  { %3774 = vmatpush3.msra.mxu1 %v4142_v36  ;;  %v6374_v36 = vld [vmem:[#allocation9_spill] sm:$0xff] }
 0x104   :  { %3775 = vmatprep.subr.mxu1 %v4148_v37  ;;  %v310_v37 = vadd.f32 %v309_v32, %v308_v29  ;;  %v3370_v29 = vld [vmem:[%s6326_s2 + $0x2e0] sm:$0xff]  ;;  %v3367_v32 = vld [vmem:[%s6326_s2 + $0x2c8] sm:$0xff] }
 0x105   :  { %3776 = vmatpush3.msra.mxu1 %v4154_v38  ;;  %v6375_v38 = vld [vmem:[#allocation10_spill] sm:$0xff] }
 0x106   :  { %3777 = vmatprep.subr.mxu1 %v4160_v39  ;;  %v674_v39 = vld [vmem:[%s6323_s10 + $0x20] sm:$0xff] }
 0x107   :  { %3778 = vmatpush3.msra.mxu1 %v4166_v40  ;;  %v673_v40 = vld [vmem:[%s6323_s10 + $0x18] sm:$0xff]  ;;  %708 = vmatprep.subr.mxu0 %v674_v39 }
 0x108   :  { %3779 = vmatprep.subr.mxu1 %v4172_v41  ;;  %v675_v41 = vld [vmem:[%s6323_s10 + $0x28] sm:$0xff]  ;;  %709 = vmatpush1.msra.mxu0 %v673_v40 }
 0x109   :  { %3780 = vmatpush3.msra.mxu1 %v4178_v42  ;;  %v671_v42 = vld [vmem:[%s6323_s10 + $0x8] sm:$0xff] }
 0x10a   :  { %3781 = vmatprep.subr.mxu1 %v4184_v43  ;;  %v670_v43 = vld [vmem:[%s6323_s10] sm:$0xff]  ;;  %710 = vmatprep.subr.mxu0 %v671_v42 }
 0x10b   :  { %3782 = vmatpush3.msra.mxu1 %v4190_v44  ;;  %v672_v44 = vld [vmem:[%s6323_s10 + $0x10] sm:$0xff]  ;;  %711 = vmatpush1.msra.mxu0 %v670_v43 }
 0x10c   :  { %3783 = vmatprep.subr.mxu1 %v4196_v45  ;;  %852 = vmatprep.subr.mxu0 %v674_v39  ;;  %v3360_v39 = vld [vmem:[%s6326_s2 + $0x290] sm:$0xff] }
 0x10d   :  { %3784 = vmatpush3.msra.mxu1 %v4202_v46 }
 0x10e   :  { %3785 = vmatprep.subr.mxu1 %v4208_v47 }
 0x10f   :  { %3786 = vmatpush3.msra.mxu1 %v6369_v30  ;;  %v3369_v30 = vld [vmem:[%s6326_s2 + $0x2d8] sm:$0xff] }
 0x110   :  { %3787 = vmatprep.subr.mxu1 %v6370_v31  ;;  %v3368_v31 = vld [vmem:[%s6326_s2 + $0x2d0] sm:$0xff] }
 0x111   :  { %3788 = vmatpush3.msra.mxu1 %v6371_v33  ;;  %v3366_v33 = vld [vmem:[%s6326_s2 + $0x2c0] sm:$0xff] }
 0x112   :  { %3789 = vmatprep.subr.mxu1 %v6372_v34  ;;  %v3365_v34 = vld [vmem:[%s6326_s2 + $0x2b8] sm:$0xff] }
 0x113   :  { %3790 = vmatpush3.msra.mxu1 %v6373_v35  ;;  %v3364_v35 = vld [vmem:[%s6326_s2 + $0x2b0] sm:$0xff] }
 0x114   :  { %3791 = vmatprep.subr.mxu1 %v6374_v36  ;;  %v3363_v36 = vld [vmem:[%s6326_s2 + $0x2a8] sm:$0xff] }
 0x115   :  { %3792 = vmatpush3.msra.mxu1 %v6375_v38  ;;  %v3361_v38 = vld [vmem:[%s6326_s2 + $0x298] sm:$0xff] }
 0x116   :  { %584 = vmatmul.mubr.f32.vlgmr.msra.gmra.mxu1 %v310_v37  ;;  %3867 = vmatprep.subr.mxu1 %v6368_v15  ;;  %v3362_v37 = vld [vmem:[%s6326_s2 + $0x2a0] sm:$0xff] }
 0x117   :  { %3871 = vmatprep.mubr.msk.f32.mxu1 %vm3897_vm1, %v6368_v15  ;;  %3868 = vmatpush3.msra.mxu1 %v675_v41 }
 0x118   :  { %3869 = vmatprep.subr.mxu1 %v6368_v15 }
 0x119   :  { %3870 = vmatpush3.msra.mxu1 %v672_v44 }
 0x11a   :  { %3874 = vmatprep.subr.mxu1 %v6368_v15 }
 0x1ac   :  { %v3749_v46 = vpop.f32.mrf.mxu0 }
 0x1ae   :  { %v3750_v60 = vpop.f32.mrf.mxu0 }
 0x1af   :  { %v3751_v21 = vadd.f32 %v3750_v60, %v3749_v46  ;;  %v3417_v46 = vld [vmem:[%s6326_s2 + $0x458] sm:$0xff]  ;;  %v3415_v60 = vld [vmem:[%s6326_s2 + $0x448] sm:$0xff] }
 0x1b6   :  { %v512_v45 = vpop.f32.mrf.mxu1 }
 0x1b7   :  { %v513_v6 = vadd.f32 %v3751_v21, %v512_v45  ;;  %v3418_v45 = vld [vmem:[%s6326_s2 + $0x460] sm:$0xff]  ;;  %v3412_v21 = vld [vmem:[%s6326_s2 + $0x430] sm:$0xff] }
 0x1b8   :  { %v3847_v47 = vpop.f32.mrf.mxu1 }
 0x1b9   :  { %v659_v19 = vmul.f32 0.001953125, %v513_v6  ;;  %v3416_v47 = vld [vmem:[%s6326_s2 + $0x450] sm:$0xff]  ;;  %v3411_v6 = vld [vmem:[%s6326_s2 + $0x428] sm:$0xff] }
 0x1bb   :  { %v661_v8 = vmul.f32 %v659_v19, %v659_v19 }
 0x1bd   :  { %v655_v61 = vpop.f32.mrf.mxu0 }
 0x1bf   :  { %v3866_v62 = vpop.f32.mrf.mxu0 }
 0x1c0   :  { %v3413_v62 = vld [vmem:[%s6326_s2 + $0x438] sm:$0xff] }
 0x1d6   :  { %v3793_v18 = vpop.f32.mrf.mxu1 }
 0x1d8   :  { %v3794_v20 = vpop.f32.mrf.mxu1 }
 0x1d9   :  { %v3795_v23 = vadd.f32 %v3794_v20, %v3793_v18  ;;  %v3410_v18 = vld [vmem:[%s6326_s2 + $0x420] sm:$0xff]  ;;  %v3409_v20 = vld [vmem:[%s6326_s2 + $0x418] sm:$0xff] }
 0x1db   :  { %v656_v22 = vadd.f32 %v3795_v23, %v655_v61  ;;  %v3414_v61 = vld [vmem:[%s6326_s2 + $0x440] sm:$0xff]  ;;  %v3437_v23 = vld [vmem:[%s6326_s2 + $0x4f8] sm:$0xff] }
 0x1dd   :  { %v660_v11 = vmul.f32 0.001953125, %v656_v22  ;;  %v3407_v22 = vld [vmem:[%s6326_s2 + $0x408] sm:$0xff] }
 0x1df   :  { %v662_v13 = vsub.f32 %v660_v11, %v661_v8  ;;  %v3436_v8 = vld [vmem:[%s6326_s2 + $0x4f0] sm:$0xff]  ;;  %v3406_v11 = vld [vmem:[%s6326_s2 + $0x400] sm:$0xff] }
 0x1e1   :  { %v664_v17 = vadd.f32 1e-05, %v662_v13  ;;  %v3435_v13 = vld [vmem:[%s6326_s2 + $0x4e8] sm:$0xff] }
 0x1e3   :  { %3886 = vrsqrt.f32 %v664_v17  ;;  %v3405_v17 = vld [vmem:[%s6326_s2 + $0x3f8] sm:$0xff] }
 0x1f0   :  { %v3887_v16 = vpop.eup %3886 }
 0x1f1   :  { %v666_v2 = vmul.f32 %v3887_v16, %v663_v10  ;;  %v3434_v10 = vld [vmem:[%s6326_s2 + $0x4e0] sm:$0xff]  ;;  %v3404_v16 = vld [vmem:[%s6326_s2 + $0x3f0] sm:$0xff] }
 0x1f3   :  { %3354 = vmatmul.mubr.msk.f32.vlgmr.msra.gmra.mxu0 %vm676_vm3, %v666_v2  ;;  %3872 = vmatmul.mubr.msk.f32.vlgmr.msra.gmra.mxu1 %vm676_vm3, %v666_v2  ;;  %v668_v9 = vmul.f32 %v666_v2, %v659_v19  ;;  %v3408_v19 = vld [vmem:[%s6326_s2 + $0x410] sm:$0xff]  ;;  %v3433_v2 = vld [vmem:[%s6326_s2 + $0x4d8] sm:$0xff] }
 0x1f4   :  { %853 = vmatpush1.msra.mxu0 %v673_v40  ;;  %3875 = vmatpush3.msra.mxu1 %v675_v41  ;;  %v3359_v40 = vld [vmem:[%s6326_s2 + $0x288] sm:$0xff]  ;;  %v3358_v41 = vld [vmem:[%s6326_s2 + $0x280] sm:$0xff] }
 0x1f5   :  { %854 = vmatprep.subr.mxu0 %v671_v42  ;;  %3876 = vmatprep.subr.mxu1 %v6368_v15  ;;  %v669_v0 = vsub.f32 %v667_v5, %v668_v9  ;;  %v3421_v42 = vld [vmem:[%s6326_s2 + $0x478] sm:$0xff]  ;;  %v3403_v5 = vld [vmem:[%s6326_s2 + $0x3e8] sm:$0xff]  ;;  %v3432_v9 = vld [vmem:[%s6326_s2 + $0x4d0] sm:$0xff] }
 0x1f6   :  { %855 = vmatpush1.msra.mxu0 %v670_v43  ;;  %888 = vmatprep.mubr.f32.mxu0 %v6368_v15  ;;  %v3420_v43 = vld [vmem:[%s6326_s2 + $0x470] sm:$0xff] }
 0x1f7   :  { %3877 = vmatpush3.msra.mxu1 %v672_v44  ;;  %3878 = vmatprep.mubr.msk.f32.mxu1 %vm3897_vm1, %v6368_v15  ;;  %v3419_v44 = vld [vmem:[%s6326_s2 + $0x468] sm:$0xff]  ;;  %vm3015_vm1 = vcmask 261120  }
 0x1f8   :  { %3356 = vmatmul.mubr.msk.f32.vlgmr.msra.gmra.mxu0 %vm676_vm3, %v669_v0  ;;  %3879 = vmatmul.mubr.msk.f32.vlgmr.msra.gmra.mxu1 %vm676_vm3, %v669_v0  ;;  %v3402_v0 = vld [vmem:[%s6326_s2 + $0x3e0] sm:$0xff]  ;;  %vm3335_vm3 = vcmask 48128  }
 0x1f9   :  { %1391 = vmatprep.subr.mxu0 %v3389_v7  ;;  %1544 = vmatprep.mubr.f32.mxu1 %v6368_v15  ;;  %v3431_v7 = vld [vmem:[%s6326_s2 + $0x4c8] sm:$0xff] }
 0x1fa   :  { %1392 = vmatpush1.msra.mxu0 %v3388_v53  ;;  %1496 = vmatprep.subr.mxu1 %v3437_v23  ;;  %v3401_v53 = vld [vmem:[%s6326_s2 + $0x3d8] sm:$0xff] }
 0x1fb   :  { %1393 = vmatprep.subr.mxu0 %v3387_v3  ;;  %1497 = vmatpush1.msra.mxu1 %v3436_v8  ;;  %v3430_v3 = vld [vmem:[%s6326_s2 + $0x4c0] sm:$0xff] }
 0x1fc   :  { %1394 = vmatpush1.msra.mxu0 %v3386_v48  ;;  %1498 = vmatprep.subr.mxu1 %v3435_v13  ;;  %v3400_v48 = vld [vmem:[%s6326_s2 + $0x3d0] sm:$0xff]  ;;  %v6381_v8 = vld [vmem:[#allocation12_spill] sm:$0xff] }
 0x1fd   :  { %1395 = vmatprep.subr.mxu0 %v3385_v49  ;;  %1499 = vmatpush1.msra.mxu1 %v3434_v10  ;;  %v3429_v49 = vld [vmem:[%s6326_s2 + $0x4b8] sm:$0xff] }
 0x1fe   :  { %1396 = vmatpush1.msra.mxu0 %v3384_v50  ;;  %1500 = vmatprep.subr.mxu1 %v3433_v2  ;;  %v3399_v50 = vld [vmem:[%s6326_s2 + $0x3c8] sm:$0xff] }
 0x1ff   :  { %1397 = vmatprep.subr.mxu0 %v3383_v51  ;;  %1501 = vmatpush1.msra.mxu1 %v3432_v9  ;;  %v3428_v51 = vld [vmem:[%s6326_s2 + $0x4b0] sm:$0xff] }
 0x200   :  { %1398 = vmatpush1.msra.mxu0 %v3382_v52  ;;  %1502 = vmatprep.subr.mxu1 %v3431_v7  ;;  %v3398_v52 = vld [vmem:[%s6326_s2 + $0x3c0] sm:$0xff] }
 0x201   :  { %1399 = vmatprep.subr.mxu0 %v3381_v54  ;;  %1503 = vmatpush1.msra.mxu1 %v3430_v3  ;;  %v3427_v54 = vld [vmem:[%s6326_s2 + $0x4a8] sm:$0xff] }
 0x202   :  { %1400 = vmatpush1.msra.mxu0 %v3380_v55  ;;  %1504 = vmatprep.subr.mxu1 %v3429_v49  ;;  %v3397_v55 = vld [vmem:[%s6326_s2 + $0x3b8] sm:$0xff] }
 0x203   :  { %1401 = vmatprep.subr.mxu0 %v3379_v56  ;;  %1505 = vmatpush1.msra.mxu1 %v3428_v51  ;;  %v3426_v56 = vld [vmem:[%s6326_s2 + $0x4a0] sm:$0xff] }
 0x204   :  { %1402 = vmatpush1.msra.mxu0 %v3378_v57  ;;  %v3396_v57 = vld [vmem:[%s6326_s2 + $0x3b0] sm:$0xff]  ;;  %1506 = vmatprep.subr.mxu1 %v3427_v54 }
 0x205   :  { %1403 = vmatprep.subr.mxu0 %v3377_v58  ;;  %v3425_v58 = vld [vmem:[%s6326_s2 + $0x498] sm:$0xff]  ;;  %1507 = vmatpush1.msra.mxu1 %v3426_v56 }
 0x206   :  { %1404 = vmatpush1.msra.mxu0 %v3376_v59  ;;  %v3395_v59 = vld [vmem:[%s6326_s2 + $0x3a8] sm:$0xff]  ;;  %1508 = vmatprep.subr.mxu1 %v3425_v58 }
 0x207   :  { %1405 = vmatprep.subr.mxu0 %v3375_v24  ;;  %v3424_v24 = vld [vmem:[%s6326_s2 + $0x490] sm:$0xff] }
 0x208   :  { %1406 = vmatpush1.msra.mxu0 %v3374_v25  ;;  %v3394_v25 = vld [vmem:[%s6326_s2 + $0x3a0] sm:$0xff]  ;;  %1509 = vmatpush1.msra.mxu1 %v3424_v24 }
 0x209   :  { %1407 = vmatprep.subr.mxu0 %v3373_v26  ;;  %v3423_v26 = vld [vmem:[%s6326_s2 + $0x488] sm:$0xff] }
 0x20a   :  { %1408 = vmatpush1.msra.mxu0 %v3372_v27  ;;  %v3393_v27 = vld [vmem:[%s6326_s2 + $0x398] sm:$0xff]  ;;  %1510 = vmatprep.subr.mxu1 %v3423_v26 }
 0x20b   :  { %1409 = vmatprep.subr.mxu0 %v3371_v28  ;;  %v3422_v28 = vld [vmem:[%s6326_s2 + $0x480] sm:$0xff] }
 0x20c   :  { %1410 = vmatpush1.msra.mxu0 %v3370_v29  ;;  %v3392_v29 = vld [vmem:[%s6326_s2 + $0x390] sm:$0xff]  ;;  %1511 = vmatpush1.msra.mxu1 %v3422_v28 }
 0x20d   :  { %1411 = vmatprep.subr.mxu0 %v3369_v30  ;;  %v1186_v30 = vld [vmem:[%s6326_s2 + $0xf8] sm:$0xff]  ;;  %v6383_v28 = vld [vmem:[#allocation14_spill] sm:$0xff] }
 0x20e   :  { %1412 = vmatpush1.msra.mxu0 %v3368_v31  ;;  %v3391_v31 = vld [vmem:[%s6326_s2 + $0x388] sm:$0xff]  ;;  %1578 = vmatprep.subr.mxu1 %v1186_v30 }
 0x20f   :  { %1413 = vmatprep.subr.mxu0 %v3367_v32  ;;  %v3390_v32 = vld [vmem:[%s6326_s2 + $0x380] sm:$0xff] }
 0x210   :  { %1414 = vmatpush1.msra.mxu0 %v3366_v33  ;;  %v1234_v33 = vld [vmem:[%s6326_s2 + $0x278] sm:$0xff] }
 0x211   :  { %1415 = vmatprep.subr.mxu0 %v3365_v34  ;;  %v965_v34 = vlaneseq }
 0x212   :  { %1416 = vmatpush1.msra.mxu0 %v3364_v35 }
 0x213   :  { %1417 = vmatprep.subr.mxu0 %v3363_v36  ;;  %v966_v35 = vshrl.u32 %v965_v34, 7 }
 0x214   :  { %1418 = vmatpush1.msra.mxu0 %v3362_v37 }
 0x215   :  { %1419 = vmatprep.subr.mxu0 %v3361_v38  ;;  %v4721_v36 = vsub.s32 0, %v966_v35 }
 0x216   :  { %1420 = vmatpush1.msra.mxu0 %v3360_v39 }
 0x217   :  { %1421 = vmatprep.subr.mxu0 %v3359_v40  ;;  %6376 = vst [vmem:[#allocation4_spill] sm:$0xff] %v4721_v36 }
 0x218   :  { %1422 = vmatpush1.msra.mxu0 %v3358_v41 }
 0x219   :  { %1423 = vmatprep.subr.mxu0 %v3421_v42 }
 0x21a   :  { %1424 = vmatpush2.msra.mxu0 %v3420_v43 }
 0x21b   :  { %1425 = vmatprep.subr.mxu0 %v3419_v44 }
 0x21c   :  { %1426 = vmatpush2.msra.mxu0 %v3418_v45 }
 0x21d   :  { %1427 = vmatprep.subr.mxu0 %v3417_v46 }
 0x21e   :  { %1428 = vmatpush2.msra.mxu0 %v3416_v47  ;;  %v6377_v47 = vld [vmem:[#allocation16_spill] sm:$0xff] }
 0x21f   :  { %1429 = vmatprep.subr.mxu0 %v3415_v60 }
 0x220   :  { %1430 = vmatpush2.msra.mxu0 %v3414_v61 }
 0x221   :  { %1431 = vmatprep.subr.mxu0 %v3413_v62 }
 0x222   :  { %1432 = vmatpush2.msra.mxu0 %v3412_v21 }
 0x223   :  { %1433 = vmatprep.subr.mxu0 %v3411_v6  ;;  %v6378_v6 = vld [vmem:[#allocation15_spill] sm:$0xff] }
 0x224   :  { %1434 = vmatpush2.msra.mxu0 %v3410_v18 }
 0x225   :  { %1435 = vmatprep.subr.mxu0 %v3409_v20  ;;  %v6379_v20 = vld [vmem:[#allocation17_spill] sm:$0xff] }
 0x226   :  { %1436 = vmatpush2.msra.mxu0 %v3408_v19 }
 0x227   :  { %1437 = vmatprep.subr.mxu0 %v3407_v22  ;;  %v6380_v22 = vld [vmem:[#allocation11_spill] sm:$0xff] }
 0x228   :  { %1438 = vmatpush2.msra.mxu0 %v3406_v11  ;;  %v6382_v11 = vld [vmem:[#allocation13_spill] sm:$0xff] }
 0x229   :  { %1439 = vmatprep.subr.mxu0 %v3405_v17 }
 0x22a   :  { %1440 = vmatpush2.msra.mxu0 %v3404_v16 }
 0x22b   :  { %1441 = vmatprep.subr.mxu0 %v3403_v5 }
 0x22c   :  { %1442 = vmatpush2.msra.mxu0 %v3402_v0 }
 0x22d   :  { %1443 = vmatprep.subr.mxu0 %v3401_v53 }
 0x22e   :  { %1444 = vmatpush2.msra.mxu0 %v3400_v48 }
 0x22f   :  { %1445 = vmatprep.subr.mxu0 %v3399_v50 }
 0x230   :  { %1446 = vmatpush2.msra.mxu0 %v3398_v52 }
 0x231   :  { %1447 = vmatprep.subr.mxu0 %v3397_v55 }
 0x232   :  { %1448 = vmatpush2.msra.mxu0 %v3396_v57 }
 0x233   :  { %1449 = vmatprep.subr.mxu0 %v3395_v59 }
 0x234   :  { %1450 = vmatpush2.msra.mxu0 %v3394_v25 }
 0x235   :  { %1451 = vmatprep.subr.mxu0 %v3393_v27 }
 0x236   :  { %1452 = vmatpush2.msra.mxu0 %v3392_v29 }
 0x237   :  { %1453 = vmatprep.subr.mxu0 %v3391_v31 }
 0x238   :  { %1454 = vmatpush2.msra.mxu0 %v3390_v32 }
 0x239   :  { %1683 = vmatprep.subr.mxu0 %v1234_v33 }
 0x2b3   :  { %v746_v37 = vpop.f32.mrf.mxu0  ;;  %v817_v38 = vpop.f32.mrf.mxu1 }
 0x2b4   :  { %v968_v39 = vrot.slane %v746_v37, %v4721_v36  ;;  %v976_v40 = vrot.slane %v817_v38, %v4721_v36 }
 0x2b5   :  { %v748_v41 = vpop.f32.mrf.mxu0  ;;  %v3873_v42 = vpop.f32.mrf.mxu1 }
 0x2b6   :  { %v977_v43 = vmul.f32 %v968_v39, %v4312_v63  ;;  %v980_v44 = vmul.f32 %v968_v39, %v4316_v1  ;;  %v983_v45 = vmul.f32 %v968_v39, %v4320_v4  ;;  %v986_v46 = vmul.f32 %v968_v39, %v4335_v12 }
 0x2b7   :  { %v979_v60 = vmul.f32 %v976_v40, %v6377_v47  ;;  %v972_v61 = vrot.slane %v748_v41, %v4721_v36  ;;  %v982_v18 = vmul.f32 %v6378_v6, %v976_v40  ;;  %v985_v19 = vmul.f32 %v976_v40, %v6379_v20 }
 0x2b8   :  { %v890_v62 = vpop.f32.mrf.mxu0  ;;  %v961_v21 = vpop.f32.mrf.mxu1  ;;  %v988_v23 = vmul.f32 %v4354_v14, %v976_v40 }
 0x2b9   :  { %v992_v63 = vrot.slane %v890_v62, %v4721_v36  ;;  %v1000_v1 = vrot.slane %v961_v21, %v4721_v36  ;;  %v978_v4 = vmul.f32 %v972_v61, %v6380_v22  ;;  %v981_v12 = vmul.f32 %v972_v61, %v6381_v8 }
 0x2ba   :  { %v984_v13 = vmul.f32 %v972_v61, %v6382_v11  ;;  %v3880_v17 = vpop.f32.mrf.mxu1  ;;  %v892_v55 = vpop.f32.mrf.mxu0  ;;  %v987_v29 = vmul.f32 %v972_v61, %v6383_v28  ;;  %v1181_v11 = vld [vmem:[%s6326_s2 + $0xd0] sm:$0xff] }
 0x2bb   :  { %v1001_v10 = vadd.f32 %v992_v63, %v977_v43  ;;  %v1004_v16 = vadd.f32 %v992_v63, %v980_v44  ;;  %v1007_v2 = vadd.f32 %v992_v63, %v983_v45  ;;  %v1010_v5 = vadd.f32 %v992_v63, %v986_v46 }
 0x2bc   :  { %v1003_v9 = vadd.f32 %v1000_v1, %v979_v60  ;;  %v1006_v0 = vadd.f32 %v1000_v1, %v982_v18  ;;  %v1009_v7 = vadd.f32 %v1000_v1, %v985_v19  ;;  %v1012_v53 = vadd.f32 %v1000_v1, %v988_v23  ;;  %v1185_v19 = vld [vmem:[%s6326_s2 + $0xf0] sm:$0xff]  ;;  %v1184_v23 = vld [vmem:[%s6326_s2 + $0xe8] sm:$0xff] }
 0x2bd   :  { %v1013_v3 = vmax.f32 %v1001_v10, 0.0  ;;  %v1016_v48 = vmax.f32 %v1004_v16, 0.0  ;;  %v1019_v49 = vmax.f32 %v1007_v2, 0.0  ;;  %v1022_v50 = vmax.f32 %v1010_v5, 0.0 }
 0x2be   :  { %v1015_v14 = vmax.f32 %v1003_v9, 0.0  ;;  %v1018_v51 = vmax.f32 %v1006_v0, 0.0  ;;  %v1021_v52 = vmax.f32 %v1009_v7, 0.0  ;;  %v1024_v54 = vmax.f32 %v1012_v53, 0.0  ;;  %v1180_v7 = vld [vmem:[%s6326_s2 + $0xc8] sm:$0xff] }
 0x2bf   :  { %v1040_v56 = vrot.slane %v1013_v3, 6  ;;  %v1043_v57 = vrot.slane %v1016_v48, 6  ;;  %v1083_v58 = vrot.slane %v1019_v49, 2  ;;  %v1086_v59 = vrot.slane %v1022_v50, 2  ;;  %v1179_v48 = vld [vmem:[%s6326_s2 + $0xc0] sm:$0xff] }
 0x2c0   :  { %v1042_v24 = vrot.slane %v1015_v14, 6  ;;  %v1047_v25 = vrot.slane %v1018_v51, 6  ;;  %v1085_v26 = vrot.slane %v1021_v52, 2  ;;  %v1090_v27 = vrot.slane %v1024_v54, 2  ;;  %v1233_v51 = vld [vmem:[%s6326_s2 + $0x270] sm:$0xff] }
 0x2c1   :  { %v4741_v30 = vsel %vm1039_vm8, %v1040_v56, %v1043_v57  ;;  %1058 = vst [vmem:[#allocation2] sm:$0xfc] %v1040_v56  ;;  %1065 = vst [vmem:[#allocation2 + $0x30] sm:$0x3] %v1043_v57  ;;  %v4744_v31 = vsel %vm1082_vm9, %v1083_v58, %v1086_v59  ;;  %v996_v32 = vrot.slane %v892_v55, %v4721_v36  ;;  %v1232_v56 = vld [vmem:[%s6326_s2 + $0x268] sm:$0xff] }
 0x2c2   :  { %1101 = vst [vmem:[#allocation2 + $0x30] sm:$0xc0] %v1083_v58  ;;  %1107 = vst [vmem:[#allocation2 + $0x60] sm:$0x3f] %v1086_v59  ;;  %v1048_v33 = vsel %vm1039_vm8, %v1042_v24, %v1047_v25  ;;  %v1091_v34 = vsel %vm1082_vm9, %v1085_v26, %v1090_v27  ;;  %v1258_v3 = vrot.slane %v4741_v30, 1  ;;  %v1178_v58 = vld [vmem:[%s6326_s2 + $0xb8] sm:$0xff] }
 0x2c3   :  { %1062 = vst [vmem:[#allocation2 + $0x18] sm:$0xff] %v4741_v30  ;;  %1104 = vst [vmem:[#allocation2 + $0x48] sm:$0xff] %v4744_v31  ;;  %v1002_v35 = vadd.f32 %v996_v32, %v978_v4  ;;  %v1005_v37 = vadd.f32 %v996_v32, %v981_v12  ;;  %v1008_v38 = vadd.f32 %v996_v32, %v984_v13  ;;  %v1183_v4 = vld [vmem:[%s6326_s2 + $0xe0] sm:$0xff]  ;;  %v1182_v12 = vld [vmem:[%s6326_s2 + $0xd8] sm:$0xff] }
 0x2c4   :  { %1061 = vst.msk [vmem:[#allocation2 + $0x10] sm:$0xfc] %vm1060_vm10, %v1042_v24  ;;  %v1011_v39 = vadd.f32 %v996_v32, %v987_v29  ;;  %v1230_v29 = vld [vmem:[%s6326_s2 + $0x258] sm:$0xff] }
 0x2c5   :  { %1067 = vst.msk [vmem:[#allocation2 + $0x40] sm:$0x3] %vm1027_vm4, %v1047_v25  ;;  %v1014_v40 = vmax.f32 %v1002_v35, 0.0  ;;  %v1017_v41 = vmax.f32 %v1005_v37, 0.0  ;;  %v1020_v42 = vmax.f32 %v1008_v38, 0.0  ;;  %v1231_v25 = vld [vmem:[%s6326_s2 + $0x260] sm:$0xff] }
 0x2c6   :  { %1103 = vst.msk [vmem:[#allocation2 + $0x40] sm:$0xc0] %vm1074_vm5, %v1085_v26  ;;  %v1023_v43 = vmax.f32 %v1011_v39, 0.0  ;;  %v1177_v37 = vld [vmem:[%s6326_s2 + $0xb0] sm:$0xff] }
 0x2c7   :  { %1110 = vst.msk [vmem:[#allocation2 + $0x70] sm:$0x3f] %vm1109_vm11, %v1090_v27  ;;  %v1041_v44 = vrot.slane %v1014_v40, 6  ;;  %v1045_v45 = vrot.slane %v1017_v41, 6  ;;  %v1084_v46 = vrot.slane %v1020_v42, 2  ;;  %v1228_v41 = vld [vmem:[%s6326_s2 + $0x248] sm:$0xff] }
 0x2c8   :  { %1064 = vst.msk [vmem:[#allocation2 + $0x28] sm:$0xff] %vm276_vm2, %v1048_v33  ;;  %1106 = vst.msk [vmem:[#allocation2 + $0x58] sm:$0xff] %vm276_vm2, %v1091_v34  ;;  %v1088_v47 = vrot.slane %v1023_v43, 2  ;;  %v1235_v63 = vld [vmem:[#allocation2] sm:$0xfe]  ;;  %v1229_v33 = vld [vmem:[%s6326_s2 + $0x250] sm:$0xff] }
 0x2c9   :  { %v4758_v60 = vsel %vm1039_vm8, %v1041_v44, %v1045_v45  ;;  %1059 = vst [vmem:[#allocation2 + $0x8] sm:$0xfc] %v1041_v44  ;;  %1066 = vst [vmem:[#allocation2 + $0x38] sm:$0x3] %v1045_v45  ;;  %v1257_v8 = vrot.slane %v1235_v63, 1  ;;  %v1176_v45 = vld [vmem:[%s6326_s2 + $0xa8] sm:$0xff] }
 0x2ca   :  { %v4761_v61 = vsel %vm1082_vm9, %v1084_v46, %v1088_v47  ;;  %1102 = vst [vmem:[#allocation2 + $0x38] sm:$0xc0] %v1084_v46  ;;  %1108 = vst [vmem:[#allocation2 + $0x68] sm:$0x3f] %v1088_v47  ;;  %v1261_v5 = vrot.slane %v4758_v60, 1  ;;  %v1227_v46 = vld [vmem:[%s6326_s2 + $0x240] sm:$0xff] }
 0x2cb   :  { %v1237_v62 = vld [vmem:[#allocation2 + $0x10] sm:$0xfe]  ;;  %1063 = vst [vmem:[#allocation2 + $0x20] sm:$0xff] %v4758_v60  ;;  %1105 = vst [vmem:[#allocation2 + $0x50] sm:$0xff] %v4761_v61  ;;  %v1238_v53 = vld [vmem:[#allocation2 + $0x30] sm:$0x1]  ;;  %v1259_v55 = vsel %vm1256_vm12, %v1257_v8, %v1258_v3 }
 0x2cc   :  { %v1263_v6 = vrot.slane %v1237_v62, 1  ;;  %v1240_v18 = vld [vmem:[#allocation2 + $0x40] sm:$0x1]  ;;  %v1758_v50 = vld [vmem:[#allocation2 + $0x10] sm:$0xfc]  ;;  %v1266_v57 = vrot.slane %v1238_v53, 1 }
 0x2cd   :  { %v1270_v22 = vrot.slane %v1240_v18, 1  ;;  %v1243_v16 = vld [vmem:[#allocation2 + $0x40] sm:$0xe0]  ;;  %v1761_v59 = vld [vmem:[#allocation2 + $0x40] sm:$0x3]  ;;  %v1780_v27 = vrot.slane %v1758_v50, 2 }
 0x2ce   :  { %v1289_v52 = vrot.slane %v1243_v16, 5  ;;  %v1241_v32 = vld [vmem:[#allocation2 + $0x30] sm:$0xe0]  ;;  %v1287_v34 = vrot.slane %v4761_v61, 5  ;;  %v1787_v39 = vrot.slane %v1761_v59, 2  ;;  %v1267_v40 = vsel %vm1256_vm12, %v1258_v3, %v1266_v57  ;;  %v1226_v18 = vld [vmem:[%s6326_s2 + $0x238] sm:$0xff] }
 0x2cf   :  { %v4765_v21 = vld [vmem:[#allocation2 + $0x28] sm:$0xff]  ;;  %v4786_v13 = vld [vmem:[#allocation2 + $0x58] sm:$0xff]  ;;  %v1246_v43 = vld [vmem:[#allocation2 + $0x70] sm:$0x1f]  ;;  %v1283_v47 = vrot.slane %v1241_v32, 5 }
 0x2d0   :  { %v1264_v20 = vrot.slane %v4765_v21, 1  ;;  %v1236_v17 = vld [vmem:[#allocation2 + $0x8] sm:$0xfe]  ;;  %v1239_v10 = vld [vmem:[#allocation2 + $0x38] sm:$0x1]  ;;  %v1290_v54 = vrot.slane %v4786_v13, 5 }
 0x2d1   :  { %v1260_v2 = vrot.slane %v1236_v17, 1  ;;  %v1268_v9 = vrot.slane %v1239_v10, 1  ;;  %v1242_v49 = vld [vmem:[#allocation2 + $0x38] sm:$0xe0]  ;;  %v1781_v28 = vrot.slane %v4765_v21, 2  ;;  %v1296_v63 = vrot.slane %v1246_v43, 5 }
 0x2d2   :  { %v1265_v1 = vsel %vm1256_vm12, %v1263_v6, %v1264_v20  ;;  %v1271_v0 = vsel %vm1256_vm12, %v1264_v20, %v1270_v22  ;;  %v1286_v26 = vrot.slane %v1242_v49, 5  ;;  %v1291_v35 = vsel %vm1282_vm13, %v1289_v52, %v1290_v54  ;;  %v1245_v42 = vld [vmem:[#allocation2 + $0x68] sm:$0x1f]  ;;  %v1175_v6 = vld [vmem:[%s6326_s2 + $0xa0] sm:$0xff]  ;;  %v1173_v8 = vld [vmem:[%s6326_s2 + $0x90] sm:$0xff] }
 0x2d3   :  { %3438 = vmatmul.mubr.msk.f32.vlgmr.msra.gmra.mxu1 %vm276_vm2, %v1265_v1  ;;  %v1262_v14 = vsel %vm1256_vm12, %v1260_v2, %v1261_v5  ;;  %v1269_v24 = vsel %vm1256_vm12, %v1261_v5, %v1268_v9  ;;  %v4830_v38 = vsel %vm1082_vm9, %v1780_v27, %v1781_v28  ;;  %v4845_v62 = vsel %vm1082_vm9, %v1781_v28, %v1787_v39  ;;  %v1174_v1 = vld [vmem:[%s6326_s2 + $0x98] sm:$0xff]  ;;  %v1244_v22 = vld [vmem:[#allocation2 + $0x60] sm:$0x1f]  ;;  %v1172_v10 = vld [vmem:[%s6326_s2 + $0x88] sm:$0xff] }
 0x2d4   :  { %1579 = vmatpush1.msra.mxu1 %v1185_v19  ;;  %1550 = vmatprep.mubr.f32.mxu1 %v6368_v15  ;;  %v1288_v44 = vsel %vm1282_vm13, %v1286_v26, %v1287_v34  ;;  %v1284_v20 = vrot.slane %v4744_v31, 5  ;;  %v1294_v19 = vrot.slane %v1245_v42, 5  ;;  %v1297_v17 = vsel %vm1282_vm13, %v1290_v54, %v1296_v63  ;;  %v1223_v2 = vld [vmem:[%s6326_s2 + $0x220] sm:$0xff]  ;;  %v1112_v9 = vld [vmem:[#allocation2 + $0x8] sm:$0xff]  ;;  %v1221_v53 = vld [vmem:[%s6326_s2 + $0x210] sm:$0xff] }
 0x2d5   :  { %1580 = vmatprep.subr.mxu1 %v1184_v23  ;;  %1455 = vmatprep.mubr.f32.mxu0 %v1262_v14  ;;  %v1225_v23 = vld [vmem:[%s6326_s2 + $0x230] sm:$0xff]  ;;  %v1292_v16 = vrot.slane %v1244_v22, 5  ;;  %v1171_v5 = vld [vmem:[%s6326_s2 + $0x80] sm:$0xff]  ;;  %v1220_v49 = vld [vmem:[%s6326_s2 + $0x208] sm:$0xff] }
 0x2d6   :  { %1581 = vmatpush1.msra.mxu1 %v1183_v4  ;;  %1456 = vmatmul.mubr.f32.vlgmr.msra.gmra.mxu0 %v1259_v55  ;;  %v1285_v4 = vsel %vm1282_vm13, %v1283_v47, %v1284_v20  ;;  %v1168_v50 = vld [vmem:[%s6326_s2 + $0x68] sm:$0xff]  ;;  %v1219_v14 = vld [vmem:[%s6326_s2 + $0x200] sm:$0xff]  ;;  %v3477_v52 = vld [vmem:[%s6326_s2 + $0x5f8] sm:$0xff] }
 0x2d7   :  { %1582 = vmatprep.subr.mxu1 %v1182_v12  ;;  %3439 = vmatmul.mubr.msk.f32.gmra.mxu1 %vm276_vm2, %v1271_v0  ;;  %v1224_v12 = vld [vmem:[%s6326_s2 + $0x228] sm:$0xff]  ;;  %v1222_v0 = vld [vmem:[%s6326_s2 + $0x218] sm:$0xff]  ;;  %v1293_v3 = vsel %vm1282_vm13, %v1284_v20, %v1292_v16  ;;  %v1165_v55 = vld [vmem:[%s6326_s2 + $0x50] sm:$0xff] }
 0x2d8   :  { %1583 = vmatpush1.msra.mxu1 %v1181_v11  ;;  %1556 = vmatprep.mubr.f32.mxu1 %v6368_v15  ;;  %v1295_v11 = vsel %vm1282_vm13, %v1287_v34, %v1294_v19  ;;  %v1166_v54 = vld [vmem:[%s6326_s2 + $0x58] sm:$0xff]  ;;  %v1164_v57 = vld [vmem:[%s6326_s2 + $0x48] sm:$0xff]  ;;  %v1161_v28 = vld [vmem:[%s6326_s2 + $0x30] sm:$0xff] }
 0x2d9   :  { %1584 = vmatprep.subr.mxu1 %v1180_v7  ;;  %1684 = vmatpush1.msra.mxu0 %v1233_v51  ;;  %v1170_v7 = vld [vmem:[%s6326_s2 + $0x78] sm:$0xff]  ;;  %v1167_v51 = vld [vmem:[%s6326_s2 + $0x60] sm:$0xff]  ;;  %v3475_v59 = vld [vmem:[%s6326_s2 + $0x5e8] sm:$0xff] }
 0x2da   :  { %1585 = vmatpush1.msra.mxu1 %v1179_v48  ;;  %1461 = vmatprep.mubr.f32.mxu0 %v1269_v24  ;;  %v1169_v48 = vld [vmem:[%s6326_s2 + $0x70] sm:$0xff]  ;;  %v1163_v24 = vld [vmem:[%s6326_s2 + $0x40] sm:$0xff]  ;;  %v3473_v26 = vld [vmem:[%s6326_s2 + $0x5d8] sm:$0xff] }
 0x2db   :  { %1685 = vmatprep.subr.mxu0 %v1232_v56  ;;  %1586 = vmatprep.subr.mxu1 %v1178_v58  ;;  %v3476_v56 = vld [vmem:[%s6326_s2 + $0x5f0] sm:$0xff]  ;;  %v1162_v27 = vld [vmem:[%s6326_s2 + $0x38] sm:$0xff]  ;;  %v3471_v34 = vld [vmem:[%s6326_s2 + $0x5c8] sm:$0xff] }
 0x2dc   :  { %1686 = vmatpush1.msra.mxu0 %v1231_v25  ;;  %3440 = vmatmul.mubr.msk.f32.gmra.mxu1 %vm276_vm2, %v1291_v35  ;;  %v1113_v58 = vld [vmem:[#allocation2 + $0x10] sm:$0xff]  ;;  %v3474_v25 = vld [vmem:[%s6326_s2 + $0x5e0] sm:$0xff]  ;;  %v1158_v42 = vld [vmem:[%s6326_s2 + $0x18] sm:$0xff] }
 0x2dd   :  { %1687 = vmatprep.subr.mxu0 %v1230_v29  ;;  %1462 = vmatmul.mubr.f32.gmra.mxu0 %v1267_v40  ;;  %v1119_v29 = vld [vmem:[#allocation2 + $0x40] sm:$0xf0]  ;;  %v3472_v32 = vld [vmem:[%s6326_s2 + $0x5d0] sm:$0xff]  ;;  %v1143_v40 = vrot.slane %v4786_v13, 4  ;;  %v1757_v47 = vld [vmem:[#allocation2 + $0x8] sm:$0xfc] }
 0x2de   :  { %1688 = vmatpush1.msra.mxu0 %v1229_v33  ;;  %1467 = vmatprep.mubr.f32.mxu0 %v1288_v44  ;;  %v1160_v33 = vld [vmem:[%s6326_s2 + $0x28] sm:$0xff]  ;;  %v1159_v35 = vld [vmem:[%s6326_s2 + $0x20] sm:$0xff]  ;;  %v1142_v39 = vrot.slane %v1119_v29, 4  ;;  %v1157_v43 = vld [vmem:[%s6326_s2 + $0x10] sm:$0xff]  ;;  %v1777_v22 = vrot.slane %v1757_v47, 2 }
 0x2df   :  { %1587 = vmatpush1.msra.mxu1 %v1177_v37  ;;  %1689 = vmatprep.subr.mxu0 %v1228_v41  ;;  %v3470_v37 = vld [vmem:[%s6326_s2 + $0x5c0] sm:$0xff]  ;;  %v3469_v41 = vld [vmem:[%s6326_s2 + $0x5b8] sm:$0xff]  ;;  %v1125_v44 = vld [vmem:[#allocation2 + $0x70] sm:$0xf] }
 0x2e0   :  { %1588 = vmatprep.subr.mxu1 %v1176_v45  ;;  %1690 = vmatpush1.msra.mxu0 %v1227_v46  ;;  %v3468_v45 = vld [vmem:[%s6326_s2 + $0x5b0] sm:$0xff]  ;;  %v1156_v46 = vld [vmem:[%s6326_s2 + $0x8] sm:$0xff]  ;;  %v1155_v20 = vld [vmem:[%s6326_s2] sm:$0xff]  ;;  %v1149_v63 = vrot.slane %v1125_v44, 4 }
 0x2e1   :  { %1589 = vmatpush1.msra.mxu1 %v1175_v6  ;;  %1691 = vmatprep.subr.mxu0 %v1226_v18  ;;  %v1144_v6 = vsel %vm1135_vm14, %v1142_v39, %v1143_v40  ;;  %v3467_v18 = vld [vmem:[%s6326_s2 + $0x5a8] sm:$0xff]  ;;  %v3466_v19 = vld [vmem:[%s6326_s2 + $0x5a0] sm:$0xff]  ;;  %v1206_v29 = vld [vmem:[%s6326_s2 + $0x198] sm:$0xff] }
 0x2e2   :  { %1468 = vmatmul.mubr.f32.gmra.mxu0 %v1285_v4  ;;  %1562 = vmatprep.mubr.f32.mxu1 %v6368_v15  ;;  %v1217_v4 = vld [vmem:[%s6326_s2 + $0x1f0] sm:$0xff]  ;;  %v3450_v39 = vld [vmem:[%s6326_s2 + $0x520] sm:$0xff] }
 0x2e3   :  { %1590 = vmatprep.subr.mxu1 %v1174_v1  ;;  %1692 = vmatpush1.msra.mxu0 %v1225_v23  ;;  %v3465_v1 = vld [vmem:[%s6326_s2 + $0x598] sm:$0xff]  ;;  %v1201_v44 = vld [vmem:[%s6326_s2 + $0x170] sm:$0xff]  ;;  %v3446_v47 = vld [vmem:[%s6326_s2 + $0x500] sm:$0xff] }
 0x2e4   :  { %1473 = vmatprep.mubr.f32.mxu0 %v1295_v11  ;;  %3441 = vmatmul.mubr.msk.f32.gmra.mxu1 %vm276_vm2, %v1297_v17  ;;  %v1218_v23 = vld [vmem:[%s6326_s2 + $0x1f8] sm:$0xff]  ;;  %v1150_v11 = vsel %vm1135_vm14, %v1143_v40, %v1149_v63  ;;  %v3463_v17 = vld [vmem:[%s6326_s2 + $0x588] sm:$0xff]  ;;  %v1203_v40 = vld [vmem:[%s6326_s2 + $0x180] sm:$0xff] }
 0x2e5   :  { %1591 = vmatpush1.msra.mxu1 %v1173_v8  ;;  %1693 = vmatprep.subr.mxu0 %v1224_v12  ;;  %v3464_v8 = vld [vmem:[%s6326_s2 + $0x590] sm:$0xff]  ;;  %v1778_v12 = vrot.slane %v4758_v60, 2 }
 0x2e6   :  { %1592 = vmatprep.subr.mxu1 %v1172_v10  ;;  %1642 = vmatprep.mubr.f32.mxu1 %v1112_v9  ;;  %v1216_v10 = vld [vmem:[%s6326_s2 + $0x1e8] sm:$0xff]  ;;  %v3461_v9 = vld [vmem:[%s6326_s2 + $0x578] sm:$0xff]  ;;  %v1197_v63 = vld [vmem:[%s6326_s2 + $0x150] sm:$0xff] }
 0x2e7   :  { %1694 = vmatpush1.msra.mxu0 %v1223_v2  ;;  %1593 = vmatpush1.msra.mxu1 %v1171_v5  ;;  %v1779_v16 = vsel %vm1082_vm9, %v1777_v22, %v1778_v12  ;;  %v3462_v2 = vld [vmem:[%s6326_s2 + $0x580] sm:$0xff] }
 0x2e8   :  { %1695 = vmatprep.subr.mxu0 %v1222_v0  ;;  %1474 = vmatmul.mubr.f32.gmra.mxu0 %v1293_v3  ;;  %v1215_v5 = vld [vmem:[%s6326_s2 + $0x1e0] sm:$0xff]  ;;  %v1214_v0 = vld [vmem:[%s6326_s2 + $0x1d8] sm:$0xff]  ;;  %v3459_v3 = vld [vmem:[%s6326_s2 + $0x568] sm:$0xff] }
 0x2e9   :  { %1594 = vmatprep.subr.mxu1 %v1170_v7  ;;  %1696 = vmatpush1.msra.mxu0 %v1221_v53  ;;  %v3460_v7 = vld [vmem:[%s6326_s2 + $0x570] sm:$0xff]  ;;  %v3506_v22 = vld [vmem:[%s6326_s2 + $0x6e0] sm:$0xff] }
 0x2ea   :  { %1595 = vmatpush1.msra.mxu1 %v1169_v48  ;;  %1697 = vmatprep.subr.mxu0 %v1220_v49  ;;  %v1213_v53 = vld [vmem:[%s6326_s2 + $0x1d0] sm:$0xff]  ;;  %v1212_v48 = vld [vmem:[%s6326_s2 + $0x1c8] sm:$0xff]  ;;  %v2454_v49 = vrot.slane %v4765_v21, 4 }
 0x2eb   :  { %1596 = vmatprep.subr.mxu1 %v1168_v50  ;;  %1698 = vmatpush1.msra.mxu0 %v1219_v14  ;;  %v3458_v50 = vld [vmem:[%s6326_s2 + $0x560] sm:$0xff] }
 0x2ec   :  { %1597 = vmatpush1.msra.mxu1 %v1167_v51  ;;  %1731 = vmatprep.mubr.f32.mxu0 %v6368_v15  ;;  %v1211_v14 = vld [vmem:[%s6326_s2 + $0x1c0] sm:$0xff]  ;;  %v2434_v51 = vld [vmem:[#allocation2 + $0x10] sm:$0xf0] }
 0x2ed   :  { %1907 = vmatprep.subr.mxu0 %v3477_v52  ;;  %1598 = vmatprep.subr.mxu1 %v1166_v54  ;;  %v3457_v52 = vld [vmem:[%s6326_s2 + $0x558] sm:$0xff]  ;;  %v2453_v54 = vrot.slane %v2434_v51, 4 }
 0x2ee   :  { %3442 = vmatmul.mubr.msk.f32.vlgmr.msra.gmra.mxu0 %vm276_vm2, %v1113_v58  ;;  %1599 = vmatpush1.msra.mxu1 %v1165_v55  ;;  %v3456_v55 = vld [vmem:[%s6326_s2 + $0x550] sm:$0xff]  ;;  %v3455_v58 = vld [vmem:[%s6326_s2 + $0x548] sm:$0xff]  ;;  %v3497_v51 = vld [vmem:[%s6326_s2 + $0x698] sm:$0xff] }
 0x2ef   :  { %1908 = vmatpush1.msra.mxu0 %v3476_v56  ;;  %1600 = vmatprep.subr.mxu1 %v1164_v57  ;;  %v1209_v56 = vld [vmem:[%s6326_s2 + $0x1b0] sm:$0xff]  ;;  %v2437_v57 = vld [vmem:[#allocation2 + $0x40] sm:$0xf] }
 0x2f0   :  { %1909 = vmatprep.subr.mxu0 %v3475_v59  ;;  %1601 = vmatpush1.msra.mxu1 %v1163_v24  ;;  %v1208_v59 = vld [vmem:[%s6326_s2 + $0x1a8] sm:$0xff]  ;;  %v5063_v24 = vsel %vm1135_vm14, %v2453_v54, %v2454_v49  ;;  %v1111_v54 = vld [vmem:[#allocation2] sm:$0xff] }
 0x2f1   :  { %1910 = vmatpush1.msra.mxu0 %v3474_v25  ;;  %1737 = vmatprep.mubr.f32.mxu0 %v6368_v15  ;;  %v2460_v25 = vrot.slane %v2437_v57, 4  ;;  %v3524_v57 = vld [vmem:[%s6326_s2 + $0x770] sm:$0xff] }
 0x2f2   :  { %1911 = vmatprep.subr.mxu0 %v3473_v26  ;;  %1602 = vmatprep.subr.mxu1 %v1162_v27  ;;  %v3454_v26 = vld [vmem:[%s6326_s2 + $0x540] sm:$0xff] }
 0x2f3   :  { %3443 = vmatmul.mubr.msk.f32.gmra.mxu0 %vm276_vm2, %v4765_v21  ;;  %1603 = vmatpush1.msra.mxu1 %v1161_v28  ;;  %v1210_v21 = vld [vmem:[%s6326_s2 + $0x1b8] sm:$0xff]  ;;  %v1207_v27 = vld [vmem:[%s6326_s2 + $0x1a0] sm:$0xff] }
 0x2f4   :  { %1912 = vmatpush1.msra.mxu0 %v3472_v32  ;;  %1604 = vmatprep.subr.mxu1 %v1160_v33  ;;  %v3453_v28 = vld [vmem:[%s6326_s2 + $0x538] sm:$0xff]  ;;  %v5078_v32 = vsel %vm1135_vm14, %v2454_v49, %v2460_v25  ;;  %v3452_v33 = vld [vmem:[%s6326_s2 + $0x530] sm:$0xff]  ;;  %v1188_v49 = vld [vmem:[%s6326_s2 + $0x108] sm:$0xff] }
 0x2f5   :  { %1913 = vmatprep.subr.mxu0 %v3471_v34  ;;  %1605 = vmatpush1.msra.mxu1 %v1159_v35  ;;  %v1205_v34 = vld [vmem:[%s6326_s2 + $0x190] sm:$0xff]  ;;  %v3451_v35 = vld [vmem:[%s6326_s2 + $0x528] sm:$0xff]  ;;  %v3493_v25 = vld [vmem:[%s6326_s2 + $0x678] sm:$0xff] }
 0x2f6   :  { %1914 = vmatpush1.msra.mxu0 %v3470_v37  ;;  %1743 = vmatprep.mubr.f32.mxu0 %v6368_v15  ;;  %v1204_v37 = vld [vmem:[%s6326_s2 + $0x188] sm:$0xff] }
 0x2f7   :  { %1915 = vmatprep.subr.mxu0 %v3469_v41  ;;  %1606 = vmatprep.subr.mxu1 %v1158_v42  ;;  %v3449_v41 = vld [vmem:[%s6326_s2 + $0x518] sm:$0xff] }
 0x2f8   :  { %3444 = vmatmul.mubr.msk.f32.gmra.mxu0 %vm276_vm2, %v1144_v6  ;;  %1607 = vmatpush1.msra.mxu1 %v1157_v43  ;;  %v1202_v42 = vld [vmem:[%s6326_s2 + $0x178] sm:$0xff]  ;;  %v3448_v43 = vld [vmem:[%s6326_s2 + $0x510] sm:$0xff]  ;;  %v1199_v6 = vld [vmem:[%s6326_s2 + $0x160] sm:$0xff] }
 0x2f9   :  { %1916 = vmatpush1.msra.mxu0 %v3468_v45  ;;  %1608 = vmatprep.subr.mxu1 %v1156_v46  ;;  %v3447_v45 = vld [vmem:[%s6326_s2 + $0x508] sm:$0xff] }
 0x2fa   :  { %1917 = vmatprep.subr.mxu0 %v3467_v18  ;;  %1609 = vmatpush1.msra.mxu1 %v1155_v20  ;;  %v1200_v46 = vld [vmem:[%s6326_s2 + $0x168] sm:$0xff]  ;;  %v3509_v18 = vld [vmem:[%s6326_s2 + $0x6f8] sm:$0xff] }
 0x2fb   :  { %1918 = vmatpush1.msra.mxu0 %v3466_v19  ;;  %1749 = vmatprep.mubr.f32.mxu0 %v6368_v15  ;;  %v1198_v20 = vld [vmem:[%s6326_s2 + $0x158] sm:$0xff]  ;;  %v3508_v19 = vld [vmem:[%s6326_s2 + $0x6f0] sm:$0xff] }
 0x2fc   :  { %1919 = vmatprep.subr.mxu0 %v3465_v1  ;;  %1610 = vmatprep.subr.mxu1 %v1218_v23  ;;  %v3507_v1 = vld [vmem:[%s6326_s2 + $0x6e8] sm:$0xff] }
 0x2fd   :  { %3445 = vmatmul.mubr.msk.f32.gmra.mxu0 %vm276_vm2, %v1150_v11  ;;  %1611 = vmatpush2.msra.mxu1 %v1217_v4  ;;  %v1196_v23 = vld [vmem:[%s6326_s2 + $0x148] sm:$0xff]  ;;  %v1195_v4 = vld [vmem:[%s6326_s2 + $0x140] sm:$0xff]  ;;  %v1194_v11 = vld [vmem:[%s6326_s2 + $0x138] sm:$0xff] }
 0x2fe   :  { %1920 = vmatpush1.msra.mxu0 %v3464_v8  ;;  %1971 = vmatprep.mubr.f32.mxu0 %v1779_v16  ;;  %v3505_v8 = vld [vmem:[%s6326_s2 + $0x6d8] sm:$0xff]  ;;  %v3503_v16 = vld [vmem:[%s6326_s2 + $0x6c8] sm:$0xff] }
 0x2ff   :  { %1921 = vmatprep.subr.mxu0 %v3463_v17  ;;  %1612 = vmatprep.subr.mxu1 %v1216_v10  ;;  %v3504_v17 = vld [vmem:[%s6326_s2 + $0x6d0] sm:$0xff] }
 0x300   :  { %1922 = vmatpush1.msra.mxu0 %v3462_v2  ;;  %1613 = vmatpush2.msra.mxu1 %v1215_v5  ;;  %v1193_v10 = vld [vmem:[%s6326_s2 + $0x130] sm:$0xff]  ;;  %v1192_v2 = vld [vmem:[%s6326_s2 + $0x128] sm:$0xff]  ;;  %v3502_v5 = vld [vmem:[%s6326_s2 + $0x6c0] sm:$0xff] }
 0x301   :  { %1923 = vmatprep.subr.mxu0 %v3461_v9  ;;  %1614 = vmatprep.subr.mxu1 %v1214_v0  ;;  %v1191_v9 = vld [vmem:[%s6326_s2 + $0x120] sm:$0xff]  ;;  %v3501_v0 = vld [vmem:[%s6326_s2 + $0x6b8] sm:$0xff] }
 0x302   :  { %1924 = vmatpush1.msra.mxu0 %v3460_v7  ;;  %1615 = vmatpush2.msra.mxu1 %v1213_v53  ;;  %v1190_v7 = vld [vmem:[%s6326_s2 + $0x118] sm:$0xff]  ;;  %v3500_v53 = vld [vmem:[%s6326_s2 + $0x6b0] sm:$0xff] }
 0x303   :  { %1925 = vmatprep.subr.mxu0 %v3459_v3  ;;  %1616 = vmatprep.subr.mxu1 %v1212_v48  ;;  %v1189_v3 = vld [vmem:[%s6326_s2 + $0x110] sm:$0xff]  ;;  %v3499_v48 = vld [vmem:[%s6326_s2 + $0x6a8] sm:$0xff] }
 0x304   :  { %1926 = vmatpush1.msra.mxu0 %v3458_v50  ;;  %1617 = vmatpush2.msra.mxu1 %v1211_v14  ;;  %v3498_v50 = vld [vmem:[%s6326_s2 + $0x6a0] sm:$0xff] }
 0x305   :  { %1927 = vmatprep.subr.mxu0 %v3457_v52  ;;  %1618 = vmatprep.subr.mxu1 %v1210_v21  ;;  %v1187_v14 = vld [vmem:[%s6326_s2 + $0x100] sm:$0xff]  ;;  %v3496_v52 = vld [vmem:[%s6326_s2 + $0x690] sm:$0xff]  ;;  %v3525_v21 = vld [vmem:[%s6326_s2 + $0x778] sm:$0xff] }
 0x306   :  { %1928 = vmatpush1.msra.mxu0 %v3456_v55  ;;  %1619 = vmatpush2.msra.mxu1 %v1209_v56  ;;  %v3495_v55 = vld [vmem:[%s6326_s2 + $0x688] sm:$0xff]  ;;  %v1118_v56 = vld [vmem:[#allocation2 + $0x38] sm:$0xf0] }
 0x307   :  { %1929 = vmatprep.subr.mxu0 %v3455_v58  ;;  %1620 = vmatprep.subr.mxu1 %v1208_v59  ;;  %v3494_v58 = vld [vmem:[%s6326_s2 + $0x680] sm:$0xff]  ;;  %v3523_v59 = vld [vmem:[%s6326_s2 + $0x768] sm:$0xff] }
 0x308   :  { %1930 = vmatpush1.msra.mxu0 %v3454_v26  ;;  %1621 = vmatpush2.msra.mxu1 %v1207_v27  ;;  %v3522_v26 = vld [vmem:[%s6326_s2 + $0x760] sm:$0xff]  ;;  %v3492_v27 = vld [vmem:[%s6326_s2 + $0x670] sm:$0xff] }
 0x309   :  { %1931 = vmatprep.subr.mxu0 %v3453_v28  ;;  %1622 = vmatprep.subr.mxu1 %v1206_v29  ;;  %v1139_v28 = vrot.slane %v1118_v56, 4  ;;  %v3521_v29 = vld [vmem:[%s6326_s2 + $0x758] sm:$0xff] }
 0x30a   :  { %1932 = vmatpush1.msra.mxu0 %v3452_v33  ;;  %1623 = vmatpush2.msra.mxu1 %v1205_v34  ;;  %v1117_v33 = vld [vmem:[#allocation2 + $0x30] sm:$0xf0]  ;;  %v1140_v34 = vrot.slane %v4761_v61, 4 }
 0x30b   :  { %1933 = vmatprep.subr.mxu0 %v3451_v35  ;;  %1624 = vmatprep.subr.mxu1 %v1204_v37  ;;  %v3491_v35 = vld [vmem:[%s6326_s2 + $0x668] sm:$0xff] }
 0x30c   :  { %1934 = vmatpush1.msra.mxu0 %v3450_v39  ;;  %1625 = vmatpush2.msra.mxu1 %v1203_v40  ;;  %v1124_v37 = vld [vmem:[#allocation2 + $0x68] sm:$0xf]  ;;  %v3520_v39 = vld [vmem:[%s6326_s2 + $0x750] sm:$0xff]  ;;  %v3490_v40 = vld [vmem:[%s6326_s2 + $0x660] sm:$0xff] }
 0x30d   :  { %1935 = vmatprep.subr.mxu0 %v3449_v41  ;;  %1626 = vmatprep.subr.mxu1 %v1202_v42  ;;  %v1141_v41 = vsel %vm1135_vm14, %v1139_v28, %v1140_v34  ;;  %v3519_v42 = vld [vmem:[%s6326_s2 + $0x748] sm:$0xff] }
 0x30e   :  { %1936 = vmatpush1.msra.mxu0 %v3448_v43  ;;  %1627 = vmatpush2.msra.mxu1 %v1201_v44  ;;  %v3489_v43 = vld [vmem:[%s6326_s2 + $0x658] sm:$0xff]  ;;  %v1136_v44 = vrot.slane %v1117_v33, 4  ;;  %v3607_v33 = vld [vmem:[%s6326_s2 + $0x9e8] sm:$0xff] }
 0x30f   :  { %1937 = vmatprep.subr.mxu0 %v3447_v45  ;;  %1628 = vmatprep.subr.mxu1 %v1200_v46  ;;  %v3518_v45 = vld [vmem:[%s6326_s2 + $0x740] sm:$0xff]  ;;  %v3488_v46 = vld [vmem:[%s6326_s2 + $0x650] sm:$0xff] }
 0x310   :  { %1938 = vmatpush1.msra.mxu0 %v3446_v47  ;;  %1629 = vmatpush2.msra.mxu1 %v1199_v6  ;;  %v1147_v47 = vrot.slane %v1124_v37, 4  ;;  %v1137_v6 = vrot.slane %v4744_v31, 4  ;;  %v3486_v31 = vld [vmem:[%s6326_s2 + $0x640] sm:$0xff] }
 0x311   :  { %1939 = vmatprep.subr.mxu0 %v3509_v18  ;;  %1630 = vmatprep.subr.mxu1 %v1198_v20  ;;  %v3517_v18 = vld [vmem:[%s6326_s2 + $0x738] sm:$0xff]  ;;  %v1123_v20 = vld [vmem:[#allocation2 + $0x60] sm:$0xf] }
 0x312   :  { %1940 = vmatpush2.msra.mxu0 %v3508_v19  ;;  %1631 = vmatpush2.msra.mxu1 %v1197_v63  ;;  %v3487_v19 = vld [vmem:[%s6326_s2 + $0x648] sm:$0xff]  ;;  %v1138_v63 = vsel %vm1135_vm14, %v1136_v44, %v1137_v6  ;;  %v3553_v44 = vld [vmem:[%s6326_s2 + $0x838] sm:$0xff] }
 0x313   :  { %1941 = vmatprep.subr.mxu0 %v3507_v1  ;;  %1632 = vmatprep.subr.mxu1 %v1196_v23  ;;  %v3516_v1 = vld [vmem:[%s6326_s2 + $0x730] sm:$0xff]  ;;  %v1148_v23 = vsel %vm1135_vm14, %v1140_v34, %v1147_v47 }
 0x314   :  { %1942 = vmatpush2.msra.mxu0 %v3506_v22  ;;  %1633 = vmatpush2.msra.mxu1 %v1195_v4  ;;  %v3515_v22 = vld [vmem:[%s6326_s2 + $0x728] sm:$0xff]  ;;  %v3485_v4 = vld [vmem:[%s6326_s2 + $0x638] sm:$0xff] }
 0x315   :  { %1943 = vmatprep.subr.mxu0 %v3505_v8  ;;  %1634 = vmatprep.subr.mxu1 %v1194_v11  ;;  %v1145_v8 = vrot.slane %v1123_v20, 4  ;;  %v3514_v11 = vld [vmem:[%s6326_s2 + $0x720] sm:$0xff] }
 0x316   :  { %1944 = vmatpush2.msra.mxu0 %v3504_v17  ;;  %1635 = vmatpush2.msra.mxu1 %v1193_v10  ;;  %v3484_v17 = vld [vmem:[%s6326_s2 + $0x630] sm:$0xff]  ;;  %v3513_v10 = vld [vmem:[%s6326_s2 + $0x718] sm:$0xff] }
 0x317   :  { %1945 = vmatprep.subr.mxu0 %v3503_v16  ;;  %1636 = vmatprep.subr.mxu1 %v1192_v2  ;;  %v3483_v16 = vld [vmem:[%s6326_s2 + $0x628] sm:$0xff]  ;;  %v3512_v2 = vld [vmem:[%s6326_s2 + $0x710] sm:$0xff] }
 0x318   :  { %1946 = vmatpush2.msra.mxu0 %v3502_v5  ;;  %1637 = vmatpush2.msra.mxu1 %v1191_v9  ;;  %v1146_v5 = vsel %vm1135_vm14, %v1137_v6, %v1145_v8  ;;  %v3482_v9 = vld [vmem:[%s6326_s2 + $0x620] sm:$0xff] }
 0x319   :  { %1947 = vmatprep.subr.mxu0 %v3501_v0  ;;  %1638 = vmatprep.subr.mxu1 %v1190_v7  ;;  %v3511_v0 = vld [vmem:[%s6326_s2 + $0x708] sm:$0xff]  ;;  %v3481_v7 = vld [vmem:[%s6326_s2 + $0x618] sm:$0xff]  ;;  %v3550_v8 = vld [vmem:[%s6326_s2 + $0x820] sm:$0xff] }
 0x31a   :  { %1948 = vmatpush2.msra.mxu0 %v3500_v53  ;;  %1639 = vmatpush2.msra.mxu1 %v1189_v3  ;;  %v3510_v53 = vld [vmem:[%s6326_s2 + $0x700] sm:$0xff] }
 0x31b   :  { %1949 = vmatprep.subr.mxu0 %v3499_v48  ;;  %1640 = vmatprep.subr.mxu1 %v1188_v49  ;;  %v1756_v3 = vld [vmem:[#allocation2] sm:$0xfc]  ;;  %v3480_v48 = vld [vmem:[%s6326_s2 + $0x610] sm:$0xff]  ;;  %v3561_v49 = vld [vmem:[%s6326_s2 + $0x878] sm:$0xff] }
 0x31c   :  { %1950 = vmatpush2.msra.mxu0 %v3498_v50  ;;  %1641 = vmatpush2.msra.mxu1 %v1187_v14  ;;  %v1760_v50 = vld [vmem:[#allocation2 + $0x38] sm:$0x3]  ;;  %v3479_v14 = vld [vmem:[%s6326_s2 + $0x608] sm:$0xff] }
 0x31d   :  { %1951 = vmatprep.subr.mxu0 %v3497_v51  ;;  %1643 = vmatmul.mubr.f32.vlgmr.msra.gmra.mxu1 %v1111_v54  ;;  %v3560_v51 = vld [vmem:[%s6326_s2 + $0x870] sm:$0xff]  ;;  %v3559_v54 = vld [vmem:[%s6326_s2 + $0x868] sm:$0xff]  ;;  %v1785_v56 = vrot.slane %v1760_v50, 2 }
 0x31e   :  { %1952 = vmatpush2.msra.mxu0 %v3496_v52  ;;  %2012 = vmatprep.subr.mxu1 %v3525_v21  ;;  %v1774_v52 = vrot.slane %v1756_v3, 2  ;;  %v3478_v21 = vld [vmem:[%s6326_s2 + $0x600] sm:$0xff]  ;;  %v3547_v50 = vld [vmem:[%s6326_s2 + $0x808] sm:$0xff] }
 0x31f   :  { %1648 = vmatprep.mubr.f32.mxu1 %v4758_v60  ;;  %1953 = vmatprep.subr.mxu0 %v3495_v55  ;;  %v1775_v55 = vrot.slane %v4741_v30, 2  ;;  %v1786_v28 = vsel %vm1082_vm9, %v1778_v12, %v1785_v56  ;;  %v3606_v60 = vld [vmem:[%s6326_s2 + $0x9e0] sm:$0xff]  ;;  %v3545_v56 = vld [vmem:[%s6326_s2 + $0x7f8] sm:$0xff] }
 0x320   :  { %2013 = vmatpush1.msra.mxu1 %v3524_v57  ;;  %1954 = vmatpush2.msra.mxu0 %v3494_v58  ;;  %v3558_v57 = vld [vmem:[%s6326_s2 + $0x860] sm:$0xff]  ;;  %v3609_v58 = vld [vmem:[%s6326_s2 + $0x9f8] sm:$0xff] }
 0x321   :  { %2014 = vmatprep.subr.mxu1 %v3523_v59  ;;  %1955 = vmatprep.subr.mxu0 %v3493_v25  ;;  %v1759_v59 = vld [vmem:[#allocation2 + $0x30] sm:$0x3]  ;;  %v1776_v25 = vsel %vm1082_vm9, %v1774_v52, %v1775_v55  ;;  %v5410_v3 = vld [vmem:[#allocation2 + $0x20] sm:$0xff] }
 0x322   :  { %2015 = vmatpush1.msra.mxu1 %v3522_v26  ;;  %1956 = vmatpush2.msra.mxu0 %v3492_v27  ;;  %v1763_v26 = vld [vmem:[#allocation2 + $0x38] sm:$0xc0]  ;;  %v1764_v27 = vld [vmem:[#allocation2 + $0x40] sm:$0xc0]  ;;  %v1783_v34 = vrot.slane %v1759_v59, 2  ;;  %v3544_v59 = vld [vmem:[%s6326_s2 + $0x7f0] sm:$0xff] }
 0x323   :  { %1649 = vmatmul.mubr.f32.gmra.mxu1 %v4741_v30  ;;  %2016 = vmatprep.subr.mxu1 %v3521_v29  ;;  %v3608_v30 = vld [vmem:[%s6326_s2 + $0x9f0] sm:$0xff]  ;;  %v1802_v12 = vrot.slane %v1763_v26, 6  ;;  %v1805_v37 = vrot.slane %v1764_v27, 6  ;;  %v3598_v52 = vld [vmem:[%s6326_s2 + $0x9a0] sm:$0xff]  ;;  %v3892_v27 = vld [vmem:[#allocation2 + $0x28] sm:$0xff] }
 0x324   :  { %1654 = vmatprep.mubr.f32.mxu1 %v1141_v41  ;;  %1957 = vmatprep.subr.mxu0 %v3491_v35  ;;  %v3556_v29 = vld [vmem:[%s6326_s2 + $0x850] sm:$0xff]  ;;  %v3555_v35 = vld [vmem:[%s6326_s2 + $0x848] sm:$0xff] }
 0x325   :  { %2017 = vmatpush1.msra.mxu1 %v3520_v39  ;;  %1958 = vmatpush2.msra.mxu0 %v3490_v40  ;;  %v1806_v39 = vrot.slane %v4786_v13, 6  ;;  %v3605_v40 = vld [vmem:[%s6326_s2 + $0x9d8] sm:$0xff]  ;;  %v1762_v41 = vld [vmem:[#allocation2 + $0x30] sm:$0xc0] }
 0x326   :  { %2018 = vmatprep.subr.mxu1 %v3519_v42  ;;  %1959 = vmatprep.subr.mxu0 %v3489_v43  ;;  %v1784_v42 = vsel %vm1082_vm9, %v1775_v55, %v1783_v34  ;;  %v1803_v43 = vrot.slane %v4761_v61, 6  ;;  %v3604_v13 = vld [vmem:[%s6326_s2 + $0x9d0] sm:$0xff]  ;;  %v1799_v20 = vrot.slane %v1762_v41, 6  ;;  %v2098_v34 = vld [vmem:[#allocation2 + $0x40] sm:$0x7] }
 0x327   :  { %2019 = vmatpush1.msra.mxu1 %v3518_v45  ;;  %1960 = vmatpush2.msra.mxu0 %v3488_v46  ;;  %v1766_v45 = vld [vmem:[#allocation2 + $0x68] sm:$0x3f]  ;;  %v1767_v46 = vld [vmem:[#allocation2 + $0x70] sm:$0x3f]  ;;  %v1807_v6 = vsel %vm1039_vm8, %v1805_v37, %v1806_v39  ;;  %v3642_v41 = vld [vmem:[%s6326_s2 + $0xae0] sm:$0xff] }
 0x328   :  { %1655 = vmatmul.mubr.f32.gmra.mxu1 %v1138_v63  ;;  %2020 = vmatprep.subr.mxu1 %v3517_v18  ;;  %v1804_v47 = vsel %vm1039_vm8, %v1802_v12, %v1803_v43  ;;  %v3552_v61 = vld [vmem:[%s6326_s2 + $0x830] sm:$0xff]  ;;  %v3603_v18 = vld [vmem:[%s6326_s2 + $0x9c8] sm:$0xff]  ;;  %v3602_v63 = vld [vmem:[%s6326_s2 + $0x9c0] sm:$0xff] }
 0x329   :  { %1660 = vmatprep.mubr.f32.mxu1 %v1148_v23  ;;  %1961 = vmatprep.subr.mxu0 %v3487_v19  ;;  %v3551_v19 = vld [vmem:[%s6326_s2 + $0x828] sm:$0xff]  ;;  %v2095_v55 = vld [vmem:[#allocation2 + $0x10] sm:$0xf8] }
 0x32a   :  { %2021 = vmatpush1.msra.mxu1 %v3516_v1  ;;  %1962 = vmatpush2.msra.mxu0 %v3486_v31  ;;  %v2094_v1 = vld [vmem:[#allocation2 + $0x8] sm:$0xf8]  ;;  %v2118_v26 = vrot.slane %v2095_v55, 3  ;;  %v3540_v37 = vld [vmem:[%s6326_s2 + $0x7d0] sm:$0xff] }
 0x32b   :  { %2022 = vmatprep.subr.mxu1 %v3515_v22  ;;  %1963 = vmatprep.subr.mxu0 %v3485_v4  ;;  %v5385_v31 = vld [vmem:[#allocation2 + $0x48] sm:$0xff]  ;;  %v1810_v22 = vrot.slane %v1766_v45, 6  ;;  %v1812_v4 = vrot.slane %v1767_v46, 6  ;;  %v3640_v45 = vld [vmem:[%s6326_s2 + $0xad0] sm:$0xff] }
 0x32c   :  { %2023 = vmatpush1.msra.mxu1 %v3514_v11  ;;  %1964 = vmatpush2.msra.mxu0 %v3484_v17  ;;  %v1800_v23 = vrot.slane %v5385_v31, 6  ;;  %v3601_v11 = vld [vmem:[%s6326_s2 + $0x9b8] sm:$0xff] }
 0x32d   :  { %1661 = vmatmul.mubr.f32.gmra.mxu1 %v1146_v5  ;;  %2024 = vmatprep.subr.mxu1 %v3513_v10  ;;  %v2115_v10 = vrot.slane %v2094_v1, 3  ;;  %v3549_v5 = vld [vmem:[%s6326_s2 + $0x818] sm:$0xff]  ;;  %v3534_v1 = vld [vmem:[%s6326_s2 + $0x7a0] sm:$0xff] }
 0x32e   :  { %1965 = vmatprep.subr.mxu0 %v3483_v16  ;;  %2025 = vmatpush1.msra.mxu1 %v3512_v2  ;;  %v1801_v17 = vsel %vm1039_vm8, %v1799_v20, %v1800_v23  ;;  %v1765_v16 = vld [vmem:[#allocation2 + $0x60] sm:$0x3f]  ;;  %v19_v2 = vstv %s6327_s8  ;;  %v5502_v20 = vld [vmem:[#allocation2 + $0x58] sm:$0xff] }
 0x32f   :  { %1966 = vmatpush2.msra.mxu0 %v3482_v9  ;;  %2026 = vmatprep.subr.mxu1 %v3511_v0  ;;  %v3600_v9 = vld [vmem:[%s6326_s2 + $0x9b0] sm:$0xff]  ;;  %20 = vst [vmem:[#allocation3] sm:$0x1] %v19_v2  ;;  %v1811_v0 = vsel %vm1039_vm8, %v1803_v43, %v1810_v22  ;;  %v3641_v43 = vld [vmem:[%s6326_s2 + $0xad8] sm:$0xff]  ;;  %v3531_v2 = vld [vmem:[%s6326_s2 + $0x788] sm:$0xff] }
 0x330   :  { %1967 = vmatprep.subr.mxu0 %v3481_v7  ;;  %2027 = vmatpush1.msra.mxu1 %v3510_v53  ;;  %v1813_v7 = vsel %vm1039_vm8, %v1806_v39, %v1812_v4  ;;  %v3548_v53 = vld [vmem:[%s6326_s2 + $0x810] sm:$0xff]  ;;  %v3643_v39 = vld [vmem:[%s6326_s2 + $0xae8] sm:$0xff]  ;;  %v3533_v4 = vld [vmem:[%s6326_s2 + $0x798] sm:$0xff] }
 0x331   :  { %2060 = vmatprep.mubr.f32.mxu1 %v6368_v15  ;;  %1968 = vmatpush2.msra.mxu0 %v3480_v48  ;;  %v2116_v48 = vrot.slane %v5410_v3, 3  ;;  %v2104_v22 = vld [vmem:[#allocation2 + $0x70] sm:$0x7f] }
 0x332   :  { %3526 = vmatmul.mubr.msk.f32.vlgmr.msra.gmra.mxu1 %vm276_vm2, %v4830_v38  ;;  %2246 = vmatprep.subr.mxu1 %v3561_v49  ;;  %v3557_v38 = vld [vmem:[%s6326_s2 + $0x858] sm:$0xff]  ;;  %v3599_v49 = vld [vmem:[%s6326_s2 + $0x9a8] sm:$0xff] }
 0x333   :  { %1969 = vmatprep.subr.mxu0 %v3479_v14  ;;  %2247 = vmatpush1.msra.mxu1 %v3560_v51  ;;  %v1808_v14 = vrot.slane %v1765_v16, 6  ;;  %v2117_v51 = vsel %vm2111_vm15, %v2115_v10, %v2116_v48  ;;  %v3635_v10 = vld [vmem:[%s6326_s2 + $0xaa8] sm:$0xff] }
 0x334   :  { %1970 = vmatpush2.msra.mxu0 %v3478_v21  ;;  %2248 = vmatprep.subr.mxu1 %v3559_v54  ;;  %v3546_v21 = vld [vmem:[%s6326_s2 + $0x800] sm:$0xff]  ;;  %v3597_v54 = vld [vmem:[%s6326_s2 + $0x998] sm:$0xff]  ;;  %v2433_v16 = vld [vmem:[#allocation2 + $0x8] sm:$0xf0] }
 0x335   :  { %1972 = vmatmul.mubr.f32.vlgmr.msra.gmra.mxu0 %v1776_v25  ;;  %2066 = vmatprep.mubr.f32.mxu1 %v6368_v15  ;;  %v3595_v25 = vld [vmem:[%s6326_s2 + $0x988] sm:$0xff] }
 0x336   :  { %2249 = vmatpush1.msra.mxu1 %v3558_v57  ;;  %2351 = vmatprep.subr.mxu0 %v3609_v58  ;;  %v3596_v57 = vld [vmem:[%s6326_s2 + $0x990] sm:$0xff]  ;;  %v1809_v58 = vsel %vm1039_vm8, %v1800_v23, %v1808_v14  ;;  %v3637_v23 = vld [vmem:[%s6326_s2 + $0xab8] sm:$0xff] }
 0x337   :  { %1977 = vmatprep.mubr.f32.mxu0 %v1786_v28  ;;  %3527 = vmatmul.mubr.msk.f32.gmra.mxu1 %vm276_vm2, %v4845_v62  ;;  %v3554_v62 = vld [vmem:[%s6326_s2 + $0x840] sm:$0xff]  ;;  %v2119_v28 = vrot.slane %v3892_v27, 3 }
 0x338   :  { %2250 = vmatprep.subr.mxu1 %v3557_v38  ;;  %2352 = vmatpush1.msra.mxu0 %v3608_v30  ;;  %v3543_v30 = vld [vmem:[%s6326_s2 + $0x7e8] sm:$0xff]  ;;  %v3594_v38 = vld [vmem:[%s6326_s2 + $0x980] sm:$0xff] }
 0x339   :  { %2251 = vmatpush1.msra.mxu1 %v3556_v29  ;;  %2353 = vmatprep.subr.mxu0 %v3607_v33  ;;  %v3542_v29 = vld [vmem:[%s6326_s2 + $0x7e0] sm:$0xff]  ;;  %v3645_v33 = vld [vmem:[%s6326_s2 + $0xaf8] sm:$0xff]  ;;  %v2120_v12 = vsel %vm2111_vm15, %v2118_v26, %v2119_v28  ;;  %v3587_v26 = vld [vmem:[%s6326_s2 + $0x948] sm:$0xff] }
 0x33a   :  { %2252 = vmatprep.subr.mxu1 %v3555_v35  ;;  %2354 = vmatpush1.msra.mxu0 %v3606_v60  ;;  %v3541_v35 = vld [vmem:[%s6326_s2 + $0x7d8] sm:$0xff]  ;;  %v3644_v60 = vld [vmem:[%s6326_s2 + $0xaf0] sm:$0xff]  ;;  %v3626_v27 = vld [vmem:[%s6326_s2 + $0xa60] sm:$0xff] }
 0x33b   :  { %1978 = vmatmul.mubr.f32.gmra.mxu0 %v1784_v42  ;;  %2072 = vmatprep.mubr.f32.mxu1 %v6368_v15  ;;  %v3538_v42 = vld [vmem:[%s6326_s2 + $0x7c0] sm:$0xff] }
 0x33c   :  { %2253 = vmatpush1.msra.mxu1 %v3554_v62  ;;  %2355 = vmatprep.subr.mxu0 %v3605_v40  ;;  %v3539_v62 = vld [vmem:[%s6326_s2 + $0x7c8] sm:$0xff]  ;;  %v2125_v40 = vrot.slane %v2098_v34, 3  ;;  %v3624_v34 = vld [vmem:[%s6326_s2 + $0xa50] sm:$0xff] }
 0x33d   :  { %1983 = vmatprep.mubr.f32.mxu0 %v1804_v47  ;;  %3528 = vmatmul.mubr.msk.f32.gmra.mxu1 %vm276_vm2, %v1807_v6  ;;  %v3536_v47 = vld [vmem:[%s6326_s2 + $0x7b0] sm:$0xff]  ;;  %v3639_v6 = vld [vmem:[%s6326_s2 + $0xac8] sm:$0xff] }
 0x33e   :  { %2254 = vmatprep.subr.mxu1 %v3553_v44  ;;  %2356 = vmatpush1.msra.mxu0 %v3604_v13  ;;  %v2101_v13 = vld [vmem:[#allocation2 + $0x40] sm:$0x80]  ;;  %v3537_v44 = vld [vmem:[%s6326_s2 + $0x7b8] sm:$0xff]  ;;  %v2126_v46 = vsel %vm2111_vm15, %v2119_v28, %v2125_v40 }
 0x33f   :  { %2255 = vmatpush1.msra.mxu1 %v3552_v61  ;;  %2357 = vmatprep.subr.mxu0 %v3603_v18  ;;  %v3535_v61 = vld [vmem:[%s6326_s2 + $0x7a8] sm:$0xff]  ;;  %v2144_v18 = vrot.slane %v2101_v13, 7  ;;  %v3586_v28 = vld [vmem:[%s6326_s2 + $0x940] sm:$0xff]  ;;  %v3581_v40 = vld [vmem:[%s6326_s2 + $0x918] sm:$0xff] }
 0x340   :  { %2256 = vmatprep.subr.mxu1 %v3551_v19  ;;  %2358 = vmatpush1.msra.mxu0 %v3602_v63  ;;  %v2145_v19 = vrot.slane %v5502_v20, 7  ;;  %v3638_v63 = vld [vmem:[%s6326_s2 + $0xac0] sm:$0xff]  ;;  %v3579_v13 = vld [vmem:[%s6326_s2 + $0x908] sm:$0xff] }
 0x341   :  { %1984 = vmatmul.mubr.f32.gmra.mxu0 %v1801_v17  ;;  %2078 = vmatprep.mubr.f32.mxu1 %v6368_v15  ;;  %v3532_v17 = vld [vmem:[%s6326_s2 + $0x790] sm:$0xff] }
 0x342   :  { %2257 = vmatpush1.msra.mxu1 %v3550_v8  ;;  %2359 = vmatprep.subr.mxu0 %v3601_v11  ;;  %v3636_v8 = vld [vmem:[%s6326_s2 + $0xab0] sm:$0xff]  ;;  %v2146_v11 = vsel %vm2137_vm0, %v2144_v18, %v2145_v19  ;;  %v3615_v18 = vld [vmem:[%s6326_s2 + $0xa08] sm:$0xff] }
 0x343   :  { %1989 = vmatprep.mubr.f32.mxu0 %v1811_v0  ;;  %3529 = vmatmul.mubr.msk.f32.gmra.mxu1 %vm276_vm2, %v1813_v7  ;;  %v3530_v0 = vld [vmem:[%s6326_s2 + $0x780] sm:$0xff]  ;;  %v3633_v7 = vld [vmem:[%s6326_s2 + $0xa98] sm:$0xff] }
 0x344   :  { %2258 = vmatprep.subr.mxu1 %v3549_v5  ;;  %2360 = vmatpush1.msra.mxu0 %v3600_v9  ;;  %v2151_v5 = vrot.slane %v2104_v22, 7  ;;  %v3634_v9 = vld [vmem:[%s6326_s2 + $0xaa0] sm:$0xff]  ;;  %v3573_v22 = vld [vmem:[%s6326_s2 + $0x8d8] sm:$0xff] }
 0x345   :  { %2259 = vmatpush1.msra.mxu1 %v3548_v53  ;;  %2310 = vmatprep.mubr.f32.mxu1 %v2117_v51  ;;  %v2450_v53 = vrot.slane %v2433_v16, 4  ;;  %v2451_v51 = vrot.slane %v5410_v3, 4  ;;  %v3570_v16 = vld [vmem:[%s6326_s2 + $0x8c0] sm:$0xff] }
 0x346   :  { %2361 = vmatprep.subr.mxu0 %v3599_v49  ;;  %2260 = vmatprep.subr.mxu1 %v3547_v50  ;;  %v3593_v49 = vld [vmem:[%s6326_s2 + $0x978] sm:$0xff]  ;;  %v3632_v50 = vld [vmem:[%s6326_s2 + $0xa90] sm:$0xff]  ;;  %v2152_v14 = vsel %vm2137_vm0, %v2145_v19, %v2151_v5  ;;  %v3575_v19 = vld [vmem:[%s6326_s2 + $0x8e8] sm:$0xff] }
 0x347   :  { %2362 = vmatpush1.msra.mxu0 %v3598_v52  ;;  %2261 = vmatpush1.msra.mxu1 %v3546_v21  ;;  %v3592_v52 = vld [vmem:[%s6326_s2 + $0x970] sm:$0xff]  ;;  %v3631_v21 = vld [vmem:[%s6326_s2 + $0xa88] sm:$0xff]  ;;  %v2452_v55 = vsel %vm1135_vm14, %v2450_v53, %v2451_v51  ;;  %v3569_v5 = vld [vmem:[%s6326_s2 + $0x8b8] sm:$0xff] }
 0x348   :  { %1990 = vmatmul.mubr.f32.gmra.mxu0 %v1809_v58  ;;  %2363 = vmatprep.subr.mxu0 %v3597_v54  ;;  %v3591_v54 = vld [vmem:[%s6326_s2 + $0x968] sm:$0xff]  ;;  %v3629_v58 = vld [vmem:[%s6326_s2 + $0xa78] sm:$0xff] }
 0x349   :  { %2262 = vmatprep.subr.mxu1 %v3545_v56  ;;  %2364 = vmatpush1.msra.mxu0 %v3596_v57  ;;  %v3630_v56 = vld [vmem:[%s6326_s2 + $0xa80] sm:$0xff]  ;;  %v3567_v53 = vld [vmem:[%s6326_s2 + $0x8a8] sm:$0xff] }
 0x34a   :  { %2263 = vmatpush1.msra.mxu1 %v3544_v59  ;;  %2365 = vmatprep.subr.mxu0 %v3595_v25  ;;  %v3590_v57 = vld [vmem:[%s6326_s2 + $0x960] sm:$0xff]  ;;  %v3589_v59 = vld [vmem:[%s6326_s2 + $0x958] sm:$0xff]  ;;  %v3628_v25 = vld [vmem:[%s6326_s2 + $0xa70] sm:$0xff] }
 0x34b   :  { %2264 = vmatprep.subr.mxu1 %v3543_v30  ;;  %2366 = vmatpush1.msra.mxu0 %v3594_v38  ;;  %v3588_v30 = vld [vmem:[%s6326_s2 + $0x950] sm:$0xff]  ;;  %v3627_v38 = vld [vmem:[%s6326_s2 + $0xa68] sm:$0xff] }
 0x34c   :  { %2399 = vmatprep.mubr.f32.mxu0 %v6368_v15  ;;  %2265 = vmatpush1.msra.mxu1 %v3542_v29  ;;  %v3625_v29 = vld [vmem:[%s6326_s2 + $0xa58] sm:$0xff] }
 0x34d   :  { %3610 = vmatmul.mubr.msk.f32.vlgmr.msra.gmra.mxu0 %vm276_vm2, %v2120_v12  ;;  %2556 = vmatprep.subr.mxu0 %v3645_v33  ;;  %v3585_v33 = vld [vmem:[%s6326_s2 + $0x938] sm:$0xff]  ;;  %v3583_v12 = vld [vmem:[%s6326_s2 + $0x928] sm:$0xff] }
 0x34e   :  { %2266 = vmatprep.subr.mxu1 %v3541_v35  ;;  %2557 = vmatpush1.msra.mxu0 %v3644_v60  ;;  %v3584_v35 = vld [vmem:[%s6326_s2 + $0x930] sm:$0xff]  ;;  %v3623_v60 = vld [vmem:[%s6326_s2 + $0xa48] sm:$0xff] }
 0x34f   :  { %2267 = vmatpush1.msra.mxu1 %v3540_v37  ;;  %2558 = vmatprep.subr.mxu0 %v3643_v39  ;;  %v3622_v37 = vld [vmem:[%s6326_s2 + $0xa40] sm:$0xff] }
 0x350   :  { %2268 = vmatprep.subr.mxu1 %v3539_v62  ;;  %2405 = vmatprep.mubr.f32.mxu0 %v6368_v15  ;;  %v3582_v39 = vld [vmem:[%s6326_s2 + $0x920] sm:$0xff]  ;;  %v3621_v62 = vld [vmem:[%s6326_s2 + $0xa38] sm:$0xff] }
 0x351   :  { %2559 = vmatpush1.msra.mxu0 %v3642_v41  ;;  %2269 = vmatpush1.msra.mxu1 %v3538_v42  ;;  %v3620_v41 = vld [vmem:[%s6326_s2 + $0xa30] sm:$0xff] }
 0x352   :  { %3611 = vmatmul.mubr.msk.f32.gmra.mxu0 %vm276_vm2, %v2126_v46  ;;  %2560 = vmatprep.subr.mxu0 %v3641_v43  ;;  %v3580_v42 = vld [vmem:[%s6326_s2 + $0x910] sm:$0xff]  ;;  %v3619_v43 = vld [vmem:[%s6326_s2 + $0xa28] sm:$0xff]  ;;  %v3617_v46 = vld [vmem:[%s6326_s2 + $0xa18] sm:$0xff] }
 0x353   :  { %2270 = vmatprep.subr.mxu1 %v3537_v44  ;;  %2561 = vmatpush1.msra.mxu0 %v3640_v45  ;;  %v3618_v44 = vld [vmem:[%s6326_s2 + $0xa20] sm:$0xff] }
 0x354   :  { %2271 = vmatpush1.msra.mxu1 %v3536_v47  ;;  %2562 = vmatprep.subr.mxu0 %v3639_v6  ;;  %v3578_v45 = vld [vmem:[%s6326_s2 + $0x900] sm:$0xff]  ;;  %v3577_v47 = vld [vmem:[%s6326_s2 + $0x8f8] sm:$0xff]  ;;  %v3616_v6 = vld [vmem:[%s6326_s2 + $0xa10] sm:$0xff] }
 0x355   :  { %2272 = vmatprep.subr.mxu1 %v3535_v61  ;;  %2411 = vmatprep.mubr.f32.mxu0 %v6368_v15  ;;  %v3576_v61 = vld [vmem:[%s6326_s2 + $0x8f0] sm:$0xff] }
 0x356   :  { %2563 = vmatpush1.msra.mxu0 %v3638_v63  ;;  %2273 = vmatpush1.msra.mxu1 %v3534_v1  ;;  %v3614_v63 = vld [vmem:[%s6326_s2 + $0xa00] sm:$0xff] }
 0x357   :  { %3612 = vmatmul.mubr.msk.f32.gmra.mxu0 %vm276_vm2, %v2146_v11  ;;  %2564 = vmatprep.subr.mxu0 %v3637_v23  ;;  %v3574_v1 = vld [vmem:[%s6326_s2 + $0x8e0] sm:$0xff]  ;;  %v3677_v23 = vld [vmem:[%s6326_s2 + $0xbf8] sm:$0xff]  ;;  %v3675_v11 = vld [vmem:[%s6326_s2 + $0xbe8] sm:$0xff] }
 0x358   :  { %2274 = vmatprep.subr.mxu1 %v3533_v4  ;;  %2565 = vmatpush1.msra.mxu0 %v3636_v8  ;;  %v3676_v4 = vld [vmem:[%s6326_s2 + $0xbf0] sm:$0xff] }
 0x359   :  { %2275 = vmatpush1.msra.mxu1 %v3532_v17  ;;  %2566 = vmatprep.subr.mxu0 %v3635_v10  ;;  %v3572_v8 = vld [vmem:[%s6326_s2 + $0x8d0] sm:$0xff]  ;;  %v3571_v17 = vld [vmem:[%s6326_s2 + $0x8c8] sm:$0xff]  ;;  %v3674_v10 = vld [vmem:[%s6326_s2 + $0xbe0] sm:$0xff] }
 0x35a   :  { %2276 = vmatprep.subr.mxu1 %v3531_v2  ;;  %2417 = vmatprep.mubr.f32.mxu0 %v6368_v15  ;;  %v3673_v2 = vld [vmem:[%s6326_s2 + $0xbd8] sm:$0xff] }
 0x35b   :  { %2567 = vmatpush1.msra.mxu0 %v3634_v9  ;;  %2277 = vmatpush1.msra.mxu1 %v3530_v0  ;;  %v3672_v9 = vld [vmem:[%s6326_s2 + $0xbd0] sm:$0xff] }
 0x35c   :  { %3613 = vmatmul.mubr.msk.f32.gmra.mxu0 %vm276_vm2, %v2152_v14  ;;  %2568 = vmatprep.subr.mxu0 %v3633_v7  ;;  %v3568_v0 = vld [vmem:[%s6326_s2 + $0x8b0] sm:$0xff]  ;;  %v3671_v7 = vld [vmem:[%s6326_s2 + $0xbc8] sm:$0xff]  ;;  %v2093_v14 = vld [vmem:[#allocation2] sm:$0xf8] }
 0x35d   :  { %2278 = vmatprep.subr.mxu1 %v3593_v49  ;;  %2569 = vmatpush1.msra.mxu0 %v3632_v50  ;;  %v3670_v49 = vld [vmem:[%s6326_s2 + $0xbc0] sm:$0xff] }
 0x35e   :  { %2620 = vmatprep.mubr.f32.mxu0 %v2452_v55  ;;  %2279 = vmatpush2.msra.mxu1 %v3592_v52  ;;  %v3566_v50 = vld [vmem:[%s6326_s2 + $0x8a0] sm:$0xff]  ;;  %v3669_v52 = vld [vmem:[%s6326_s2 + $0xbb8] sm:$0xff]  ;;  %v3564_v55 = vld [vmem:[%s6326_s2 + $0x890] sm:$0xff] }
 0x35f   :  { %2570 = vmatprep.subr.mxu0 %v3631_v21  ;;  %2280 = vmatprep.subr.mxu1 %v3591_v54  ;;  %v3565_v21 = vld [vmem:[%s6326_s2 + $0x898] sm:$0xff]  ;;  %v3668_v54 = vld [vmem:[%s6326_s2 + $0xbb0] sm:$0xff] }
 0x360   :  { %2571 = vmatpush1.msra.mxu0 %v3630_v56  ;;  %2281 = vmatpush2.msra.mxu1 %v3590_v57  ;;  %v2097_v56 = vld [vmem:[#allocation2 + $0x38] sm:$0x7]  ;;  %v3667_v57 = vld [vmem:[%s6326_s2 + $0xba8] sm:$0xff] }
 0x361   :  { %2572 = vmatprep.subr.mxu0 %v3629_v58  ;;  %2282 = vmatprep.subr.mxu1 %v3589_v59  ;;  %v3563_v58 = vld [vmem:[%s6326_s2 + $0x888] sm:$0xff]  ;;  %v2112_v59 = vrot.slane %v2093_v14, 3 }
 0x362   :  { %2573 = vmatpush1.msra.mxu0 %v3628_v25  ;;  %2283 = vmatpush2.msra.mxu1 %v3588_v30  ;;  %v3666_v25 = vld [vmem:[%s6326_s2 + $0xba0] sm:$0xff] }
 0x363   :  { %2574 = vmatprep.subr.mxu0 %v3627_v38  ;;  %2284 = vmatprep.subr.mxu1 %v3587_v26  ;;  %v3562_v30 = vld [vmem:[%s6326_s2 + $0x880] sm:$0xff]  ;;  %v3665_v38 = vld [vmem:[%s6326_s2 + $0xb98] sm:$0xff] }
 0x364   :  { %2575 = vmatpush1.msra.mxu0 %v3626_v27  ;;  %2285 = vmatpush2.msra.mxu1 %v3586_v28  ;;  %v5740_v26 = vld [vmem:[#allocation2 + $0x18] sm:$0xff]  ;;  %v2123_v28 = vrot.slane %v2097_v56, 3  ;;  %v3680_v56 = vld [vmem:[%s6326_s2 + $0xc10] sm:$0xff] }
 0x365   :  { %2576 = vmatprep.subr.mxu0 %v3625_v29  ;;  %2286 = vmatprep.subr.mxu1 %v3585_v33  ;;  %v2113_v27 = vrot.slane %v5740_v26, 3  ;;  %v3664_v29 = vld [vmem:[%s6326_s2 + $0xb90] sm:$0xff]  ;;  %v3693_v33 = vld [vmem:[%s6326_s2 + $0xc78] sm:$0xff] }
 0x366   :  { %2577 = vmatpush1.msra.mxu0 %v3624_v34  ;;  %2287 = vmatpush2.msra.mxu1 %v3584_v35  ;;  %v2096_v34 = vld [vmem:[#allocation2 + $0x30] sm:$0x7] }
 0x367   :  { %2578 = vmatprep.subr.mxu0 %v3623_v60  ;;  %2288 = vmatprep.subr.mxu1 %v3583_v12  ;;  %v2114_v35 = vsel %vm2111_vm15, %v2112_v59, %v2113_v27  ;;  %v3663_v60 = vld [vmem:[%s6326_s2 + $0xb88] sm:$0xff]  ;;  %v2100_v12 = vld [vmem:[#allocation2 + $0x38] sm:$0x80] }
 0x368   :  { %2579 = vmatpush1.msra.mxu0 %v3622_v37  ;;  %2289 = vmatpush2.msra.mxu1 %v3582_v39  ;;  %v3692_v37 = vld [vmem:[%s6326_s2 + $0xc70] sm:$0xff]  ;;  %v3662_v39 = vld [vmem:[%s6326_s2 + $0xb80] sm:$0xff]  ;;  %v3679_v59 = vld [vmem:[%s6326_s2 + $0xc08] sm:$0xff] }
 0x369   :  { %2580 = vmatprep.subr.mxu0 %v3621_v62  ;;  %2290 = vmatprep.subr.mxu1 %v3581_v40  ;;  %v2124_v62 = vsel %vm2111_vm15, %v2116_v48, %v2123_v28  ;;  %v3691_v40 = vld [vmem:[%s6326_s2 + $0xc68] sm:$0xff]  ;;  %v2141_v48 = vrot.slane %v2100_v12, 7  ;;  %v3648_v28 = vld [vmem:[%s6326_s2 + $0xb10] sm:$0xff]  ;;  %v2448_v12 = vrot.slane %v5740_v26, 4  ;;  %v3898_v26 = vmov 0  }
 0x36a   :  { %2581 = vmatpush1.msra.mxu0 %v3620_v41  ;;  %2291 = vmatpush2.msra.mxu1 %v3580_v42  ;;  %v3661_v41 = vld [vmem:[%s6326_s2 + $0xb78] sm:$0xff]  ;;  %v2121_v42 = vrot.slane %v2096_v34, 3  ;;  %v3646_v34 = vld [vmem:[%s6326_s2 + $0xb00] sm:$0xff] }
 0x36b   :  { %2582 = vmatprep.subr.mxu0 %v3619_v43  ;;  %2292 = vmatprep.subr.mxu1 %v3579_v13  ;;  %v3690_v43 = vld [vmem:[%s6326_s2 + $0xc60] sm:$0xff]  ;;  %v3660_v13 = vld [vmem:[%s6326_s2 + $0xb70] sm:$0xff] }
 0x36c   :  { %2583 = vmatpush1.msra.mxu0 %v3618_v44  ;;  %2293 = vmatpush2.msra.mxu1 %v3578_v45  ;;  %v3689_v44 = vld [vmem:[%s6326_s2 + $0xc58] sm:$0xff]  ;;  %v2099_v45 = vld [vmem:[#allocation2 + $0x30] sm:$0x80] }
 0x36d   :  { %2584 = vmatprep.subr.mxu0 %v3617_v46  ;;  %2294 = vmatprep.subr.mxu1 %v3577_v47  ;;  %v5777_v46 = vld [vmem:[#allocation2 + $0x50] sm:$0xff] }
 0x36e   :  { %2585 = vmatpush1.msra.mxu0 %v3616_v6  ;;  %2295 = vmatpush2.msra.mxu1 %v3576_v61  ;;  %v2142_v47 = vrot.slane %v5777_v46, 7  ;;  %v3659_v6 = vld [vmem:[%s6326_s2 + $0xb68] sm:$0xff] }
 0x36f   :  { %2586 = vmatprep.subr.mxu0 %v3615_v18  ;;  %2296 = vmatprep.subr.mxu1 %v3575_v19  ;;  %v2103_v61 = vld [vmem:[#allocation2 + $0x68] sm:$0x7f]  ;;  %v2122_v18 = vsel %vm2111_vm15, %v2113_v27, %v2121_v42  ;;  %v3688_v19 = vld [vmem:[%s6326_s2 + $0xc50] sm:$0xff]  ;;  %v2436_v27 = vld [vmem:[#allocation2 + $0x38] sm:$0xf] }
 0x370   :  { %2587 = vmatpush1.msra.mxu0 %v3614_v63  ;;  %2297 = vmatpush2.msra.mxu1 %v3574_v1  ;;  %v3658_v63 = vld [vmem:[%s6326_s2 + $0xb60] sm:$0xff]  ;;  %v2143_v1 = vsel %vm2137_vm0, %v2141_v48, %v2142_v47  ;;  %v2743_v42 = vld [vmem:[%s6328_s13 + $0x8] sm:$0xff]  ;;  %v3702_v48 = vld [vmem:[#allocation3] ss:$0 sm:$0xff] }
 0x371   :  { %2588 = vmatprep.subr.mxu0 %v3677_v23  ;;  %2298 = vmatprep.subr.mxu1 %v3573_v22  ;;  %v3687_v23 = vld [vmem:[%s6326_s2 + $0xc48] sm:$0xff]  ;;  %v3657_v22 = vld [vmem:[%s6326_s2 + $0xb58] sm:$0xff] }
 0x372   :  { %2589 = vmatpush2.msra.mxu0 %v3676_v4  ;;  %2299 = vmatpush2.msra.mxu1 %v3572_v8  ;;  %v2138_v4 = vrot.slane %v2099_v45, 7  ;;  %v3686_v8 = vld [vmem:[%s6326_s2 + $0xc40] sm:$0xff]  ;;  %v2439_v45 = vld [vmem:[#allocation2 + $0x68] sm:$0xff] }
 0x373   :  { %2590 = vmatprep.subr.mxu0 %v3675_v11  ;;  %2300 = vmatprep.subr.mxu1 %v3571_v17  ;;  %v3656_v11 = vld [vmem:[%s6326_s2 + $0xb50] sm:$0xff]  ;;  %v2149_v17 = vrot.slane %v2103_v61, 7 }
 0x374   :  { %2591 = vmatpush2.msra.mxu0 %v3674_v10  ;;  %2301 = vmatpush2.msra.mxu1 %v3570_v16  ;;  %v2139_v10 = vrot.slane %v5385_v31, 7  ;;  %v3685_v16 = vld [vmem:[%s6326_s2 + $0xc38] sm:$0xff] }
 0x375   :  { %2592 = vmatprep.subr.mxu0 %v3673_v2  ;;  %2302 = vmatprep.subr.mxu1 %v3569_v5  ;;  %v2102_v2 = vld [vmem:[#allocation2 + $0x60] sm:$0x7f]  ;;  %v3655_v5 = vld [vmem:[%s6326_s2 + $0xb48] sm:$0xff] }
 0x376   :  { %2593 = vmatpush2.msra.mxu0 %v3672_v9  ;;  %2303 = vmatpush2.msra.mxu1 %v3568_v0  ;;  %v2140_v9 = vsel %vm2137_vm0, %v2138_v4, %v2139_v10  ;;  %v3684_v0 = vld [vmem:[%s6326_s2 + $0xc30] sm:$0xff]  ;;  %v2147_v14 = vrot.slane %v2102_v2, 7  ;;  %v2835_v4 = vld [vmem:[%s6329_s11 + $0x48] sm:$0xff] }
 0x377   :  { %2594 = vmatprep.subr.mxu0 %v3671_v7  ;;  %2304 = vmatprep.subr.mxu1 %v3567_v53  ;;  %v3654_v7 = vld [vmem:[%s6326_s2 + $0xb40] sm:$0xff]  ;;  %v2150_v53 = vsel %vm2137_vm0, %v2142_v47, %v2149_v17 }
 0x378   :  { %2595 = vmatpush2.msra.mxu0 %v3670_v49  ;;  %2305 = vmatpush2.msra.mxu1 %v3566_v50  ;;  %v3683_v49 = vld [vmem:[%s6326_s2 + $0xc28] sm:$0xff]  ;;  %v3653_v50 = vld [vmem:[%s6326_s2 + $0xb38] sm:$0xff] }
 0x379   :  { %2596 = vmatprep.subr.mxu0 %v3669_v52  ;;  %2306 = vmatprep.subr.mxu1 %v3565_v21  ;;  %v3682_v52 = vld [vmem:[%s6326_s2 + $0xc20] sm:$0xff]  ;;  %v3652_v21 = vld [vmem:[%s6326_s2 + $0xb30] sm:$0xff] }
 0x37a   :  { %2597 = vmatpush2.msra.mxu0 %v3668_v54  ;;  %2307 = vmatpush2.msra.mxu1 %v3564_v55  ;;  %v3681_v54 = vld [vmem:[%s6326_s2 + $0xc18] sm:$0xff]  ;;  %v3651_v55 = vld [vmem:[%s6326_s2 + $0xb28] sm:$0xff] }
 0x37b   :  { %2598 = vmatprep.subr.mxu0 %v3667_v57  ;;  %2308 = vmatprep.subr.mxu1 %v3563_v58  ;;  %v2148_v57 = vsel %vm2137_vm0, %v2139_v10, %v2147_v14  ;;  %v3650_v58 = vld [vmem:[%s6326_s2 + $0xb20] sm:$0xff]  ;;  %v2832_v10 = vld [vmem:[%s6329_s11 + $0x30] sm:$0xff] }
 0x37c   :  { %2599 = vmatpush2.msra.mxu0 %v3666_v25  ;;  %2309 = vmatpush2.msra.mxu1 %v3562_v30  ;;  %v2432_v25 = vld [vmem:[#allocation2] sm:$0xf0]  ;;  %v3649_v30 = vld [vmem:[%s6326_s2 + $0xb18] sm:$0xff] }
 0x37d   :  { %2600 = vmatprep.subr.mxu0 %v3665_v38  ;;  %2311 = vmatmul.mubr.f32.vlgmr.msra.gmra.mxu1 %v2114_v35  ;;  %v3678_v38 = vld [vmem:[%s6326_s2 + $0xc00] sm:$0xff]  ;;  %v2458_v35 = vrot.slane %v2436_v27, 4 }
 0x37e   :  { %2601 = vmatpush2.msra.mxu0 %v3664_v29  ;;  %2661 = vmatprep.subr.mxu1 %v3693_v33  ;;  %v3647_v29 = vld [vmem:[%s6326_s2 + $0xb08] sm:$0xff]  ;;  %v2447_v33 = vrot.slane %v2432_v25, 4 }
 0x37f   :  { %2316 = vmatprep.mubr.f32.mxu1 %v2124_v62  ;;  %2602 = vmatprep.subr.mxu0 %v3663_v60  ;;  %v2435_v60 = vld [vmem:[#allocation2 + $0x30] sm:$0xf] }
 0x380   :  { %2662 = vmatpush1.msra.mxu1 %v3692_v37  ;;  %2603 = vmatpush2.msra.mxu0 %v3662_v39  ;;  %v2742_v37 = vld [vmem:[%s6328_s13] sm:$0xff]  ;;  %v2449_v39 = vsel %vm1135_vm14, %v2447_v33, %v2448_v12  ;;  %v2456_v62 = vrot.slane %v2435_v60, 4  ;;  %v2843_v60 = vld [vmem:[%s6329_s11 + $0x88] sm:$0xff] }
 0x381   :  { %2663 = vmatprep.subr.mxu1 %v3691_v40  ;;  %2604 = vmatprep.subr.mxu0 %v3661_v41  ;;  %v2459_v40 = vsel %vm1135_vm14, %v2451_v51, %v2458_v35  ;;  %v2745_v51 = vld [vmem:[%s6328_s13 + $0x18] sm:$0xff]  ;;  %v2844_v35 = vld [vmem:[%s6329_s11 + $0x90] sm:$0xff] }
 0x382   :  { %2664 = vmatpush1.msra.mxu1 %v3690_v43  ;;  %2605 = vmatpush2.msra.mxu0 %v3660_v13  ;;  %v2457_v3 = vsel %vm1135_vm14, %v2448_v12, %v2456_v62 }
 0x383   :  { %2317 = vmatmul.mubr.f32.gmra.mxu1 %v2122_v18  ;;  %2665 = vmatprep.subr.mxu1 %v3689_v44  ;;  %v2438_v18 = vld [vmem:[#allocation2 + $0x60] sm:$0xff] }
 0x384   :  { %2322 = vmatprep.mubr.f32.mxu1 %v2143_v1  ;;  %2606 = vmatprep.subr.mxu0 %v3659_v6  ;;  %v2838_v1 = vld [vmem:[%s6329_s11 + $0x60] sm:$0xff] }
 0x385   :  { %2666 = vmatpush1.msra.mxu1 %v3688_v19  ;;  %2607 = vmatpush2.msra.mxu0 %v3658_v63  ;;  %v2841_v19 = vld [vmem:[%s6329_s11 + $0x78] sm:$0xff]  ;;  %v2839_v63 = vld [vmem:[%s6329_s11 + $0x68] sm:$0xff] }
 0x386   :  { %2667 = vmatprep.subr.mxu1 %v3687_v23  ;;  %2608 = vmatprep.subr.mxu0 %v3657_v22  ;;  %v2837_v23 = vld [vmem:[%s6329_s11 + $0x58] sm:$0xff]  ;;  %v2836_v22 = vld [vmem:[%s6329_s11 + $0x50] sm:$0xff] }
 0x387   :  { %2668 = vmatpush1.msra.mxu1 %v3686_v8  ;;  %2609 = vmatpush2.msra.mxu0 %v3656_v11  ;;  %v2834_v8 = vld [vmem:[%s6329_s11 + $0x40] sm:$0xff]  ;;  %v2833_v11 = vld [vmem:[%s6329_s11 + $0x38] sm:$0xff] }
 0x388   :  { %2323 = vmatmul.mubr.f32.gmra.mxu1 %v2140_v9  ;;  %2669 = vmatprep.subr.mxu1 %v3685_v16  ;;  %v2831_v16 = vld [vmem:[%s6329_s11 + $0x28] sm:$0xff]  ;;  %v2829_v9 = vld [vmem:[%s6329_s11 + $0x18] sm:$0xff] }
 0x389   :  { %2328 = vmatprep.mubr.f32.mxu1 %v2150_v53  ;;  %2610 = vmatprep.subr.mxu0 %v3655_v5  ;;  %v2830_v5 = vld [vmem:[%s6329_s11 + $0x20] sm:$0xff] }
 0x38a   :  { %2670 = vmatpush1.msra.mxu1 %v3684_v0  ;;  %2611 = vmatpush2.msra.mxu0 %v3654_v7 }
 0x38b   :  { %2671 = vmatprep.subr.mxu1 %v3683_v49  ;;  %2612 = vmatprep.subr.mxu0 %v3653_v50 }
 0x38c   :  { %2672 = vmatpush1.msra.mxu1 %v3682_v52  ;;  %2613 = vmatpush2.msra.mxu0 %v3652_v21  ;;  %v2828_v52 = vld [vmem:[%s6329_s11 + $0x10] sm:$0xff]  ;;  %v2827_v21 = vld [vmem:[%s6329_s11 + $0x8] sm:$0xff] }
 0x38d   :  { %2329 = vmatmul.mubr.f32.gmra.mxu1 %v2148_v57  ;;  %2673 = vmatprep.subr.mxu1 %v3681_v54  ;;  %v2849_v57 = vld [vmem:[%s6329_s11 + $0xb8] sm:$0xff] }
 0x38e   :  { %2614 = vmatprep.subr.mxu0 %v3651_v55  ;;  %2674 = vmatpush1.msra.mxu1 %v3680_v56  ;;  %v2826_v55 = vld [vmem:[%s6329_s11] sm:$0xff] }
 0x38f   :  { %2615 = vmatpush2.msra.mxu0 %v3650_v58  ;;  %2675 = vmatprep.subr.mxu1 %v3679_v59  ;;  %v2848_v59 = vld [vmem:[%s6329_s11 + $0xb0] sm:$0xff] }
 0x390   :  { %2616 = vmatprep.subr.mxu0 %v3649_v30  ;;  %2676 = vmatpush1.msra.mxu1 %v3678_v38  ;;  %v2847_v30 = vld [vmem:[%s6329_s11 + $0xa8] sm:$0xff] }
 0x391   :  { %2709 = vmatprep.mubr.f32.mxu1 %v6368_v15  ;;  %2617 = vmatpush2.msra.mxu0 %v3648_v28  ;;  %v2846_v28 = vld [vmem:[%s6329_s11 + $0xa0] sm:$0xff] }
 0x392   :  { %3694 = vmatmul.mubr.msk.f32.vlgmr.msra.gmra.mxu1 %vm276_vm2, %v5063_v24  ;;  %2618 = vmatprep.subr.mxu0 %v3647_v29  ;;  %v2744_v24 = vld [vmem:[%s6328_s13 + $0x10] sm:$0xff]  ;;  %v2845_v29 = vld [vmem:[%s6329_s11 + $0x98] sm:$0xff] }
 0x393   :  { %2619 = vmatpush2.msra.mxu0 %v3646_v34  ;;  %2715 = vmatprep.mubr.f32.mxu1 %v6368_v15  ;;  %v1546_v41 = vpop.f32.mrf.mxu1 }
 0x394   :  { %2621 = vmatmul.mubr.f32.vlgmr.msra.gmra.mxu0 %v2449_v39  ;;  %3884 = vset.pattern.permute.xlu0 %v3898_v26  ;;  %v2842_v39 = vld [vmem:[%s6329_s11 + $0x80] sm:$0xff] }
 0x395   :  { %2626 = vmatprep.mubr.f32.mxu0 %v2459_v40  ;;  %2748 = vperm.xlu0 %3884, %v2742_v37  }
 0x396   :  { %3695 = vmatmul.mubr.msk.f32.gmra.mxu1 %vm276_vm2, %v5078_v32  ;;  %3885 = vset.pattern.permute.xlu1 %v3898_v26  ;;  %v1548_v32 = vpop.f32.mrf.mxu1  ;;  %v1457_v43 = vpop.f32.mrf.mxu0 }
 0x397   :  { %2721 = vmatprep.mubr.f32.mxu1 %v6368_v15  ;;  %2758 = vperm.xlu1 %3885, %v2744_v24   ;;  %v5890_v13 = vadd.f32 %v1546_v41, %v1457_v43 }
 0x398   :  { %2627 = vmatmul.mubr.f32.gmra.mxu0 %v2457_v3  ;;  %2853 = vmatprep.subr.mxu1 %v6368_v15  ;;  %v1459_v44 = vpop.f32.mrf.mxu0  ;;  %v1552_v6 = vpop.f32.mrf.mxu1 }
 0x399   :  { %2632 = vmatprep.mubr.f32.mxu0 %v5777_v46  ;;  %2753 = vperm.xlu0 %3884, %v2743_v42   ;;  %v5895_v47 = vadd.f32 %v1548_v32, %v1459_v44  ;;  %v2440_v46 = vld [vmem:[#allocation2 + $0x70] sm:$0xff] }
 0x39a   :  { %3696 = vmatmul.mubr.msk.f32.gmra.mxu1 %vm276_vm2, %v5502_v20  ;;  %2926 = vmatprep.subr.mxu0 %v6368_v15  ;;  %v5969_v7 = vpop.f32.mrf.mxu1 }
 0x39b   :  { %2727 = vmatprep.mubr.f32.mxu1 %v6368_v15  ;;  %2763 = vperm.xlu1 %3885, %v2745_v51  }
 0x39c   :  { %2633 = vmatmul.mubr.f32.gmra.mxu0 %v5385_v31  ;;  %2854 = vmatpush1.msra.mxu1 %v2841_v19  ;;  %v2840_v31 = vld [vmem:[%s6329_s11 + $0x70] sm:$0xff]  ;;  %v5975_v49 = vpop.f32.mrf.mxu1 }
 0x39d   :  { %2638 = vmatprep.mubr.f32.mxu0 %v2439_v45  ;;  %v1463_v61 = vpop.f32.mrf.mxu0  ;;  %3235 = vperm.xlu0 %3884, %v3702_v48  }
 0x39e   :  { %3697 = vmatmul.mubr.msk.f32.gmra.mxu1 %vm276_vm2, %v2440_v46  ;;  %v5898_v20 = vadd.f32 %v1552_v6, %v1463_v61  ;;  %2927 = vmatpush1.msra.mxu0 %v2841_v19  ;;  %v5979_v14 = vpop.f32.mrf.mxu1 }
 0x39f   :  { %2855 = vmatprep.subr.mxu1 %v6368_v15  ;;  %2928 = vmatprep.subr.mxu0 %v6368_v15  ;;  %v5945_v17 = vpop.f32.mrf.mxu0 }
 0x3a0   :  { %2639 = vmatmul.mubr.f32.gmra.mxu0 %v2438_v18  ;;  %2856 = vmatpush1.msra.mxu1 %v2840_v31 }
 0x3a1   :  { %2929 = vmatpush1.msra.mxu0 %v2840_v31  ;;  %2857 = vmatprep.subr.mxu1 %v6368_v15 }
 0x3a2   :  { %2930 = vmatprep.subr.mxu0 %v6368_v15  ;;  %2858 = vmatpush1.msra.mxu1 %v2839_v63  ;;  %v5955_v2 = vpop.f32.mrf.mxu0 }
 0x3a3   :  { %2931 = vmatpush1.msra.mxu0 %v2839_v63  ;;  %2859 = vmatprep.subr.mxu1 %v6368_v15 }
 0x3a4   :  { %2932 = vmatprep.subr.mxu0 %v6368_v15  ;;  %2860 = vmatpush1.msra.mxu1 %v2838_v1  ;;  %v5967_v0 = vpop.f32.mrf.mxu0  ;;  %v5994_v56 = vpop.f32.mrf.mxu1 }
 0x3a5   :  { %2933 = vmatpush1.msra.mxu0 %v2838_v1  ;;  %2861 = vmatprep.subr.mxu1 %v6368_v15 }
 0x3a6   :  { %2934 = vmatprep.subr.mxu0 %v6368_v15  ;;  %2862 = vmatpush1.msra.mxu1 %v2837_v23  ;;  %v6008_v25 = vpop.f32.mrf.mxu1 }
 0x3a7   :  { %2935 = vmatpush1.msra.mxu0 %v2837_v23  ;;  %2863 = vmatprep.subr.mxu1 %v6368_v15 }
 0x3a8   :  { %2936 = vmatprep.subr.mxu0 %v6368_v15  ;;  %2864 = vmatpush1.msra.mxu1 %v2836_v22  ;;  %v5973_v53 = vpop.f32.mrf.mxu0 }
 0x3a9   :  { %2937 = vmatpush1.msra.mxu0 %v2836_v22  ;;  %2865 = vmatprep.subr.mxu1 %v6368_v15 }
 0x3aa   :  { %2938 = vmatprep.subr.mxu0 %v6368_v15  ;;  %2866 = vmatpush1.msra.mxu1 %v2835_v4  ;;  %v5977_v50 = vpop.f32.mrf.mxu0 }
 0x3ab   :  { %2939 = vmatpush1.msra.mxu0 %v2835_v4  ;;  %2867 = vmatprep.subr.mxu1 %v6368_v15 }
 0x3ac   :  { %2940 = vmatprep.subr.mxu0 %v6368_v15  ;;  %2868 = vmatpush1.msra.mxu1 %v2834_v8 }
 0x3ad   :  { %2941 = vmatpush1.msra.mxu0 %v2834_v8  ;;  %2869 = vmatprep.subr.mxu1 %v6368_v15 }
 0x3ae   :  { %2942 = vmatprep.subr.mxu0 %v6368_v15  ;;  %2870 = vmatpush1.msra.mxu1 %v2833_v11  ;;  %v5987_v54 = vpop.f32.mrf.mxu0 }
 0x3af   :  { %2943 = vmatpush1.msra.mxu0 %v2833_v11  ;;  %2871 = vmatprep.subr.mxu1 %v6368_v15 }
 0x3b0   :  { %2944 = vmatprep.subr.mxu0 %v6368_v15  ;;  %2872 = vmatpush1.msra.mxu1 %v2832_v10  ;;  %v6001_v58 = vpop.f32.mrf.mxu0 }
 0x3b1   :  { %2945 = vmatpush1.msra.mxu0 %v2832_v10  ;;  %2873 = vmatprep.subr.mxu1 %v6368_v15 }
 0x3b2   :  { %2946 = vmatprep.subr.mxu0 %v6368_v15  ;;  %2874 = vmatpush1.msra.mxu1 %v2831_v16 }
 0x3b3   :  { %2947 = vmatpush1.msra.mxu0 %v2831_v16  ;;  %2875 = vmatprep.subr.mxu1 %v6368_v15  ;;  %v6017_v27 = vpop.f32.mrf.mxu0 }
 0x3b4   :  { %2948 = vmatprep.subr.mxu0 %v6368_v15  ;;  %2876 = vmatpush1.msra.mxu1 %v2830_v5 }
 0x3b5   :  { %2949 = vmatpush1.msra.mxu0 %v2830_v5  ;;  %2877 = vmatprep.subr.mxu1 %v6368_v15  ;;  %v6031_v34 = vpop.f32.mrf.mxu0 }
 0x3b6   :  { %2950 = vmatprep.subr.mxu0 %v6368_v15  ;;  %2878 = vmatpush1.msra.mxu1 %v2829_v9 }
 0x3b7   :  { %2951 = vmatpush1.msra.mxu0 %v2829_v9  ;;  %2879 = vmatprep.subr.mxu1 %v6368_v15 }
 0x3b8   :  { %2952 = vmatprep.subr.mxu0 %v6368_v15  ;;  %2880 = vmatpush1.msra.mxu1 %v2828_v52  ;;  %v6043_v37 = vpop.f32.mrf.mxu0 }
 0x3b9   :  { %2953 = vmatpush1.msra.mxu0 %v2828_v52  ;;  %2881 = vmatprep.subr.mxu1 %v6368_v15 }
 0x3ba   :  { %2954 = vmatprep.subr.mxu0 %v6368_v15  ;;  %2882 = vmatpush1.msra.mxu1 %v2827_v21  ;;  %v6052_v40 = vpop.f32.mrf.mxu0 }
 0x3bb   :  { %2955 = vmatpush1.msra.mxu0 %v2827_v21  ;;  %2883 = vmatprep.subr.mxu1 %v6368_v15 }
 0x3bc   :  { %2956 = vmatprep.subr.mxu0 %v6368_v15  ;;  %2884 = vmatpush1.msra.mxu1 %v2826_v55 }
 0x3bd   :  { %2957 = vmatpush1.msra.mxu0 %v2826_v55  ;;  %2901 = vmatprep.subr.mxu1 %v6368_v15  ;;  %v6054_v24 = vpop.f32.mrf.mxu0 }
 0x3be   :  { %2974 = vmatprep.subr.mxu0 %v6368_v15  ;;  %2902 = vmatpush2.msra.mxu1 %v2849_v57 }
 0x3bf   :  { %2975 = vmatpush2.msra.mxu0 %v2849_v57  ;;  %2903 = vmatprep.subr.mxu1 %v6368_v15  ;;  %v6056_v42 = vpop.f32.mrf.mxu0 }
 0x3c0   :  { %2976 = vmatprep.subr.mxu0 %v6368_v15  ;;  %2904 = vmatpush2.msra.mxu1 %v2848_v59  ;;  %6384 = vst [vmem:[#allocation5_spill] sm:$0xff] %v6056_v42 }
 0x3c1   :  { %2977 = vmatpush2.msra.mxu0 %v2848_v59  ;;  %2905 = vmatprep.subr.mxu1 %v6368_v15 }
 0x3c2   :  { %2978 = vmatprep.subr.mxu0 %v6368_v15  ;;  %2906 = vmatpush2.msra.mxu1 %v2847_v30 }
 0x3c3   :  { %2979 = vmatpush2.msra.mxu0 %v2847_v30  ;;  %2907 = vmatprep.subr.mxu1 %v6368_v15 }
 0x3c4   :  { %2980 = vmatprep.subr.mxu0 %v6368_v15  ;;  %2908 = vmatpush2.msra.mxu1 %v2846_v28 }
 0x3c5   :  { %2981 = vmatpush2.msra.mxu0 %v2846_v28  ;;  %2909 = vmatprep.subr.mxu1 %v6368_v15 }
 0x3c6   :  { %2982 = vmatprep.subr.mxu0 %v6368_v15  ;;  %2910 = vmatpush2.msra.mxu1 %v2845_v29 }
 0x3c7   :  { %2983 = vmatpush2.msra.mxu0 %v2845_v29  ;;  %2911 = vmatprep.subr.mxu1 %v6368_v15 }
 0x3c8   :  { %2984 = vmatprep.subr.mxu0 %v6368_v15  ;;  %2912 = vmatpush2.msra.mxu1 %v2844_v35 }
 0x3c9   :  { %2985 = vmatpush2.msra.mxu0 %v2844_v35  ;;  %2913 = vmatprep.subr.mxu1 %v6368_v15  ;;  %v1555_v35 = vadd.f32 %v5969_v7, %v5945_v17 }
 0x3ca   :  { %2986 = vmatprep.subr.mxu0 %v6368_v15  ;;  %2914 = vmatpush2.msra.mxu1 %v2843_v60 }
 0x3cb   :  { %2987 = vmatpush2.msra.mxu0 %v2843_v60  ;;  %2915 = vmatprep.subr.mxu1 %v6368_v15  ;;  %v1559_v60 = vadd.f32 %v5975_v49, %v5955_v2 }
 0x3cc   :  { %2988 = vmatprep.subr.mxu0 %v6368_v15  ;;  %2916 = vmatpush2.msra.mxu1 %v2842_v39  ;;  %v1561_v15 = vadd.f32 %v5979_v14, %v5967_v0 }
 0x3cd   :  { %2989 = vmatpush2.msra.mxu0 %v2842_v39 }
 0x3dd   :  { %v6015_v38 = vpop.f32.mrf.mxu1 }
 0x3de   :  { %v1645_v39 = vadd.f32 %v6015_v38, %v5890_v13  ;;  %v1567_v38 = vadd.f32 %v6008_v25, %v5977_v50 }
 0x3df   :  { %v6029_v33 = vpop.f32.mrf.mxu1 }
 0x3e0   :  { %v1734_v0 = vadd.f32 %v5987_v54, %v1645_v39 }
 0x3e3   :  { %v1650_v12 = vpop.f32.mrf.mxu1 }
 0x3e5   :  { %v1652_v62 = vpop.f32.mrf.mxu1 }
 0x3e6   :  { %v1653_v17 = vadd.f32 %v1652_v62, %v1555_v35 }
 0x3e8   :  { %v1656_v26 = vpop.f32.mrf.mxu1 }
 0x3e9   :  { %v1657_v7 = vadd.f32 %v1656_v26, %v1559_v60 }
 0x3ea   :  { %v1658_v41 = vpop.f32.mrf.mxu1 }
 0x3eb   :  { %v1746_v62 = vadd.f32 %v6043_v37, %v1657_v7 }
 0x3ed   :  { %v1662_v51 = vpop.f32.mrf.mxu1 }
 0x3ef   :  { %v6058_v43 = vpop.f32.mrf.mxu1 }
 0x3f2   :  { %v2062_v44 = vpop.f32.mrf.mxu1 }
 0x3f4   :  { %v2064_v46 = vpop.f32.mrf.mxu1 }
 0x3f5   :  { %v1973_v3 = vpop.f32.mrf.mxu0 }
 0x3f7   :  { %v1975_v32 = vpop.f32.mrf.mxu0  ;;  %v2068_v61 = vpop.f32.mrf.mxu1 }
 0x3f8   :  { %v2065_v49 = vadd.f32 %v2064_v46, %v1975_v32 }
 0x3f9   :  { %v2070_v19 = vpop.f32.mrf.mxu1 }
 0x3fb   :  { %v1979_v48 = vpop.f32.mrf.mxu0 }
 0x3fc   :  { %v2069_v14 = vadd.f32 %v2068_v61, %v1979_v48 }
 0x3fd   :  { %v1981_v45 = vpop.f32.mrf.mxu0  ;;  %v2074_v63 = vpop.f32.mrf.mxu1 }
 0x3fe   :  { %v2071_v26 = vadd.f32 %v2070_v19, %v1981_v45 }
 0x3ff   :  { %v6068_v23 = vpop.f32.mrf.mxu1 }
 0x401   :  { %v6060_v6 = vpop.f32.mrf.mxu0 }
 0x403   :  { %v6062_v18 = vpop.f32.mrf.mxu0  ;;  %v6070_v4 = vpop.f32.mrf.mxu1 }
 0x405   :  { %v6072_v11 = vpop.f32.mrf.mxu1 }
 0x408   :  { %v6064_v31 = vpop.f32.mrf.mxu0 }
 0x40a   :  { %v6066_v1 = vpop.f32.mrf.mxu0 }
 0x40d   :  { %v2401_v22 = vpop.f32.mrf.mxu0 }
 0x40f   :  { %v2403_v8 = vpop.f32.mrf.mxu0 }
 0x410   :  { %v2749_v46 = vpop.permute.xlu0 %2748 }
 0x412   :  { %v2407_v16 = vpop.f32.mrf.mxu0 }
 0x414   :  { %v2409_v9 = vpop.f32.mrf.mxu0 }
 0x417   :  { %v2413_v55 = vpop.f32.mrf.mxu0 }
 0x419   :  { %v6074_v59 = vpop.f32.mrf.mxu0 }
 0x41a   :  { %6385 = vst [vmem:[#allocation6_spill] sm:$0xff] %v6074_v59  ;;  %v1565_v59 = vadd.f32 %v5994_v56, %v5973_v53 }
 0x41c   :  { %v6080_v29 = vpop.f32.mrf.mxu0  ;;  %v1663_v2 = vadd.f32 %v1662_v51, %v1565_v59 }
 0x41d   :  { %6388 = vst [vmem:[#allocation9_spill] sm:$0xff] %v6080_v29  ;;  %v1647_v29 = vadd.f32 %v6029_v33, %v5895_v47  ;;  %v2063_v47 = vadd.f32 %v2062_v44, %v1973_v3 }
 0x41e   :  { %v2421_v42 = vpop.f32.mrf.mxu0  ;;  %v1752_v50 = vadd.f32 %v6054_v24, %v1663_v2  ;;  %v2077_v24 = vadd.f32 %v6068_v23, %v6062_v18  ;;  %v2754_v2 = vpop.permute.xlu0 %2753 }
 0x41f   :  { %v1736_v53 = vadd.f32 %v6001_v58, %v1647_v29  ;;  %v2085_v61 = vadd.f32 %v2063_v47, %v1734_v0 }
 0x421   :  { %v2086_v54 = vadd.f32 %v2065_v49, %v1736_v53  ;;  %v6391_v35 = vld [vmem:[#allocation6_spill] sm:$0xff]  ;;  %v2759_v49 = vpop.permute.xlu1 %2758 }
 0x43d   :  { %v2312_v10 = vpop.f32.mrf.mxu1 }
 0x43e   :  { %v2402_v25 = vadd.f32 %v2401_v22, %v2312_v10 }
 0x43f   :  { %v2314_v5 = vpop.f32.mrf.mxu1 }
 0x440   :  { %v2404_v33 = vadd.f32 %v2403_v8, %v2314_v5 }
 0x442   :  { %v2425_v37 = vadd.f32 %v2404_v33, %v2086_v54 }
 0x443   :  { %v2318_v52 = vpop.f32.mrf.mxu1 }
 0x445   :  { %v2320_v21 = vpop.f32.mrf.mxu1 }
 0x446   :  { %v2410_v48 = vadd.f32 %v2409_v9, %v2320_v21 }
 0x448   :  { %v2324_v57 = vpop.f32.mrf.mxu1 }
 0x449   :  { %v2414_v5 = vadd.f32 %v2413_v55, %v2324_v57 }
 0x44a   :  { %v6076_v30 = vpop.f32.mrf.mxu1 }
 0x44b   :  { %6386 = vst [vmem:[#allocation7_spill] sm:$0xff] %v6076_v30  ;;  %v1659_v30 = vadd.f32 %v1658_v41, %v1561_v15  ;;  %v1742_v15 = vadd.f32 %v6031_v34, %v1653_v17  ;;  %v2408_v41 = vadd.f32 %v2407_v16, %v2318_v52  ;;  %v2075_v34 = vadd.f32 %v2074_v63, %v6060_v6  ;;  %v6393_v17 = vld [vmem:[#allocation9_spill] sm:$0xff] }
 0x44c   :  { %v2424_v16 = vadd.f32 %v2402_v25, %v2085_v61  ;;  %v2083_v6 = vadd.f32 %v6072_v11, %v6066_v1 }
 0x44d   :  { %v6078_v28 = vpop.f32.mrf.mxu1  ;;  %v1748_v51 = vadd.f32 %v6052_v40, %v1659_v30  ;;  %v2088_v40 = vadd.f32 %v2071_v26, %v1742_v15  ;;  %v2089_v23 = vadd.f32 %v2075_v34, %v1746_v62 }
 0x44e   :  { %6387 = vst [vmem:[#allocation8_spill] sm:$0xff] %v6078_v28  ;;  %v1651_v28 = vadd.f32 %v1650_v12, %v5898_v20 }
 0x44f   :  { %v6088_v36 = vpop.f32.mrf.mxu1  ;;  %v2427_v63 = vadd.f32 %v2410_v48, %v2088_v40  ;;  %v2090_v57 = vadd.f32 %v2077_v24, %v1748_v51 }
 0x450   :  { %v1740_v56 = vadd.f32 %v6017_v27, %v1651_v28  ;;  %v1665_v27 = vadd.f32 %v6058_v43, %v1567_v38  ;;  %v2081_v43 = vadd.f32 %v6070_v4, %v6064_v31  ;;  %v6389_v28 = vld [vmem:[#allocation5_spill] sm:$0xff]  ;;  %v2422_v1 = vadd.f32 %v2421_v42, %v6088_v36 }
 0x452   :  { %v2711_v13 = vpop.f32.mrf.mxu1  ;;  %v2087_v3 = vadd.f32 %v2069_v14, %v1740_v56  ;;  %v1754_v18 = vadd.f32 %v6389_v28, %v1665_v27  ;;  %v6390_v29 = vld [vmem:[#allocation7_spill] sm:$0xff]  ;;  %v2091_v47 = vadd.f32 %v2081_v43, %v1752_v50 }
 0x453   :  { %v2416_v60 = vadd.f32 %v6391_v35, %v6390_v29 }
 0x454   :  { %v2713_v20 = vpop.f32.mrf.mxu1  ;;  %v2622_v12 = vpop.f32.mrf.mxu0  ;;  %v2426_v22 = vadd.f32 %v2408_v41, %v2087_v3  ;;  %v2092_v33 = vadd.f32 %v2083_v6, %v1754_v18 }
 0x455   :  { %v2712_v45 = vadd.f32 %v2711_v13, %v2622_v12  ;;  %v6392_v39 = vld [vmem:[#allocation8_spill] sm:$0xff]  ;;  %v2428_v13 = vadd.f32 %v2414_v5, %v2089_v23  ;;  %v2429_v12 = vadd.f32 %v2416_v60, %v2090_v57 }
 0x456   :  { %v2717_v32 = vpop.f32.mrf.mxu1  ;;  %v2624_v58 = vpop.f32.mrf.mxu0  ;;  %v2420_v7 = vadd.f32 %v6393_v17, %v6392_v39  ;;  %v2431_v41 = vadd.f32 %v2422_v1, %v2092_v33 }
 0x457   :  { %v2714_v44 = vadd.f32 %v2713_v20, %v2624_v58  ;;  %v6121_v31 = vadd.f32 %v2712_v45, %v2424_v16 }
 0x458   :  { %v2719_v19 = vpop.f32.mrf.mxu1  ;;  %v2628_v8 = vpop.f32.mrf.mxu0  ;;  %v2430_v26 = vadd.f32 %v2420_v7, %v2091_v47 }
 0x459   :  { %v2718_v10 = vadd.f32 %v2717_v32, %v2628_v8  ;;  %v6112_v9 = vadd.f32 %v2714_v44, %v2425_v37  ;;  %v2766_v15 = vmul.f32 %v2749_v46, %v6121_v31  ;;  %v2764_v8 = vpop.permute.xlu1 %2763 }
 0x45a   :  { %v2723_v52 = vpop.f32.mrf.mxu1  ;;  %v2630_v21 = vpop.f32.mrf.mxu0 }
 0x45b   :  { %v6116_v59 = vadd.f32 %v2718_v10, %v2426_v22  ;;  %v2720_v30 = vadd.f32 %v2719_v19, %v2630_v21  ;;  %v2767_v38 = vmul.f32 %v2749_v46, %v6112_v9  ;;  %v2796_v37 = vmul.f32 %v2766_v15, %v6121_v31 }
 0x45c   :  { %v2725_v4 = vpop.f32.mrf.mxu1  ;;  %v2634_v55 = vpop.f32.mrf.mxu0 }
 0x45d   :  { %v6126_v11 = vadd.f32 %v2720_v30, %v2427_v63  ;;  %v2768_v0 = vmul.f32 %v2754_v2, %v6116_v59  ;;  %v2724_v14 = vadd.f32 %v2723_v52, %v2634_v55  ;;  %v2797_v25 = vmul.f32 %v2767_v38, %v6112_v9 }
 0x45e   :  { %v2729_v53 = vpop.f32.mrf.mxu1  ;;  %v2636_v56 = vpop.f32.mrf.mxu0  ;;  %v2783_v34 = vsel %vm276_vm2, %v2767_v38, 0.0 }
 0x45f   :  { %v2769_v20 = vmul.f32 %v2754_v2, %v6126_v11  ;;  %v6132_v36 = vadd.f32 %v2724_v14, %v2428_v13  ;;  %v2726_v42 = vadd.f32 %v2725_v4, %v2636_v56  ;;  %v2798_v32 = vmul.f32 %v2768_v0, %v6116_v59 }
 0x460   :  { %v2640_v62 = vpop.f32.mrf.mxu0  ;;  %v2731_v27 = vpop.f32.mrf.mxu1  ;;  %v2774_v48 = vadd.f32 %v2768_v0, %v2766_v15  ;;  %v2813_v21 = vsel %vm276_vm2, %v2797_v25, 0.0 }
 0x461   :  { %v2799_v51 = vmul.f32 %v2769_v20, %v6126_v11  ;;  %v2730_v54 = vadd.f32 %v2729_v53, %v2640_v62  ;;  %v6137_v50 = vadd.f32 %v2726_v42, %v2429_v12  ;;  %v2770_v58 = vmul.f32 %v2759_v49, %v6132_v36 }
 0x462   :  { %v2642_v3 = vpop.f32.mrf.mxu0  ;;  %v2784_v44 = vsel %vm276_vm2, %v2769_v20, 0.0  ;;  %v2804_v16 = vadd.f32 %v2798_v32, %v2796_v37  ;;  %v3009_v37 = vld [vmem:[%s6330_s12 + $0x10] sm:$0xff] }
 0x463   :  { %v6141_v46 = vadd.f32 %v2730_v54, %v2430_v26  ;;  %v2732_v61 = vadd.f32 %v2731_v27, %v2642_v3  ;;  %v2771_v45 = vmul.f32 %v2759_v49, %v6137_v50  ;;  %v2800_v19 = vmul.f32 %v2770_v58, %v6132_v36  ;;  %v3014_v3 = vld [vmem:[%s6330_s12 + $0x38] sm:$0xff] }
 0x464   :  { %v2814_v40 = vsel %vm276_vm2, %v2799_v51, 0.0  ;;  %v2775_v24 = vadd.f32 %v2774_v48, %v2770_v58  ;;  %v2785_v43 = vadd.f32 %v2784_v44, %v2783_v34  ;;  %v6394_v27 = vmov 0.0   ;;  %v3013_v48 = vld [vmem:[%s6330_s12 + $0x30] sm:$0xff]  ;;  %v3012_v44 = vld [vmem:[%s6330_s12 + $0x28] sm:$0xff]  ;;  %3043 = vmatprep.subr.mxu1 %v3014_v3  ;;  %v3010_v34 = vld [vmem:[%s6330_s12 + $0x18] sm:$0xff] }
 0x465   :  { %v6148_v22 = vadd.f32 %v2732_v61, %v2431_v41  ;;  %v2772_v10 = vmul.f32 %v2764_v8, %v6141_v46  ;;  %v2786_v5 = vsel %vm276_vm2, %v2771_v45, 0.0  ;;  %v2801_v52 = vmul.f32 %v2771_v45, %v6137_v50  ;;  %v3011_v61 = vld [vmem:[%s6330_s12 + $0x20] sm:$0xff]  ;;  %v3008_v45 = vld [vmem:[%s6330_s12 + $0x8] sm:$0xff] }
 0x466   :  { %v2815_v28 = vadd.f32 %v2814_v40, %v2813_v21  ;;  %v2787_v18 = vadd.f32 %v2786_v5, %v2785_v43  ;;  %v2805_v23 = vadd.f32 %v2804_v16, %v2800_v19  ;;  %v3007_v19 = vld [vmem:[%s6330_s12] sm:$0xff] }
 0x467   :  { %v2773_v6 = vmul.f32 %v2764_v8, %v6148_v22  ;;  %v2776_v63 = vadd.f32 %v2775_v24, %v2772_v10  ;;  %v2802_v30 = vmul.f32 %v2772_v10, %v6141_v46  ;;  %v2816_v29 = vsel %vm276_vm2, %v2801_v52, 0.0 }
 0x468   :  { %v2817_v55 = vadd.f32 %v2816_v29, %v2815_v28  ;;  %v3219_v29 = vld [vmem:[%s6333_s3 + $0x78] sm:$0xff] }
 0x469   :  { %v2777_v35 = vrot.slane %v2776_v63, 4  ;;  %v2788_v60 = vsel %vm276_vm2, %v2773_v6, 0.0  ;;  %v2803_v4 = vmul.f32 %v2773_v6, %v6148_v22  ;;  %v2806_v39 = vadd.f32 %v2805_v23, %v2802_v30  ;;  %v3000_v6 = vld [vmem:[%s6331_s6] sm:$0x1] }
 0x46a   :  { %v2789_v57 = vadd.f32 %v2788_v60, %v2787_v18  ;;  %v3004_v18 = vld [vmem:[%s6332_s7] sm:$0x1]  ;;  %v3217_v60 = vld [vmem:[%s6333_s3 + $0x68] sm:$0xff] }
 0x46b   :  { %v2778_v17 = vadd.f32 %v2777_v35, %v2776_v63  ;;  %v2818_v7 = vsel %vm276_vm2, %v2803_v4, 0.0  ;;  %v2807_v2 = vrot.slane %v2806_v39, 4  ;;  %v3218_v35 = vld [vmem:[%s6333_s3 + $0x70] sm:$0xff]  ;;  %v3216_v4 = vld [vmem:[%s6333_s3 + $0x60] sm:$0xff] }
 0x46c   :  { %v2790_v1 = vrot.slane %v2789_v57, 4  ;;  %v2819_v49 = vadd.f32 %v2818_v7, %v2817_v55  ;;  %v3215_v55 = vld [vmem:[%s6333_s3 + $0x58] sm:$0xff] }
 0x46d   :  { %v2779_v13 = vrot.slane %v2778_v17, 2  ;;  %v2808_v0 = vadd.f32 %v2807_v2, %v2806_v39  ;;  %v3213_v39 = vld [vmem:[%s6333_s3 + $0x48] sm:$0xff]  ;;  %v3211_v7 = vld [vmem:[%s6333_s3 + $0x38] sm:$0xff] }
 0x46e   :  { %v2791_v38 = vadd.f32 %v2790_v1, %v2789_v57  ;;  %v2820_v14 = vrot.slane %v2819_v49, 4  ;;  %v3214_v57 = vld [vmem:[%s6333_s3 + $0x50] sm:$0xff]  ;;  %v3209_v2 = vld [vmem:[%s6333_s3 + $0x28] sm:$0xff] }
 0x46f   :  { %v2780_v53 = vadd.f32 %v2779_v13, %v2778_v17  ;;  %v2809_v47 = vrot.slane %v2808_v0, 2  ;;  %v3212_v17 = vld [vmem:[%s6333_s3 + $0x40] sm:$0xff]  ;;  %v3210_v1 = vld [vmem:[%s6333_s3 + $0x30] sm:$0xff]  ;;  %v3207_v13 = vld [vmem:[%s6333_s3 + $0x18] sm:$0xff] }
 0x470   :  { %v2792_v56 = vrot.slane %v2791_v38, 2  ;;  %v2821_v33 = vadd.f32 %v2820_v14, %v2819_v49  ;;  %v3208_v49 = vld [vmem:[%s6333_s3 + $0x20] sm:$0xff] }
 0x471   :  { %v2810_v12 = vadd.f32 %v2809_v47, %v2808_v0  ;;  %v2781_v42 = vrot.slane %v2780_v53, 1  ;;  %v3205_v0 = vld [vmem:[%s6333_s3 + $0x8] sm:$0xff]  ;;  %v3204_v14 = vld [vmem:[%s6333_s3] sm:$0xff] }
 0x472   :  { %v2793_v20 = vadd.f32 %v2792_v56, %v2791_v38  ;;  %v2822_v15 = vrot.slane %v2821_v33, 2  ;;  %v3206_v38 = vld [vmem:[%s6333_s3 + $0x10] sm:$0xff]  ;;  %v3225_v47 = vld [vmem:[%s6333_s3 + $0xa8] sm:$0xff] }
 0x473   :  { %v2811_v41 = vrot.slane %v2810_v12, 1  ;;  %v2782_v25 = vadd.f32 %v2781_v42, %v2780_v53  ;;  %v3227_v53 = vld [vmem:[%s6333_s3 + $0xb8] sm:$0xff]  ;;  %v3226_v56 = vld [vmem:[%s6333_s3 + $0xb0] sm:$0xff]  ;;  %v3220_v42 = vld [vmem:[%s6333_s3 + $0x80] sm:$0xff] }
 0x474   :  { %v2794_v62 = vrot.slane %v2793_v20, 1  ;;  %v2823_v26 = vadd.f32 %v2822_v15, %v2821_v33  ;;  %v3224_v33 = vld [vmem:[%s6333_s3 + $0xa0] sm:$0xff]  ;;  %v3221_v15 = vld [vmem:[%s6333_s3 + $0x88] sm:$0xff] }
 0x475   :  { %v2812_v58 = vadd.f32 %v2811_v41, %v2810_v12  ;;  %v3222_v12 = vld [vmem:[%s6333_s3 + $0x90] sm:$0xff]  ;;  %v6395_v41 = vld [vmem:[#allocation4_spill] sm:$0xff] }
 0x476   :  { %v2795_v51 = vadd.f32 %v2794_v62, %v2793_v20  ;;  %v2824_v54 = vrot.slane %v2823_v26, 1  ;;  %v3223_v20 = vld [vmem:[%s6333_s3 + $0x98] sm:$0xff] }
 0x478   :  { %3698 = vmatprep.mubr.msk.f32.mxu1 %vm276_vm2, %v2795_v51  ;;  %v2825_v32 = vadd.f32 %v2824_v54, %v2823_v26 }
 0x479   :  { %2918 = vmatmul.mubr.f32.vlgmr.msra.gmra.mxu1 %v2782_v25 }
 0x47a   :  { %3699 = vmatprep.mubr.msk.f32.mxu0 %vm276_vm2, %v2825_v32  ;;  %3083 = vmatprep.mubr.f32.mxu1 %v6394_v27 }
 0x47b   :  { %2991 = vmatmul.mubr.f32.vlgmr.msra.gmra.mxu0 %v2812_v58  ;;  %3044 = vmatpush1.msra.mxu1 %v3013_v48 }
 0x47c   :  { %3045 = vmatprep.subr.mxu1 %v3012_v44 }
 0x47d   :  { %3046 = vmatpush1.msra.mxu1 %v3011_v61 }
 0x47e   :  { %3047 = vmatprep.subr.mxu1 %v3010_v34 }
 0x47f   :  { %3048 = vmatpush1.msra.mxu1 %v3009_v37 }
 0x480   :  { %3049 = vmatprep.subr.mxu1 %v3008_v45 }
 0x481   :  { %3050 = vmatpush1.msra.mxu1 %v3007_v19 }
 0x482   :  { %3117 = vmatprep.subr.mxu1 %v3014_v3 }
 0x539   :  { %v2919_v8 = vpop.f32.mrf.mxu1 }
 0x53a   :  { %v2996_v40 = vmul.f32 0.013888889, %v2919_v8 }
 0x53b   :  { %v2921_v24 = vpop.f32.mrf.mxu1  ;;  %v2992_v10 = vpop.f32.mrf.mxu0 }
 0x53c   :  { %v2998_v43 = vmul.f32 %v2996_v40, %v2996_v40  ;;  %v2997_v16 = vmul.f32 0.013888889, %v2992_v10 }
 0x53d   :  { %v2994_v5 = vpop.f32.mrf.mxu0 }
 0x53e   :  { %v2999_v52 = vsub.f32 %v2997_v16, %v2998_v43 }
 0x540   :  { %v3001_v21 = vadd.f32 1e-05, %v2999_v52 }
 0x542   :  { %3888 = vrsqrt.f32 %v3001_v21 }
 0x54f   :  { %v3889_v63 = vpop.eup %3888 }
 0x550   :  { %v3003_v30 = vmul.f32 %v3889_v63, %v3000_v6 }
 0x552   :  { %3700 = vmatmul.mubr.msk.f32.vlgmr.msra.gmra.mxu1 %vm3015_vm1, %v3003_v30  ;;  %v3005_v28 = vmul.f32 %v3003_v30, %v2996_v40 }
 0x553   :  { %3118 = vmatpush1.msra.mxu1 %v3013_v48  ;;  %3157 = vmatprep.mubr.f32.mxu1 %v6394_v27 }
 0x554   :  { %3119 = vmatprep.subr.mxu1 %v3012_v44  ;;  %v3006_v23 = vsub.f32 %v3004_v18, %v3005_v28 }
 0x555   :  { %3120 = vmatpush1.msra.mxu1 %v3011_v61 }
 0x556   :  { %3121 = vmatprep.subr.mxu1 %v3010_v34 }
 0x557   :  { %3122 = vmatpush1.msra.mxu1 %v3009_v37 }
 0x558   :  { %3123 = vmatprep.subr.mxu1 %v3008_v45 }
 0x559   :  { %3124 = vmatpush1.msra.mxu1 %v3007_v19 }
 0x55a   :  { %3701 = vmatmul.mubr.msk.f32.vlgmr.msra.gmra.mxu1 %vm3015_vm1, %v3006_v23  ;;  %3250 = vmatprep.subr.mxu1 %v6394_v27 }
 0x55b   :  { %3251 = vmatpush1.msra.mxu1 %v3219_v29 }
 0x55c   :  { %3252 = vmatprep.subr.mxu1 %v6394_v27 }
 0x55d   :  { %3253 = vmatpush1.msra.mxu1 %v3218_v35 }
 0x55e   :  { %3254 = vmatprep.subr.mxu1 %v6394_v27 }
 0x55f   :  { %3255 = vmatpush1.msra.mxu1 %v3217_v60 }
 0x560   :  { %3256 = vmatprep.subr.mxu1 %v6394_v27 }
 0x561   :  { %3257 = vmatpush1.msra.mxu1 %v3216_v4 }
 0x562   :  { %3258 = vmatprep.subr.mxu1 %v6394_v27 }
 0x563   :  { %3259 = vmatpush1.msra.mxu1 %v3215_v55 }
 0x564   :  { %3260 = vmatprep.subr.mxu1 %v6394_v27 }
 0x565   :  { %3261 = vmatpush1.msra.mxu1 %v3214_v57 }
 0x566   :  { %3262 = vmatprep.subr.mxu1 %v6394_v27 }
 0x567   :  { %3263 = vmatpush1.msra.mxu1 %v3213_v39 }
 0x568   :  { %3264 = vmatprep.subr.mxu1 %v6394_v27 }
 0x569   :  { %3265 = vmatpush1.msra.mxu1 %v3212_v17 }
 0x56a   :  { %3266 = vmatprep.subr.mxu1 %v6394_v27 }
 0x56b   :  { %3267 = vmatpush1.msra.mxu1 %v3211_v7 }
 0x56c   :  { %3268 = vmatprep.subr.mxu1 %v6394_v27 }
 0x56d   :  { %3269 = vmatpush1.msra.mxu1 %v3210_v1 }
 0x56e   :  { %3270 = vmatprep.subr.mxu1 %v6394_v27 }
 0x56f   :  { %3271 = vmatpush1.msra.mxu1 %v3209_v2 }
 0x570   :  { %3272 = vmatprep.subr.mxu1 %v6394_v27 }
 0x571   :  { %3273 = vmatpush1.msra.mxu1 %v3208_v49 }
 0x572   :  { %3274 = vmatprep.subr.mxu1 %v6394_v27 }
 0x573   :  { %3275 = vmatpush1.msra.mxu1 %v3207_v13 }
 0x574   :  { %3276 = vmatprep.subr.mxu1 %v6394_v27 }
 0x575   :  { %3277 = vmatpush1.msra.mxu1 %v3206_v38 }
 0x576   :  { %3278 = vmatprep.subr.mxu1 %v6394_v27 }
 0x577   :  { %3279 = vmatpush1.msra.mxu1 %v3205_v0 }
 0x578   :  { %3280 = vmatprep.subr.mxu1 %v6394_v27 }
 0x579   :  { %3281 = vmatpush1.msra.mxu1 %v3204_v14 }
 0x57a   :  { %3298 = vmatprep.subr.mxu1 %v6394_v27 }
 0x57b   :  { %3299 = vmatpush2.msra.mxu1 %v3227_v53 }
 0x57c   :  { %3300 = vmatprep.subr.mxu1 %v6394_v27 }
 0x57d   :  { %3301 = vmatpush2.msra.mxu1 %v3226_v56 }
 0x57e   :  { %3302 = vmatprep.subr.mxu1 %v6394_v27 }
 0x57f   :  { %3303 = vmatpush2.msra.mxu1 %v3225_v47 }
 0x580   :  { %3304 = vmatprep.subr.mxu1 %v6394_v27 }
 0x581   :  { %3305 = vmatpush2.msra.mxu1 %v3224_v33 }
 0x582   :  { %3306 = vmatprep.subr.mxu1 %v6394_v27 }
 0x583   :  { %3307 = vmatpush2.msra.mxu1 %v3223_v20 }
 0x584   :  { %3308 = vmatprep.subr.mxu1 %v6394_v27 }
 0x585   :  { %3309 = vmatpush2.msra.mxu1 %v3222_v12 }
 0x586   :  { %3310 = vmatprep.subr.mxu1 %v6394_v27 }
 0x587   :  { %3311 = vmatpush2.msra.mxu1 %v3221_v15 }
 0x588   :  { %3312 = vmatprep.subr.mxu1 %v6394_v27 }
 0x589   :  { %3313 = vmatpush2.msra.mxu1 %v3220_v42 }
 0x612   :  { %v3085_v62 = vpop.f32.mrf.mxu1 }
 0x613   :  { %v3167_v51 = vrot.slane %v3085_v62, %v6395_v41 }
 0x614   :  { %v3087_v26 = vpop.f32.mrf.mxu1 }
 0x615   :  { %v3171_v54 = vrot.slane %v3087_v26, %v6395_v41  ;;  %v3172_v58 = vmul.f32 %v3167_v51, %v6121_v31  ;;  %v3174_v45 = vmul.f32 %v3167_v51, %v6116_v59 }
 0x617   :  { %v3173_v48 = vmul.f32 %v3171_v54, %v6112_v9  ;;  %v3175_v44 = vmul.f32 %v3171_v54, %v6126_v11  ;;  %v3177_v19 = vmul.f32 %v3171_v54, %v6137_v50  ;;  %v3176_v9 = vmul.f32 %v3167_v51, %v6132_v36 }
 0x618   :  { %v3179_v11 = vmul.f32 %v3171_v54, %v6148_v22  ;;  %v3178_v50 = vmul.f32 %v3167_v51, %v6141_v46  ;;  %v3236_v22 = vpop.permute.xlu0 %3235 }
 0x61a   :  { %v3159_v25 = vpop.f32.mrf.mxu1 }
 0x61b   :  { %v3183_v32 = vrot.slane %v3159_v25, %v6395_v41 }
 0x61c   :  { %v3161_v3 = vpop.f32.mrf.mxu1 }
 0x61d   :  { %v3187_v61 = vrot.slane %v3161_v3, %v6395_v41  ;;  %v3188_v27 = vadd.f32 %v3183_v32, %v3172_v58  ;;  %v3190_v24 = vadd.f32 %v3183_v32, %v3174_v45  ;;  %v3192_v16 = vadd.f32 %v3183_v32, %v3176_v9 }
 0x61e   :  { %v3194_v21 = vadd.f32 %v3183_v32, %v3178_v50 }
 0x61f   :  { %v3189_v34 = vadd.f32 %v3187_v61, %v3173_v48  ;;  %v3191_v37 = vadd.f32 %v3187_v61, %v3175_v44  ;;  %v3196_v40 = vmax.f32 %v3188_v27, 0.0  ;;  %v3193_v10 = vadd.f32 %v3187_v61, %v3177_v19 }
 0x620   :  { %v3198_v43 = vmax.f32 %v3190_v24, 0.0  ;;  %v3195_v59 = vadd.f32 %v3187_v61, %v3179_v11  ;;  %v3200_v52 = vmax.f32 %v3192_v16, 0.0  ;;  %v3202_v36 = vmax.f32 %v3194_v21, 0.0 }
 0x621   :  { %v3197_v8 = vmax.f32 %v3189_v34, 0.0  ;;  %v3199_v31 = vmax.f32 %v3191_v37, 0.0  ;;  %v3201_v5 = vmax.f32 %v3193_v10, 0.0 }
 0x622   :  { %v3203_v6 = vmax.f32 %v3195_v59, 0.0 }
 0x623   :  { %3703 = vmatprep.mubr.msk.f32.mxu1 %vm276_vm2, %v3197_v8 }
 0x624   :  { %3315 = vmatmul.mubr.f32.vlgmr.msra.gmra.mxu1 %v3196_v40 }
 0x625   :  { %3704 = vmatprep.mubr.msk.f32.mxu1 %vm276_vm2, %v3199_v31 }
 0x628   :  { %3320 = vmatmul.mubr.f32.gmra.mxu1 %v3198_v43 }
 0x629   :  { %3705 = vmatprep.mubr.msk.f32.mxu1 %vm276_vm2, %v3201_v5 }
 0x62c   :  { %3325 = vmatmul.mubr.f32.gmra.mxu1 %v3200_v52 }
 0x62d   :  { %3706 = vmatprep.mubr.msk.f32.mxu1 %vm276_vm2, %v3203_v6 }
 0x630   :  { %3330 = vmatmul.mubr.f32.gmra.mxu1 %v3202_v36 }
 0x6e4   :  { %v3316_v63 = vpop.f32.mrf.mxu1 }
 0x6e5   :  { %v3317_v30 = vadd.f32 %v3316_v63, %v3236_v22 }
 0x6e6   :  { %v3318_v28 = vpop.f32.mrf.mxu1 }
 0x6e7   :  { %3336 = vst.msk [vmem:[%s6334_s14] sm:$0xff] %vm3335_vm3, %v3317_v30 }
 0x6e8   :  { %v3321_v46 = vpop.f32.mrf.mxu1 }
 0x6e9   :  { %v3322_v18 = vadd.f32 %v3321_v46, %v3236_v22 }
 0x6ea   :  { %v3323_v23 = vpop.f32.mrf.mxu1 }
 0x6eb   :  { %3337 = vst.msk [vmem:[%s6334_s14 + $0x8] sm:$0xff] %vm3335_vm3, %v3322_v18 }
 0x6ec   :  { %v3326_v29 = vpop.f32.mrf.mxu1 }
 0x6ed   :  { %v3327_v35 = vadd.f32 %v3326_v29, %v3236_v22 }
 0x6ee   :  { %v3328_v60 = vpop.f32.mrf.mxu1 }
 0x6ef   :  { %3338 = vst.msk [vmem:[%s6334_s14 + $0x10] sm:$0xff] %vm3335_vm3, %v3327_v35 }
 0x6f0   :  { %v3331_v4 = vpop.f32.mrf.mxu1 }
 0x6f1   :  { %v3332_v55 = vadd.f32 %v3331_v4, %v3236_v22 }
 0x6f2   :  { %v3333_v57 = vpop.f32.mrf.mxu1 }
 0x6f3   :  { %3339 = vst.msk [vmem:[%s6334_s14 + $0x18] sm:$0xff] %vm3335_vm3, %v3332_v55 }

</bundles_post_ra>
